<compile_context>
chip_gen: v7x
topology: tpu7x:2x2x1
jax: 0.10.0
libtpu: 0.0.40
codegen_flags: <defaults>
</compile_context>

<pallas_src>
import numpy as np
import jax
import jax.numpy as jnp
from jax.experimental import pallas as pl
from jax.experimental.pallas import tpu as pltpu

CFG = dict(seq_len=16, pred_len=16, week_t=1, enc_in=4, patch_len=4,
           d_model=32, out_channel=8, cnn_kernel=3, pooling_size=2,
           conv=1, dropout=0.1)


def _dims(cfg):
    L = cfg['seq_len']; C = cfg['enc_in']; K = cfg['cnn_kernel']
    O = cfg['out_channel']; P = cfg['pooling_size']
    LCNN = L - K + 1
    LP = LCNN // P
    W = cfg['patch_len']; D = cfg['d_model']
    N = cfg['seq_len'] // W
    M = cfg['pred_len'] // W
    S = cfg['seq_len']
    return L, C, K, O, P, LCNN, LP, W, D, N, M, S


def _round_up(v, m):
    return ((v + m - 1) // m) * m


# --------------------------------------------------------------------------
# Pallas kernel: one grid step = TB batch rows; 2D, reshape-free.
# --------------------------------------------------------------------------
def make_kernel(cfg, TB, LPO_PAD):
    L, C, K, O, P, LCNN, LP, W, D, N, M, S = _dims(cfg)
    f32 = jnp.float32
    MD = M * D

    def sigmoid(v):
        # one EUP push (tanh) + VPU mul/add instead of exp + reciprocal (2 pushes).
        return 0.5 * jnp.tanh(0.5 * v) + 0.5

    def kernel(x_ref, wconv_ref, bconv_ref, wfuse_ref, bfuse_ref,
               wihblk_ref, eball_ref, ewhh_ref,
               wdec_ref, xgdec_ref, wre_ref, bre_ref, out_ref):
        x = x_ref[...]                                            # (TB, L*C)

        # ---- Conv1d + BN(eval) + ReLU + MaxPool: ONE Toeplitz matmul, pooling
        #      offsets in lane halves -> half-max (XLU) + ReLU.
        cv = jnp.dot(x, wconv_ref[...], preferred_element_type=f32) + bconv_ref[...]
        pooled = cv[:, 0:LPO_PAD]
        for p in range(1, P):                                     # P small & static
            pooled = jnp.maximum(pooled, cv[:, p * LPO_PAD:(p + 1) * LPO_PAD])
        pooled = jnp.maximum(pooled, 0.0)                         # (TB, LPO_PAD)

        # ---- linear_patch_cnn o reshape o linear_patch (fused) + ReLU
        xin_all = jnp.maximum(
            jnp.dot(pooled, wfuse_ref[...], preferred_element_type=f32)
            + bfuse_ref[...], 0.0)                                # (TB, N*D)

        # ---- hoisted x-side encoder gates for ALL N steps (+ biases): one matmul
        gx = (jnp.dot(xin_all, wihblk_ref[...], preferred_element_type=f32)
              + eball_ref[...])                                   # (TB, N*4*D)

        # ---- encoder LSTM recurrence: only h @ Whh stays in the serial chain
        ewhh = ewhh_ref[...]                                      # (D, 4D)
        h = None
        c = None
        for n in range(N):                                        # N small & static
            g = gx[:, n * 4 * D:(n + 1) * 4 * D]
            if n > 0:
                g = g + jnp.dot(h, ewhh, preferred_element_type=f32)
            i_g = sigmoid(g[:, 0:D])
            g_g = jnp.tanh(g[:, 2 * D:3 * D])
            o_g = sigmoid(g[:, 3 * D:4 * D])
            if n == 0:
                c = i_g * g_g                                     # f_g * c0 == 0
            else:
                f_g = sigmoid(g[:, D:2 * D])
                c = f_g * c + i_g * g_g
            h = o_g * jnp.tanh(c)

        # ---- decoder LSTM (single step; all M output patches in lanes, gate-major
        #      (gate, m, d) layout).  h@Whh and c-replication merged into one matmul
        #      on [h | c]; x-side gate contributions + biases pre-baked into xgdec.
        hc = jnp.concatenate([h, c], axis=-1)                     # (TB, 2D)
        gc = jnp.dot(hc, wdec_ref[...], preferred_element_type=f32)   # (TB, 5*M*D)
        g = gc[:, 0:4 * MD] + xgdec_ref[...]
        c_rep = gc[:, 4 * MD:5 * MD]
        i_g = sigmoid(g[:, 0:MD])
        f_g = sigmoid(g[:, MD:2 * MD])
        g_g = jnp.tanh(g[:, 2 * MD:3 * MD])
        o_g = sigmoid(g[:, 3 * MD:4 * MD])
        c_d = f_g * c_rep + i_g * g_g
        h_d = o_g * jnp.tanh(c_d)                                 # (TB, M*D), lane=m*D+d

        # ---- linear_patch_re as block-diagonal matmul + final ReLU
        #      (dropout is identity in eval mode)
        yw = jnp.dot(h_d, wre_ref[...], preferred_element_type=f32) + bre_ref[...]
        out_ref[...] = jnp.maximum(yw, 0.0)
        # TODO(synk): output block is only pred_len=16 lanes wide (masked vst);
        # packing 8 batch rows per output row would make the store lane-dense but
        # needs an in-kernel sublane->lane relayout -- bounded win at this size.

    return kernel


# --------------------------------------------------------------------------
# Wrapper: weight folding / re-layout (pure XLA glue) + batch-tiled pallas_call
# --------------------------------------------------------------------------
def cnn_seg_lstm_forward(x, params, cfg, block_b=256):
    B = x.shape[0]
    L, C, K, O, P, LCNN, LP, W, D, N, M, S = _dims(cfg)
    f32 = jnp.float32
    eps = 1e-5
    LPO = LP * O
    LPO_PAD = _round_up(LPO, 64)         # 56 -> 64: lane / contraction alignment
    MD = M * D

    # -- Conv1d + BN(eval): fold BN scale into the taps; one Toeplitz block per
    #    pooling offset, padded to LPO_PAD cols and lane-concatenated -> ONE matmul.
    scale = params['bn_gamma'] / jnp.sqrt(params['bn_var'] + eps)            # (O,)
    wck = params['conv_w'].astype(f32) * scale[:, None, None]                # (O,C,K)
    sel = np.zeros((P, L, LP, K), np.float32)
    for p in range(P):
        for lp in range(LP):
            for k in range(K):
                sel[p, lp * P + p + k, lp, k] = 1.0
    wconv = jnp.einsum('plnk,ock->plcno', jnp.asarray(sel), wck)
    wconv = wconv.reshape(P, L * C, LPO)
    wconv = jnp.pad(wconv, ((0, 0), (0, 0), (0, LPO_PAD - LPO)))
    wconv_cat = jnp.concatenate([wconv[p] for p in range(P)], axis=-1)       # (L*C, P*LPO_PAD)
    bconv = ((params['conv_b'] - params['bn_mean']) * scale + params['bn_beta'])
    bconv = jnp.tile(bconv[None, :], (LP, 1)).reshape(LPO)
    bconv = jnp.pad(bconv, (0, LPO_PAD - LPO))
    bconv_cat = jnp.tile(bconv[None, :], (1, P))                             # (1, P*LPO_PAD)

    # -- linear_patch_cnn o reshape(B,N,W) o linear_patch: fused to one matrix,
    #    rows padded 56->64 to match the padded pooled tile (zeros cost nothing).
    A = params['lpc_w'].reshape(S, O, LP).transpose(0, 2, 1).reshape(S, LPO)
    wfuse = jnp.einsum('nwj,dw->jnd', A.reshape(N, W, LPO),
                       params['lp_w']).reshape(LPO, N * D)
    wfuse = jnp.pad(wfuse, ((0, LPO_PAD - LPO), (0, 0)))                     # (LPO_PAD, N*D)
    bfuse = (jnp.einsum('nw,dw->nd', params['lpc_b'].reshape(N, W), params['lp_w'])
             + params['lp_b'][None, :]).reshape(1, N * D)

    # -- encoder LSTM: block-diag x-side matrix (all N steps' x-gates in one matmul)
    ewih_t = params['enc_wih'].T                                             # (D, 4D)
    wihblk = jnp.einsum('nm,dg->ndmg', jnp.eye(N, dtype=f32),
                        ewih_t).reshape(N * D, N * 4 * D)                    # (N*D, N*4D)
    eb = (params['enc_bih'] + params['enc_bhh'])[None, :]                    # (1, 4D)
    eball = jnp.tile(eb, (1, N))                                             # (1, N*4D)
    ewhh = params['enc_whh'].T                                               # (D, 4D)

    # -- decoder LSTM: x-side gate contributions are batch-independent -> precompute,
    #    gate-major (gate, m, d) layout.  Merge h@Whh and c-replication into one
    #    block matrix applied to [h | c].
    dec_x = jnp.concatenate(
        [params['pos_emb'],
         jnp.broadcast_to(params['channel_emb'], (M, D // 2))], axis=-1)     # (M, D)
    xg = dec_x @ params['dec_wih'].T + (params['dec_bih'] + params['dec_bhh'])
    xgdec = xg.reshape(M, 4, D).transpose(1, 0, 2).reshape(1, 4 * MD)
    dwhh_big = jnp.tile(params['dec_whh'].T.reshape(D, 4, 1, D),
                        (1, 1, M, 1)).reshape(D, 4 * MD)
    crep = jnp.tile(jnp.eye(D, dtype=f32), (1, M))                           # (D, M*D)
    wdec = jnp.zeros((2 * D, 5 * MD), f32)
    wdec = wdec.at[:D, :4 * MD].set(dwhh_big)
    wdec = wdec.at[D:, 4 * MD:].set(crep)                                    # (2D, 5*M*D)

    # -- linear_patch_re as block-diagonal matmul -> (TB, pred_len) output
    wre_big = jnp.einsum('mk,dw->mdkw', jnp.eye(M, dtype=f32),
                         params['re_w'].T).reshape(MD, M * W)
    bre_big = jnp.tile(params['re_b'][None, :], (M, 1)).reshape(1, M * W)

    weights = [wconv_cat, bconv_cat, wfuse, bfuse, wihblk, eball, ewhh,
               wdec, xgdec, wre_big, bre_big]
    weights = [w.astype(f32) for w in weights]
    # TODO(synk): on v6e/v7x the static-weight matmuls could run in bf16 for 2x MXU
    # throughput; skipped because the kernel is EUP/overhead bound, not MXU bound.

    # -- batch tiling: TB rows per grid step (sublane-aligned); keep >= 2 grid blocks
    #    when the batch allows so both v7x TensorCores get work on the parallel axis.
    B8 = _round_up(B, 8)
    TB = max(8, min(_round_up(block_b, 8), B8))
    if (B8 + TB - 1) // TB < 2 and B8 >= 16:
        TB = _round_up((B8 + 1) // 2, 8)
    Bpad = _round_up(B8, TB)

    x_flat = x.reshape(B, L * C).astype(f32)
    if Bpad != B:
        x_flat = jnp.pad(x_flat, ((0, Bpad - B), (0, 0)))

    def w_spec(a):
        return pl.BlockSpec(a.shape, lambda b: (0, 0))

    in_specs = ([pl.BlockSpec((TB, L * C), lambda b: (b, 0))]
                + [w_spec(w) for w in weights])

    out = pl.pallas_call(
        make_kernel(cfg, TB, LPO_PAD),
        out_shape=jax.ShapeDtypeStruct((Bpad, M * W), f32),
        grid=(Bpad // TB,),
        in_specs=in_specs,
        out_specs=pl.BlockSpec((TB, M * W), lambda b: (b, 0)),
        compiler_params=pltpu.CompilerParams(
            dimension_semantics=("parallel",)),
    )(x_flat, *weights)

    return out[:B]                                                           # (B, pred_len)


# --------------------------------------------------------------------------
# Deterministic parameter init (shapes from the module's __init__)
# --------------------------------------------------------------------------
def init_params(cfg, key):
    L, C, K, O, P, LCNN, LP, W, D, N, M, S = _dims(cfg)
    ks = jax.random.split(key, 24)
    n = lambda k, shape, s=0.1: s * jax.random.normal(k, shape, dtype=jnp.float32)
    return dict(
        conv_w=n(ks[0], (O, C, K)),
        conv_b=n(ks[1], (O,)),
        bn_gamma=1.0 + n(ks[2], (O,)),
        bn_beta=n(ks[3], (O,)),
        bn_mean=n(ks[4], (O,)),
        bn_var=1.0 + 0.1 * jnp.abs(jax.random.normal(ks[5], (O,), dtype=jnp.float32)),
        lpc_w=n(ks[6], (S, O * LP)),
        lpc_b=n(ks[7], (S,)),
        lp_w=n(ks[8], (D, W)),
        lp_b=n(ks[9], (D,)),
        enc_wih=n(ks[10], (4 * D, D)),
        enc_whh=n(ks[11], (4 * D, D)),
        enc_bih=n(ks[12], (4 * D,)),
        enc_bhh=n(ks[13], (4 * D,)),
        dec_wih=n(ks[14], (4 * D, D)),
        dec_whh=n(ks[15], (4 * D, D)),
        dec_bih=n(ks[16], (4 * D,)),
        dec_bhh=n(ks[17], (4 * D,)),
        pos_emb=n(ks[18], (M, D // 2), 1.0),
        channel_emb=n(ks[19], (1, D // 2), 1.0),
        re_w=n(ks[20], (W, D)),
        re_b=n(ks[21], (W,)),
    )


# --------------------------------------------------------------------------
# Pure-JAX reference mirroring the PyTorch forward (original weight layouts)
# --------------------------------------------------------------------------
def reference_forward(x, params, cfg):
    B, L, C = x.shape
    _, _, K, O, P, LCNN, LP, W, D, N, M, S = _dims(cfg)
    eps = 1e-5

    xc = jnp.transpose(x, (0, 2, 1))                          # (B, C, L)
    conv = jax.lax.conv_general_dilated(
        xc, params['conv_w'], window_strides=(1,), padding='VALID',
        dimension_numbers=('NCH', 'OIH', 'NCH'))
    conv = conv + params['conv_b'][None, :, None]
    bn = ((conv - params['bn_mean'][None, :, None])
          / jnp.sqrt(params['bn_var'] + eps)[None, :, None]
          * params['bn_gamma'][None, :, None]
          + params['bn_beta'][None, :, None])
    act = jnp.maximum(bn, 0.0)
    pooled = act[:, :, :LP * P].reshape(B, O, LP, P).max(axis=-1)
    feat = pooled.reshape(B, O * LP)
    cnn_out = feat @ params['lpc_w'].T + params['lpc_b']
    seg_w = cnn_out.reshape(B, N, W)
    seg_d = seg_w @ params['lp_w'].T + params['lp_b']
    enc_in = jnp.maximum(seg_d, 0.0)

    def cell(x_t, h, c, wih, whh, bih, bhh):
        gates = x_t @ wih.T + h @ whh.T + bih + bhh
        i = jax.nn.sigmoid(gates[:, :D])
        f = jax.nn.sigmoid(gates[:, D:2 * D])
        g = jnp.tanh(gates[:, 2 * D:3 * D])
        o = jax.nn.sigmoid(gates[:, 3 * D:])
        c = f * c + i * g
        h = o * jnp.tanh(c)
        return h, c

    h = jnp.zeros((B, D)); c = jnp.zeros((B, D))
    for t in range(N):
        h, c = cell(enc_in[:, t, :], h, c, params['enc_wih'], params['enc_whh'],
                    params['enc_bih'], params['enc_bhh'])
    h_rep = jnp.repeat(h, M, axis=0)
    c_rep = jnp.repeat(c, M, axis=0)
    pos = jnp.broadcast_to(params['pos_emb'][None], (B, M, D // 2))
    ch = jnp.broadcast_to(params['channel_emb'][:, None, :], (B, M, D // 2))
    dec_in = jnp.concatenate([pos, ch], axis=-1).reshape(B * M, D)
    h_d, _ = cell(dec_in, h_rep, c_rep, params['dec_wih'], params['dec_whh'],
                  params['dec_bih'], params['dec_bhh'])
    yw = h_d @ params['re_w'].T + params['re_b']
    return jnp.maximum(yw.reshape(B, M * W), 0.0)


if __name__ == "__main__":
    key = jax.random.PRNGKey(0)
    kx, kp, kx2 = jax.random.split(key, 3)
    params = init_params(CFG, kp)

    # Batched run: B=256 -> 2 grid blocks of TB=128 (the >=2-block guard keeps both
    # v7x TensorCores busy; on v5e/v6e it is just 2 sequential steps).
    B = 256
    x = jax.random.normal(kx, (B, CFG['seq_len'], CFG['enc_in']), dtype=jnp.float32)
    y = jax.block_until_ready(cnn_seg_lstm_forward(x, params, CFG))
    assert y.shape == (B, CFG['pred_len'])
    y_ref = reference_forward(x, params, CFG)
    # tanh-form sigmoid is exact, so tolerance is tighter than the approx-reciprocal
    # version; slack left for fused-weight reassociation / matmul precision.
    np.testing.assert_allclose(np.asarray(y), np.asarray(y_ref),
                               rtol=2e-3, atol=2e-4)

    # Small / ragged batch: exercises the padding path (TB=8, Bpad=8, grid=1).
    B2 = 6
    x2 = jax.random.normal(kx2, (B2, CFG['seq_len'], CFG['enc_in']), dtype=jnp.float32)
    y2 = jax.block_until_ready(cnn_seg_lstm_forward(x2, params, CFG))
    assert y2.shape == (B2, CFG['pred_len'])
    np.testing.assert_allclose(np.asarray(y2),
                               np.asarray(reference_forward(x2, params, CFG)),
                               rtol=2e-3, atol=2e-4)

    # TODO(synk): dropout / BatchNorm are eval-mode only (identity / running stats);
    # training-mode stochastic dropout and batch statistics are not modeled.
    print("KERNEL_OK")
</pallas_src>

<mosaic_0001>
module attributes {stable_mosaic.version = 11 : i64} {
  func.func @kernel(%arg0: i32, %arg1: memref<128x64xf32, #tpu.memory_space<vmem>>, %arg2: memref<64x128xf32, #tpu.memory_space<vmem>>, %arg3: memref<1x128xf32, #tpu.memory_space<vmem>>, %arg4: memref<64x128xf32, #tpu.memory_space<vmem>>, %arg5: memref<1x128xf32, #tpu.memory_space<vmem>>, %arg6: memref<128x512xf32, #tpu.memory_space<vmem>>, %arg7: memref<1x512xf32, #tpu.memory_space<vmem>>, %arg8: memref<32x128xf32, #tpu.memory_space<vmem>>, %arg9: memref<64x640xf32, #tpu.memory_space<vmem>>, %arg10: memref<1x512xf32, #tpu.memory_space<vmem>>, %arg11: memref<128x16xf32, #tpu.memory_space<vmem>>, %arg12: memref<1x16xf32, #tpu.memory_space<vmem>>, %arg13: memref<128x16xf32, #tpu.memory_space<vmem>>) attributes {dimension_semantics = [#tpu.dimension_semantics<parallel>], iteration_bounds = array<i64: 2>, scalar_prefetch = 0 : i64, scratch_operands = 0 : i64, tpu.core_type = #tpu.core_type<tc>, window_params = [{transform_indices = @transform_0, window_bounds = array<i64: 128, 64>}, {pipeline_mode = #tpu.pipeline_mode<synchronous>, transform_indices = @transform_1, window_bounds = array<i64: 64, 128>}, {pipeline_mode = #tpu.pipeline_mode<synchronous>, transform_indices = @transform_2, window_bounds = array<i64: 1, 128>}, {pipeline_mode = #tpu.pipeline_mode<synchronous>, transform_indices = @transform_3, window_bounds = array<i64: 64, 128>}, {pipeline_mode = #tpu.pipeline_mode<synchronous>, transform_indices = @transform_4, window_bounds = array<i64: 1, 128>}, {pipeline_mode = #tpu.pipeline_mode<synchronous>, transform_indices = @transform_5, window_bounds = array<i64: 128, 512>}, {pipeline_mode = #tpu.pipeline_mode<synchronous>, transform_indices = @transform_6, window_bounds = array<i64: 1, 512>}, {pipeline_mode = #tpu.pipeline_mode<synchronous>, transform_indices = @transform_7, window_bounds = array<i64: 32, 128>}, {pipeline_mode = #tpu.pipeline_mode<synchronous>, transform_indices = @transform_8, window_bounds = array<i64: 64, 640>}, {pipeline_mode = #tpu.pipeline_mode<synchronous>, transform_indices = @transform_9, window_bounds = array<i64: 1, 512>}, {pipeline_mode = #tpu.pipeline_mode<synchronous>, transform_indices = @transform_10, window_bounds = array<i64: 128, 16>}, {pipeline_mode = #tpu.pipeline_mode<synchronous>, transform_indices = @transform_11, window_bounds = array<i64: 1, 16>}, {transform_indices = @transform_12, window_bounds = array<i64: 128, 16>}]} {
    %c0 = arith.constant 0 : index
    %c0_0 = arith.constant 0 : index
    %0 = vector.load %arg1[%c0, %c0_0] : memref<128x64xf32, #tpu.memory_space<vmem>>, vector<128x64xf32>
    %c0_1 = arith.constant 0 : index
    %c0_2 = arith.constant 0 : index
    %1 = vector.load %arg2[%c0_1, %c0_2] : memref<64x128xf32, #tpu.memory_space<vmem>>, vector<64x128xf32>
    %cst = arith.constant dense<0.000000e+00> : vector<128x128xf32>
    %2 = tpu.matmul %0, %1, %cst {dimension_numbers = #tpu.dot_dimension_numbers<[1], [0], [0], [1], [0, 0, 1, 1], [], []>} : vector<128x64xf32>, vector<64x128xf32>, vector<128x128xf32> -> vector<128x128xf32>
    %c0_3 = arith.constant 0 : index
    %c0_4 = arith.constant 0 : index
    %3 = vector.load %arg3[%c0_3, %c0_4] : memref<1x128xf32, #tpu.memory_space<vmem>>, vector<1x128xf32>
    %4 = vector.broadcast %3 : vector<1x128xf32> to vector<128x128xf32>
    %5 = arith.addf %2, %4 : vector<128x128xf32>
    %6 = vector.extract_strided_slice %5 {offsets = [0, 0], sizes = [128, 64], strides = [1, 1]} : vector<128x128xf32> to vector<128x64xf32>
    %7 = vector.extract_strided_slice %5 {offsets = [0, 64], sizes = [128, 64], strides = [1, 1]} : vector<128x128xf32> to vector<128x64xf32>
    %8 = arith.maximumf %6, %7 : vector<128x64xf32>
    %cst_5 = arith.constant 0.000000e+00 : f32
    %9 = vector.broadcast %cst_5 : f32 to vector<128x64xf32>
    %10 = arith.maximumf %8, %9 : vector<128x64xf32>
    %c0_6 = arith.constant 0 : index
    %c0_7 = arith.constant 0 : index
    %11 = vector.load %arg4[%c0_6, %c0_7] : memref<64x128xf32, #tpu.memory_space<vmem>>, vector<64x128xf32>
    %cst_8 = arith.constant dense<0.000000e+00> : vector<128x128xf32>
    %12 = tpu.matmul %10, %11, %cst_8 {dimension_numbers = #tpu.dot_dimension_numbers<[1], [0], [0], [1], [0, 0, 1, 1], [], []>} : vector<128x64xf32>, vector<64x128xf32>, vector<128x128xf32> -> vector<128x128xf32>
    %c0_9 = arith.constant 0 : index
    %c0_10 = arith.constant 0 : index
    %13 = vector.load %arg5[%c0_9, %c0_10] : memref<1x128xf32, #tpu.memory_space<vmem>>, vector<1x128xf32>
    %14 = vector.broadcast %13 : vector<1x128xf32> to vector<128x128xf32>
    %15 = arith.addf %12, %14 : vector<128x128xf32>
    %cst_11 = arith.constant 0.000000e+00 : f32
    %16 = vector.broadcast %cst_11 : f32 to vector<128x128xf32>
    %17 = arith.maximumf %15, %16 : vector<128x128xf32>
    %c0_12 = arith.constant 0 : index
    %c0_13 = arith.constant 0 : index
    %18 = vector.load %arg6[%c0_12, %c0_13] : memref<128x512xf32, #tpu.memory_space<vmem>>, vector<128x512xf32>
    %cst_14 = arith.constant dense<0.000000e+00> : vector<128x512xf32>
    %19 = tpu.matmul %17, %18, %cst_14 {dimension_numbers = #tpu.dot_dimension_numbers<[1], [0], [0], [1], [0, 0, 1, 1], [], []>} : vector<128x128xf32>, vector<128x512xf32>, vector<128x512xf32> -> vector<128x512xf32>
    %c0_15 = arith.constant 0 : index
    %c0_16 = arith.constant 0 : index
    %20 = vector.load %arg7[%c0_15, %c0_16] : memref<1x512xf32, #tpu.memory_space<vmem>>, vector<1x512xf32>
    %21 = vector.broadcast %20 : vector<1x512xf32> to vector<128x512xf32>
    %22 = arith.addf %19, %21 : vector<128x512xf32>
    %c0_17 = arith.constant 0 : index
    %c0_18 = arith.constant 0 : index
    %23 = vector.load %arg8[%c0_17, %c0_18] : memref<32x128xf32, #tpu.memory_space<vmem>>, vector<32x128xf32>
    %24 = vector.extract_strided_slice %22 {offsets = [0, 0], sizes = [128, 128], strides = [1, 1]} : vector<128x512xf32> to vector<128x128xf32>
    %25 = vector.extract_strided_slice %24 {offsets = [0, 0], sizes = [128, 32], strides = [1, 1]} : vector<128x128xf32> to vector<128x32xf32>
    %cst_19 = arith.constant 5.000000e-01 : f32
    %26 = vector.broadcast %cst_19 : f32 to vector<128x32xf32>
    %27 = arith.mulf %26, %25 : vector<128x32xf32>
    %28 = math.tanh %27 : vector<128x32xf32>
    %cst_20 = arith.constant 5.000000e-01 : f32
    %29 = vector.broadcast %cst_20 : f32 to vector<128x32xf32>
    %30 = arith.mulf %29, %28 : vector<128x32xf32>
    %cst_21 = arith.constant 5.000000e-01 : f32
    %31 = vector.broadcast %cst_21 : f32 to vector<128x32xf32>
    %32 = arith.addf %30, %31 : vector<128x32xf32>
    %33 = vector.extract_strided_slice %24 {offsets = [0, 64], sizes = [128, 32], strides = [1, 1]} : vector<128x128xf32> to vector<128x32xf32>
    %34 = math.tanh %33 : vector<128x32xf32>
    %35 = vector.extract_strided_slice %24 {offsets = [0, 96], sizes = [128, 32], strides = [1, 1]} : vector<128x128xf32> to vector<128x32xf32>
    %cst_22 = arith.constant 5.000000e-01 : f32
    %36 = vector.broadcast %cst_22 : f32 to vector<128x32xf32>
    %37 = arith.mulf %36, %35 : vector<128x32xf32>
    %38 = math.tanh %37 : vector<128x32xf32>
    %cst_23 = arith.constant 5.000000e-01 : f32
    %39 = vector.broadcast %cst_23 : f32 to vector<128x32xf32>
    %40 = arith.mulf %39, %38 : vector<128x32xf32>
    %cst_24 = arith.constant 5.000000e-01 : f32
    %41 = vector.broadcast %cst_24 : f32 to vector<128x32xf32>
    %42 = arith.addf %40, %41 : vector<128x32xf32>
    %43 = arith.mulf %32, %34 : vector<128x32xf32>
    %44 = math.tanh %43 : vector<128x32xf32>
    %45 = arith.mulf %42, %44 : vector<128x32xf32>
    %46 = vector.extract_strided_slice %22 {offsets = [0, 128], sizes = [128, 128], strides = [1, 1]} : vector<128x512xf32> to vector<128x128xf32>
    %cst_25 = arith.constant dense<0.000000e+00> : vector<128x128xf32>
    %47 = tpu.matmul %45, %23, %cst_25 {dimension_numbers = #tpu.dot_dimension_numbers<[1], [0], [0], [1], [0, 0, 1, 1], [], []>} : vector<128x32xf32>, vector<32x128xf32>, vector<128x128xf32> -> vector<128x128xf32>
    %48 = arith.addf %46, %47 : vector<128x128xf32>
    %49 = vector.extract_strided_slice %48 {offsets = [0, 0], sizes = [128, 32], strides = [1, 1]} : vector<128x128xf32> to vector<128x32xf32>
    %cst_26 = arith.constant 5.000000e-01 : f32
    %50 = vector.broadcast %cst_26 : f32 to vector<128x32xf32>
    %51 = arith.mulf %50, %49 : vector<128x32xf32>
    %52 = math.tanh %51 : vector<128x32xf32>
    %cst_27 = arith.constant 5.000000e-01 : f32
    %53 = vector.broadcast %cst_27 : f32 to vector<128x32xf32>
    %54 = arith.mulf %53, %52 : vector<128x32xf32>
    %cst_28 = arith.constant 5.000000e-01 : f32
    %55 = vector.broadcast %cst_28 : f32 to vector<128x32xf32>
    %56 = arith.addf %54, %55 : vector<128x32xf32>
    %57 = vector.extract_strided_slice %48 {offsets = [0, 64], sizes = [128, 32], strides = [1, 1]} : vector<128x128xf32> to vector<128x32xf32>
    %58 = math.tanh %57 : vector<128x32xf32>
    %59 = vector.extract_strided_slice %48 {offsets = [0, 96], sizes = [128, 32], strides = [1, 1]} : vector<128x128xf32> to vector<128x32xf32>
    %cst_29 = arith.constant 5.000000e-01 : f32
    %60 = vector.broadcast %cst_29 : f32 to vector<128x32xf32>
    %61 = arith.mulf %60, %59 : vector<128x32xf32>
    %62 = math.tanh %61 : vector<128x32xf32>
    %cst_30 = arith.constant 5.000000e-01 : f32
    %63 = vector.broadcast %cst_30 : f32 to vector<128x32xf32>
    %64 = arith.mulf %63, %62 : vector<128x32xf32>
    %cst_31 = arith.constant 5.000000e-01 : f32
    %65 = vector.broadcast %cst_31 : f32 to vector<128x32xf32>
    %66 = arith.addf %64, %65 : vector<128x32xf32>
    %67 = vector.extract_strided_slice %48 {offsets = [0, 32], sizes = [128, 32], strides = [1, 1]} : vector<128x128xf32> to vector<128x32xf32>
    %cst_32 = arith.constant 5.000000e-01 : f32
    %68 = vector.broadcast %cst_32 : f32 to vector<128x32xf32>
    %69 = arith.mulf %68, %67 : vector<128x32xf32>
    %70 = math.tanh %69 : vector<128x32xf32>
    %cst_33 = arith.constant 5.000000e-01 : f32
    %71 = vector.broadcast %cst_33 : f32 to vector<128x32xf32>
    %72 = arith.mulf %71, %70 : vector<128x32xf32>
    %cst_34 = arith.constant 5.000000e-01 : f32
    %73 = vector.broadcast %cst_34 : f32 to vector<128x32xf32>
    %74 = arith.addf %72, %73 : vector<128x32xf32>
    %75 = arith.mulf %74, %43 : vector<128x32xf32>
    %76 = arith.mulf %56, %58 : vector<128x32xf32>
    %77 = arith.addf %75, %76 : vector<128x32xf32>
    %78 = math.tanh %77 : vector<128x32xf32>
    %79 = arith.mulf %66, %78 : vector<128x32xf32>
    %80 = vector.extract_strided_slice %22 {offsets = [0, 256], sizes = [128, 128], strides = [1, 1]} : vector<128x512xf32> to vector<128x128xf32>
    %cst_35 = arith.constant dense<0.000000e+00> : vector<128x128xf32>
    %81 = tpu.matmul %79, %23, %cst_35 {dimension_numbers = #tpu.dot_dimension_numbers<[1], [0], [0], [1], [0, 0, 1, 1], [], []>} : vector<128x32xf32>, vector<32x128xf32>, vector<128x128xf32> -> vector<128x128xf32>
    %82 = arith.addf %80, %81 : vector<128x128xf32>
    %83 = vector.extract_strided_slice %82 {offsets = [0, 0], sizes = [128, 32], strides = [1, 1]} : vector<128x128xf32> to vector<128x32xf32>
    %cst_36 = arith.constant 5.000000e-01 : f32
    %84 = vector.broadcast %cst_36 : f32 to vector<128x32xf32>
    %85 = arith.mulf %84, %83 : vector<128x32xf32>
    %86 = math.tanh %85 : vector<128x32xf32>
    %cst_37 = arith.constant 5.000000e-01 : f32
    %87 = vector.broadcast %cst_37 : f32 to vector<128x32xf32>
    %88 = arith.mulf %87, %86 : vector<128x32xf32>
    %cst_38 = arith.constant 5.000000e-01 : f32
    %89 = vector.broadcast %cst_38 : f32 to vector<128x32xf32>
    %90 = arith.addf %88, %89 : vector<128x32xf32>
    %91 = vector.extract_strided_slice %82 {offsets = [0, 64], sizes = [128, 32], strides = [1, 1]} : vector<128x128xf32> to vector<128x32xf32>
    %92 = math.tanh %91 : vector<128x32xf32>
    %93 = vector.extract_strided_slice %82 {offsets = [0, 96], sizes = [128, 32], strides = [1, 1]} : vector<128x128xf32> to vector<128x32xf32>
    %cst_39 = arith.constant 5.000000e-01 : f32
    %94 = vector.broadcast %cst_39 : f32 to vector<128x32xf32>
    %95 = arith.mulf %94, %93 : vector<128x32xf32>
    %96 = math.tanh %95 : vector<128x32xf32>
    %cst_40 = arith.constant 5.000000e-01 : f32
    %97 = vector.broadcast %cst_40 : f32 to vector<128x32xf32>
    %98 = arith.mulf %97, %96 : vector<128x32xf32>
    %cst_41 = arith.constant 5.000000e-01 : f32
    %99 = vector.broadcast %cst_41 : f32 to vector<128x32xf32>
    %100 = arith.addf %98, %99 : vector<128x32xf32>
    %101 = vector.extract_strided_slice %82 {offsets = [0, 32], sizes = [128, 32], strides = [1, 1]} : vector<128x128xf32> to vector<128x32xf32>
    %cst_42 = arith.constant 5.000000e-01 : f32
    %102 = vector.broadcast %cst_42 : f32 to vector<128x32xf32>
    %103 = arith.mulf %102, %101 : vector<128x32xf32>
    %104 = math.tanh %103 : vector<128x32xf32>
    %cst_43 = arith.constant 5.000000e-01 : f32
    %105 = vector.broadcast %cst_43 : f32 to vector<128x32xf32>
    %106 = arith.mulf %105, %104 : vector<128x32xf32>
    %cst_44 = arith.constant 5.000000e-01 : f32
    %107 = vector.broadcast %cst_44 : f32 to vector<128x32xf32>
    %108 = arith.addf %106, %107 : vector<128x32xf32>
    %109 = arith.mulf %108, %77 : vector<128x32xf32>
    %110 = arith.mulf %90, %92 : vector<128x32xf32>
    %111 = arith.addf %109, %110 : vector<128x32xf32>
    %112 = math.tanh %111 : vector<128x32xf32>
    %113 = arith.mulf %100, %112 : vector<128x32xf32>
    %114 = vector.extract_strided_slice %22 {offsets = [0, 384], sizes = [128, 128], strides = [1, 1]} : vector<128x512xf32> to vector<128x128xf32>
    %cst_45 = arith.constant dense<0.000000e+00> : vector<128x128xf32>
    %115 = tpu.matmul %113, %23, %cst_45 {dimension_numbers = #tpu.dot_dimension_numbers<[1], [0], [0], [1], [0, 0, 1, 1], [], []>} : vector<128x32xf32>, vector<32x128xf32>, vector<128x128xf32> -> vector<128x128xf32>
    %116 = arith.addf %114, %115 : vector<128x128xf32>
    %117 = vector.extract_strided_slice %116 {offsets = [0, 0], sizes = [128, 32], strides = [1, 1]} : vector<128x128xf32> to vector<128x32xf32>
    %cst_46 = arith.constant 5.000000e-01 : f32
    %118 = vector.broadcast %cst_46 : f32 to vector<128x32xf32>
    %119 = arith.mulf %118, %117 : vector<128x32xf32>
    %120 = math.tanh %119 : vector<128x32xf32>
    %cst_47 = arith.constant 5.000000e-01 : f32
    %121 = vector.broadcast %cst_47 : f32 to vector<128x32xf32>
    %122 = arith.mulf %121, %120 : vector<128x32xf32>
    %cst_48 = arith.constant 5.000000e-01 : f32
    %123 = vector.broadcast %cst_48 : f32 to vector<128x32xf32>
    %124 = arith.addf %122, %123 : vector<128x32xf32>
    %125 = vector.extract_strided_slice %116 {offsets = [0, 64], sizes = [128, 32], strides = [1, 1]} : vector<128x128xf32> to vector<128x32xf32>
    %126 = math.tanh %125 : vector<128x32xf32>
    %127 = vector.extract_strided_slice %116 {offsets = [0, 96], sizes = [128, 32], strides = [1, 1]} : vector<128x128xf32> to vector<128x32xf32>
    %cst_49 = arith.constant 5.000000e-01 : f32
    %128 = vector.broadcast %cst_49 : f32 to vector<128x32xf32>
    %129 = arith.mulf %128, %127 : vector<128x32xf32>
    %130 = math.tanh %129 : vector<128x32xf32>
    %cst_50 = arith.constant 5.000000e-01 : f32
    %131 = vector.broadcast %cst_50 : f32 to vector<128x32xf32>
    %132 = arith.mulf %131, %130 : vector<128x32xf32>
    %cst_51 = arith.constant 5.000000e-01 : f32
    %133 = vector.broadcast %cst_51 : f32 to vector<128x32xf32>
    %134 = arith.addf %132, %133 : vector<128x32xf32>
    %135 = vector.extract_strided_slice %116 {offsets = [0, 32], sizes = [128, 32], strides = [1, 1]} : vector<128x128xf32> to vector<128x32xf32>
    %cst_52 = arith.constant 5.000000e-01 : f32
    %136 = vector.broadcast %cst_52 : f32 to vector<128x32xf32>
    %137 = arith.mulf %136, %135 : vector<128x32xf32>
    %138 = math.tanh %137 : vector<128x32xf32>
    %cst_53 = arith.constant 5.000000e-01 : f32
    %139 = vector.broadcast %cst_53 : f32 to vector<128x32xf32>
    %140 = arith.mulf %139, %138 : vector<128x32xf32>
    %cst_54 = arith.constant 5.000000e-01 : f32
    %141 = vector.broadcast %cst_54 : f32 to vector<128x32xf32>
    %142 = arith.addf %140, %141 : vector<128x32xf32>
    %143 = arith.mulf %142, %111 : vector<128x32xf32>
    %144 = arith.mulf %124, %126 : vector<128x32xf32>
    %145 = arith.addf %143, %144 : vector<128x32xf32>
    %146 = math.tanh %145 : vector<128x32xf32>
    %147 = arith.mulf %134, %146 : vector<128x32xf32>
    %148 = tpu.concatenate %147, %145 in 1 : vector<128x32xf32>, vector<128x32xf32> -> vector<128x64xf32>
    %c0_55 = arith.constant 0 : index
    %c0_56 = arith.constant 0 : index
    %149 = vector.load %arg9[%c0_55, %c0_56] : memref<64x640xf32, #tpu.memory_space<vmem>>, vector<64x640xf32>
    %cst_57 = arith.constant dense<0.000000e+00> : vector<128x640xf32>
    %150 = tpu.matmul %148, %149, %cst_57 {dimension_numbers = #tpu.dot_dimension_numbers<[1], [0], [0], [1], [0, 0, 1, 1], [], []>} : vector<128x64xf32>, vector<64x640xf32>, vector<128x640xf32> -> vector<128x640xf32>
    %151 = vector.extract_strided_slice %150 {offsets = [0, 0], sizes = [128, 512], strides = [1, 1]} : vector<128x640xf32> to vector<128x512xf32>
    %c0_58 = arith.constant 0 : index
    %c0_59 = arith.constant 0 : index
    %152 = vector.load %arg10[%c0_58, %c0_59] : memref<1x512xf32, #tpu.memory_space<vmem>>, vector<1x512xf32>
    %153 = vector.broadcast %152 : vector<1x512xf32> to vector<128x512xf32>
    %154 = arith.addf %151, %153 : vector<128x512xf32>
    %155 = vector.extract_strided_slice %150 {offsets = [0, 512], sizes = [128, 128], strides = [1, 1]} : vector<128x640xf32> to vector<128x128xf32>
    %156 = vector.extract_strided_slice %154 {offsets = [0, 0], sizes = [128, 128], strides = [1, 1]} : vector<128x512xf32> to vector<128x128xf32>
    %cst_60 = arith.constant 5.000000e-01 : f32
    %157 = vector.broadcast %cst_60 : f32 to vector<128x128xf32>
    %158 = arith.mulf %157, %156 : vector<128x128xf32>
    %159 = math.tanh %158 : vector<128x128xf32>
    %cst_61 = arith.constant 5.000000e-01 : f32
    %160 = vector.broadcast %cst_61 : f32 to vector<128x128xf32>
    %161 = arith.mulf %160, %159 : vector<128x128xf32>
    %cst_62 = arith.constant 5.000000e-01 : f32
    %162 = vector.broadcast %cst_62 : f32 to vector<128x128xf32>
    %163 = arith.addf %161, %162 : vector<128x128xf32>
    %164 = vector.extract_strided_slice %154 {offsets = [0, 128], sizes = [128, 128], strides = [1, 1]} : vector<128x512xf32> to vector<128x128xf32>
    %cst_63 = arith.constant 5.000000e-01 : f32
    %165 = vector.broadcast %cst_63 : f32 to vector<128x128xf32>
    %166 = arith.mulf %165, %164 : vector<128x128xf32>
    %167 = math.tanh %166 : vector<128x128xf32>
    %cst_64 = arith.constant 5.000000e-01 : f32
    %168 = vector.broadcast %cst_64 : f32 to vector<128x128xf32>
    %169 = arith.mulf %168, %167 : vector<128x128xf32>
    %cst_65 = arith.constant 5.000000e-01 : f32
    %170 = vector.broadcast %cst_65 : f32 to vector<128x128xf32>
    %171 = arith.addf %169, %170 : vector<128x128xf32>
    %172 = vector.extract_strided_slice %154 {offsets = [0, 256], sizes = [128, 128], strides = [1, 1]} : vector<128x512xf32> to vector<128x128xf32>
    %173 = math.tanh %172 : vector<128x128xf32>
    %174 = vector.extract_strided_slice %154 {offsets = [0, 384], sizes = [128, 128], strides = [1, 1]} : vector<128x512xf32> to vector<128x128xf32>
    %cst_66 = arith.constant 5.000000e-01 : f32
    %175 = vector.broadcast %cst_66 : f32 to vector<128x128xf32>
    %176 = arith.mulf %175, %174 : vector<128x128xf32>
    %177 = math.tanh %176 : vector<128x128xf32>
    %cst_67 = arith.constant 5.000000e-01 : f32
    %178 = vector.broadcast %cst_67 : f32 to vector<128x128xf32>
    %179 = arith.mulf %178, %177 : vector<128x128xf32>
    %cst_68 = arith.constant 5.000000e-01 : f32
    %180 = vector.broadcast %cst_68 : f32 to vector<128x128xf32>
    %181 = arith.addf %179, %180 : vector<128x128xf32>
    %182 = arith.mulf %171, %155 : vector<128x128xf32>
    %183 = arith.mulf %163, %173 : vector<128x128xf32>
    %184 = arith.addf %182, %183 : vector<128x128xf32>
    %185 = math.tanh %184 : vector<128x128xf32>
    %186 = arith.mulf %181, %185 : vector<128x128xf32>
    %c0_69 = arith.constant 0 : index
    %c0_70 = arith.constant 0 : index
    %187 = vector.load %arg11[%c0_69, %c0_70] : memref<128x16xf32, #tpu.memory_space<vmem>>, vector<128x16xf32>
    %cst_71 = arith.constant dense<0.000000e+00> : vector<128x16xf32>
    %188 = tpu.matmul %186, %187, %cst_71 {dimension_numbers = #tpu.dot_dimension_numbers<[1], [0], [0], [1], [0, 0, 1, 1], [], []>} : vector<128x128xf32>, vector<128x16xf32>, vector<128x16xf32> -> vector<128x16xf32>
    %c0_72 = arith.constant 0 : index
    %c0_73 = arith.constant 0 : index
    %189 = vector.load %arg12[%c0_72, %c0_73] : memref<1x16xf32, #tpu.memory_space<vmem>>, vector<1x16xf32>
    %190 = vector.broadcast %189 : vector<1x16xf32> to vector<128x16xf32>
    %191 = arith.addf %188, %190 : vector<128x16xf32>
    %cst_74 = arith.constant 0.000000e+00 : f32
    %192 = vector.broadcast %cst_74 : f32 to vector<128x16xf32>
    %193 = arith.maximumf %191, %192 : vector<128x16xf32>
    %c0_75 = arith.constant 0 : index
    %c0_76 = arith.constant 0 : index
    %194 = vector.load %arg13[%c0_75, %c0_76] : memref<128x16xf32, #tpu.memory_space<vmem>>, vector<128x16xf32>
    tpu.vector_store %arg13[%c0_75, %c0_76], %193 {strides = array<i32>} : memref<128x16xf32, #tpu.memory_space<vmem>>, vector<128x16xf32>,
    return
  }
  func.func @transform_0(%arg0: i32) -> (i32, i32) {
    %c0_i32 = arith.constant 0 : i32
    %c0_i32_0 = arith.constant 0 : i32
    return %arg0, %c0_i32 : i32, i32
  }
  func.func @transform_1(%arg0: i32) -> (i32, i32) {
    %c0_i32 = arith.constant 0 : i32
    %c0_i32_0 = arith.constant 0 : i32
    %c0_i32_1 = arith.constant 0 : i32
    return %c0_i32, %c0_i32_0 : i32, i32
  }
  func.func @transform_2(%arg0: i32) -> (i32, i32) {
    %c0_i32 = arith.constant 0 : i32
    %c0_i32_0 = arith.constant 0 : i32
    %c0_i32_1 = arith.constant 0 : i32
    return %c0_i32, %c0_i32_0 : i32, i32
  }
  func.func @transform_3(%arg0: i32) -> (i32, i32) {
    %c0_i32 = arith.constant 0 : i32
    %c0_i32_0 = arith.constant 0 : i32
    %c0_i32_1 = arith.constant 0 : i32
    return %c0_i32, %c0_i32_0 : i32, i32
  }
  func.func @transform_4(%arg0: i32) -> (i32, i32) {
    %c0_i32 = arith.constant 0 : i32
    %c0_i32_0 = arith.constant 0 : i32
    %c0_i32_1 = arith.constant 0 : i32
    return %c0_i32, %c0_i32_0 : i32, i32
  }
  func.func @transform_5(%arg0: i32) -> (i32, i32) {
    %c0_i32 = arith.constant 0 : i32
    %c0_i32_0 = arith.constant 0 : i32
    %c0_i32_1 = arith.constant 0 : i32
    return %c0_i32, %c0_i32_0 : i32, i32
  }
  func.func @transform_6(%arg0: i32) -> (i32, i32) {
    %c0_i32 = arith.constant 0 : i32
    %c0_i32_0 = arith.constant 0 : i32
    %c0_i32_1 = arith.constant 0 : i32
    return %c0_i32, %c0_i32_0 : i32, i32
  }
  func.func @transform_7(%arg0: i32) -> (i32, i32) {
    %c0_i32 = arith.constant 0 : i32
    %c0_i32_0 = arith.constant 0 : i32
    %c0_i32_1 = arith.constant 0 : i32
    return %c0_i32, %c0_i32_0 : i32, i32
  }
  func.func @transform_8(%arg0: i32) -> (i32, i32) {
    %c0_i32 = arith.constant 0 : i32
    %c0_i32_0 = arith.constant 0 : i32
    %c0_i32_1 = arith.constant 0 : i32
    return %c0_i32, %c0_i32_0 : i32, i32
  }
  func.func @transform_9(%arg0: i32) -> (i32, i32) {
    %c0_i32 = arith.constant 0 : i32
    %c0_i32_0 = arith.constant 0 : i32
    %c0_i32_1 = arith.constant 0 : i32
    return %c0_i32, %c0_i32_0 : i32, i32
  }
  func.func @transform_10(%arg0: i32) -> (i32, i32) {
    %c0_i32 = arith.constant 0 : i32
    %c0_i32_0 = arith.constant 0 : i32
    %c0_i32_1 = arith.constant 0 : i32
    return %c0_i32, %c0_i32_0 : i32, i32
  }
  func.func @transform_11(%arg0: i32) -> (i32, i32) {
    %c0_i32 = arith.constant 0 : i32
    %c0_i32_0 = arith.constant 0 : i32
    %c0_i32_1 = arith.constant 0 : i32
    return %c0_i32, %c0_i32_0 : i32, i32
  }
  func.func @transform_12(%arg0: i32) -> (i32, i32) {
    %c0_i32 = arith.constant 0 : i32
    %c0_i32_0 = arith.constant 0 : i32
    return %arg0, %c0_i32 : i32, i32
  }
}

</mosaic_0001>

<bundles_post_ra>
// kernel: tpu_custom_call.1
= control target key start
LH: loop header
LB: loop body
LE: loop exit
PB: predicated region body
PF: predicated region fallthrough
CT: control target
= control target key end

     0   :  { %s8949_s0 = inlined_call_operand.vmem [shape: f32[256,64], index: 0, kind: input, shape index: {}]   ;;  %s8950_s1 = inlined_call_operand.hbm [shape: f32[64,128], index: 1, kind: input, shape index: {}]   ;;  %s8951_s2 = inlined_call_operand.vmem [shape: f32[1,128], index: 2, kind: input, shape index: {}]   ;;  %s8952_s3 = inlined_call_operand.hbm [shape: f32[64,128], index: 3, kind: input, shape index: {}]   ;;  %s8953_s4 = inlined_call_operand.vmem [shape: f32[1,128], index: 4, kind: input, shape index: {}]   ;;  %s8954_s5 = inlined_call_operand.vmem [shape: f32[128,512], index: 5, kind: input, shape index: {}]   ;;  %s8955_s6 = inlined_call_operand.hbm [shape: f32[1,512], index: 6, kind: input, shape index: {}]   ;;  %s8956_s7 = inlined_call_operand.vmem [shape: f32[32,128], index: 7, kind: input, shape index: {}]   ;;  %s8957_s8 = inlined_call_operand.hbm [shape: f32[64,640], index: 8, kind: input, shape index: {}]   ;;  %s8958_s9 = inlined_call_operand.hbm [shape: f32[1,512], index: 9, kind: input, shape index: {}]   ;;  %s8959_s10 = inlined_call_operand.vmem [shape: f32[128,16], index: 10, kind: input, shape index: {}]   ;;  %s8960_s11 = inlined_call_operand.vmem [shape: f32[1,16], index: 11, kind: input, shape index: {}]   ;;  %s8961_s12 = inlined_call_operand.vmem [shape: f32[256,16], index: 12, kind: output, shape index: {}]  }
   0x1   :  { %8971 = sst [smem:[#allocation42_spill]] %s8952_s3 }
   0x2   :  { %8972 = sst [smem:[#allocation43_spill]] %s8961_s12 }
   0x3   :  { %17 = vsyncpa [#allocation3], 0 }
   0x4   :  { %18 = vsyncpa [#allocation5], 0 }
   0x5   :  { %19 = vsyncpa [#allocation8], 0  ;;  %s6501_s21 = smov 0  }
   0x6 LB: > { %s8962_s22 = sadd.s32 4294967295, %s6421_s21   ;;  %p4861_p0 = scmp.ge.s32.totalorder %s6421_s21, 1  ;;  %s6421_s21 = sphi %s6501_s21, %s25_s21  }
   0x7   : > { %p313_p1 = scmp.lt.s32.totalorder %s6421_s21, 3  ;;  %p6511_p2 = scmp.eq.s32.totalorder %s8962_s22, 0 }
   0x8   : > { %s6423_s25 = smov [#allocation4]   ;;  %s6424_s27 = smov [#allocation7]  }
   0x9   : > { %s8973_s23 = scalar_select %p6511_p2, 1, 0 }
   0xa   : > { %p6515_p3 = pnand %p4861_p0, %p313_p1  ;;  %s341_s26 = sshll.u32 %s6423_s25, 4  ;;  %s6519_s26 = int_to_ptr.vmem [resolvable:$true] %s341_s26 }
   0xb   : > { %s374_s28 = sshll.u32 %s6424_s27, 4  ;;  %s6425_s30 = smov [#allocation2]   ;;  %s6523_s28 = int_to_ptr.vmem [resolvable:$true] %s374_s28 }
   0xc   : > { %s8974_s24 = scalar_select %p6515_p3, 1, 0 }
   0xd   : > { %p5671_p4 = pneg %p6515_p3  ;;  %s6531_s13 = sshll.u32 %s6425_s30, 4  ;;  %s326_s13 = int_to_ptr.vmem [resolvable:$true] %s6531_s13 }
   0xe   : > { %s8976_s3 = sld [smem:[#allocation42_spill]] }
   0xf   : > { %p6527_p5 = pnand %p6511_p2, %p5671_p4 }
  0x11   : > { %p6541_p7 = pneg %p6527_p5 }
  0x14   : > { %s6263_s16 = scalar_lea.hbm %s8976_s3, 1024 }
  0x15   : > { %p6264_p6 = scmp.ne.s32.totalorder %s8976_s3, %s6263_s16  ;;  %p6270_p10 = scmp.lt.u32.totalorder %s6263_s16, %s8976_s3 }
  0x17   : > { %p6266_p8 = pnand %p6541_p7, %p6264_p6 }
  0x19   : > { %p6267_p9 = pneg %p6266_p8 }
  0x1b   : > { %p6272_p11 = pnand %p6270_p10, %p6267_p9 }
  0x1d   : > { %6275 = shalt.err (!%p6272_p11)
}
  0x1e   : > { %s6276_s27 = scalar_lea.vmem %s6519_s26, 1024  ;;  %p6284_p1 = scmp.lt.s32.totalorder %s6519_s26, %s6519_s26 }
  0x1f   : > { %p6277_p12 = scmp.ne.s32.totalorder %s6519_s26, %s6276_s27  ;;  %p6285_p4 = scmp.lt.s32.totalorder %s6276_s27, %s6276_s27 }
  0x21   : > { %p6279_p13 = pnand %p6277_p12, %p6541_p7  ;;  %p6286_p6 = por %p6285_p4, %p6284_p1 }
  0x23   : > { %p6280_p0 = pneg %p6279_p13 }
  0x25   : > { %p6287_p8 = pnand %p6286_p6, %p6280_p0 }
  0x27   : > { %6290 = shalt.err (!%p6287_p8)
}
  0x28   : > { %s8963_s30 = smov 128   ;;  %s8964_s14 = smov 8  }
  0x29   : > { %5677 = dma.hbm_to_vmem [thread:$0]  (!%p6527_p5), %s8976_s3, 1024, %s6519_s26, [#allocation5], %s8963_s30, %s8963_s30, %s8964_s14  }
  0x2a   : > { %s6291_s20 = scalar_lea.hbm %s8957_s8, 5120 }
  0x2b   : > { %p6292_p9 = scmp.ne.s32.totalorder %s8957_s8, %s6291_s20  ;;  %p6298_p12 = scmp.lt.u32.totalorder %s6291_s20, %s8957_s8 }
  0x2d   : > { %p6294_p10 = pnand %p6292_p9, %p6541_p7 }
  0x2f   : > { %p6295_p11 = pneg %p6294_p10 }
  0x31   : > { %p6300_p13 = pnand %p6298_p12, %p6295_p11 }
  0x33   : > { %6303 = shalt.err (!%p6300_p13)
}
  0x34   : > { %s6304_s26 = scalar_lea.vmem %s6523_s28, 5120  ;;  %p6312_p6 = scmp.lt.s32.totalorder %s6523_s28, %s6523_s28 }
  0x35   : > { %p6305_p0 = scmp.ne.s32.totalorder %s6523_s28, %s6304_s26  ;;  %p6313_p8 = scmp.lt.s32.totalorder %s6304_s26, %s6304_s26 }
  0x37   : > { %p6307_p1 = pnand %p6305_p0, %p6541_p7  ;;  %p6314_p9 = por %p6313_p8, %p6312_p6 }
  0x39   : > { %p6308_p4 = pneg %p6307_p1 }
  0x3b   : > { %p6315_p10 = pnand %p6314_p9, %p6308_p4 }
  0x3d   : > { %6318 = shalt.err (!%p6315_p10)
}
  0x3e   : > { %s6428_s15 = smov 640   ;;  %s6429_s12 = smov 40  }
  0x3f   : > { %5683 = dma.hbm_to_vmem [thread:$0]  (!%p6527_p5), %s8957_s8, 5120, %s6523_s28, [#allocation8], %s6428_s15, %s6428_s15, %s6429_s12  }
  0x40   : > { %s6430_s17 = smov [#allocation6]   ;;  %s6319_s27 = scalar_lea.hbm %s8950_s1, 1024 }
  0x41   : > { %s361_s18 = sshll.u32 %s6430_s17, 4  ;;  %p6320_p11 = scmp.ne.s32.totalorder %s8950_s1, %s6319_s27  ;;  %s362_s18 = int_to_ptr.vmem [resolvable:$true] %s361_s18 }
  0x42   : > { %p6326_p0 = scmp.lt.u32.totalorder %s6319_s27, %s8950_s1 }
  0x43   : > { %p6322_p12 = pnand %p6320_p11, %p6541_p7 }
  0x45   : > { %p6323_p13 = pneg %p6322_p12 }
  0x47   : > { %p6328_p1 = pnand %p6326_p0, %p6323_p13 }
  0x49   : > { %6331 = shalt.err (!%p6328_p1)
}
  0x4a   : > { %s6332_s28 = scalar_lea.vmem %s326_s13, 1024  ;;  %p6340_p9 = scmp.lt.s32.totalorder %s326_s13, %s326_s13 }
  0x4b   : > { %p6333_p4 = scmp.ne.s32.totalorder %s326_s13, %s6332_s28  ;;  %p6341_p10 = scmp.lt.s32.totalorder %s6332_s28, %s6332_s28 }
  0x4d   : > { %p6335_p6 = pnand %p6333_p4, %p6541_p7  ;;  %p6342_p2 = por %p6341_p10, %p6340_p9 }
  0x4f   : > { %p6336_p8 = pneg %p6335_p6 }
  0x51   : > { %p6343_p3 = pnand %p6342_p2, %p6336_p8 }
  0x53   : > { %6346 = shalt.err (!%p6343_p3)
}
  0x54   : > { %s8978_s30 = smov 8   ;;  %s8979_s15 = smov 128  }
  0x55   : > { %5674 = dma.hbm_to_vmem [thread:$0]  (!%p6527_p5), %s8950_s1, 1024, %s326_s13, [#allocation3], %s8979_s15, %s8979_s15, %s8978_s30  }
  0x56   : > { %s6347_s16 = scalar_lea.hbm %s8955_s6, 64 }
  0x57   : > { %p6348_p2 = scmp.ne.s32.totalorder %s8955_s6, %s6347_s16  ;;  %p6354_p12 = scmp.lt.u32.totalorder %s6347_s16, %s8955_s6 }
  0x59   : > { %p6350_p3 = pnand %p6348_p2, %p6541_p7 }
  0x5b   : > { %p6351_p11 = pneg %p6350_p3 }
  0x5d   : > { %p6356_p13 = pnand %p6354_p12, %p6351_p11 }
  0x5f   : > { %6359 = shalt.err (!%p6356_p13)
}
  0x60   : > { %s6360_s26 = scalar_lea.vmem %s362_s18, 64  ;;  %p6368_p6 = scmp.lt.s32.totalorder %s362_s18, %s362_s18 }
  0x61   : > { %p6361_p0 = scmp.ne.s32.totalorder %s362_s18, %s6360_s26  ;;  %p6369_p8 = scmp.lt.s32.totalorder %s6360_s26, %s6360_s26 }
  0x63   : > { %p6363_p1 = pnand %p6361_p0, %p6541_p7  ;;  %p6370_p9 = por %p6369_p8, %p6368_p6 }
  0x65   : > { %p6364_p4 = pneg %p6363_p1 }
  0x67   : > { %p6371_p10 = pnand %p6370_p9, %p6364_p4 }
  0x69   : > { %6374 = shalt.err (!%p6371_p10)
}
  0x6a   : > { %5680 = dma.hbm_to_vmem [thread:$0]  (!%p6527_p5), %s8955_s6, 64, %s362_s18, [#allocation5]  }
  0x6b   : > { %s6431_s30 = smov [#allocation9]   ;;  %s6375_s12 = scalar_lea.hbm %s8958_s9, 64 }
  0x6c   : > { %s388_s15 = sshll.u32 %s6431_s30, 4  ;;  %p6376_p2 = scmp.ne.s32.totalorder %s8958_s9, %s6375_s12  ;;  %s389_s15 = int_to_ptr.vmem [resolvable:$true] %s388_s15 }
  0x6d   : > { %p6382_p12 = scmp.lt.u32.totalorder %s6375_s12, %s8958_s9 }
  0x6e   : > { %p6378_p3 = pnand %p6376_p2, %p6541_p7 }
  0x70   : > { %p6379_p11 = pneg %p6378_p3 }
  0x72   : > { %p6384_p13 = pnand %p6382_p12, %p6379_p11 }
  0x74   : > { %6387 = shalt.err (!%p6384_p13)
}
  0x75   : > { %s6388_s18 = scalar_lea.vmem %s389_s15, 64  ;;  %p6396_p6 = scmp.lt.s32.totalorder %s389_s15, %s389_s15 }
  0x76   : > { %p6389_p0 = scmp.ne.s32.totalorder %s389_s15, %s6388_s18  ;;  %p6397_p8 = scmp.lt.s32.totalorder %s6388_s18, %s6388_s18 }
  0x78   : > { %p6391_p1 = pnand %p6389_p0, %p6541_p7  ;;  %p6398_p9 = por %p6397_p8, %p6396_p6 }
  0x7a   : > { %p6392_p4 = pneg %p6391_p1 }
  0x7c   : > { %p6399_p10 = pnand %p6398_p9, %p6392_p4 }
  0x7e   : > { %6402 = shalt.err (!%p6399_p10)
}
  0x7f   : > { %5686 = dma.hbm_to_vmem [thread:$0]  (!%p6527_p5), %s8958_s9, 64, %s389_s15, [#allocation8]  }
  0x80   : > { %p8980_p2 = scmp.ne.s32.totalorder %s8974_s24, 0 }
  0x82   : > { %416 = sbr.rel (%p8980_p2) target bundleno = 3961 (0xf79), region = 68 }
  0x89   : > { %p8981_p3 = scmp.ne.s32.totalorder %s8973_s23, 0 }
  0x8b   : > { %6408 = dma.done.wait (%p8981_p3), [#allocation3], 1024  }
  0x8c   : > { %6410 = vsyncadd (%p8981_p3), [#allocation3], 4294966272 }
  0x8d   : > { %6412 = dma.done.wait (%p8981_p3), [#allocation5], 1088  }
  0x8e   : > { %6414 = vsyncadd (%p8981_p3), [#allocation5], 4294966208 }
  0x8f   : > { %6416 = dma.done.wait (%p8981_p3), [#allocation8], 5184  }
  0x90   : > { %6418 = vsyncadd (%p8981_p3), [#allocation8], 4294962112  ;;  %s8982_s24 = sadd.s32 4294967295, %s6421_s21   ;;  %v502_v0 = vld [vmem:[#allocation2] sm:$0xff]  ;;  %v503_v1 = vld [vmem:[#allocation2 + $0x8] sm:$0xff]  ;;  %vm517_vm0 = vcmask 523264  }
  0x91   : > { %s4874_s29 = sshll.u32 %s8982_s24, 4  ;;  %v504_v2 = vld [vmem:[#allocation2 + $0x10] sm:$0xff]  ;;  %v5447_v3 = vpack.c.bf16 %v503_v1, %v502_v0  ;;  %v505_v4 = vld [vmem:[#allocation2 + $0x18] sm:$0xff]  ;;  %v506_v6 = vld [vmem:[#allocation2 + $0x20] sm:$0xff]  ;;  %s6432_s15 = smov 64   ;;  %vm1747_vm1 = vcmask 261120  }
  0x92   : > { %p475_p5 = scmp.lt.s32.totalorder %s4874_s29, 31  ;;  %v5451_v5 = vpack.c.bf16 %v505_v4, %v504_v2  ;;  %v507_v7 = vld [vmem:[#allocation2 + $0x28] sm:$0xff]  ;;  %v508_v10 = vld [vmem:[#allocation2 + $0x30] sm:$0xff]  ;;  %v509_v11 = vld [vmem:[#allocation2 + $0x38] sm:$0xff]  ;;  %s6434_s12 = smov 96   ;;  %vm4736_vm2 = vcmask 130048  }
  0x93   : > { %5448 = vmatprep.subr.bf16.mxu0 %v5447_v3  ;;  %v5455_v9 = vpack.c.bf16 %v507_v7, %v506_v6  ;;  %v5459_v12 = vpack.c.bf16 %v509_v11, %v508_v10  ;;  %v807_v28 = vld [vmem:[#allocation4] sm:$0xff]  ;;  %v808_v29 = vld [vmem:[#allocation4 + $0x8] sm:$0xff]  ;;  %v809_v30 = vld [vmem:[#allocation4 + $0x10] sm:$0xff]  ;;  %s6435_s26 = smov 32  }
  0x94   : > { %s9047_s29 = smov (!%p475_p5, %s4874_s29), 31  ;;  %5450 = vmatpush3.bf16.msra.mxu0 %v5447_v3  ;;  %v5463_v31 = vpack.c.bf16 %v808_v29, %v807_v28  ;;  %v810_v32 = vld [vmem:[#allocation4 + $0x18] sm:$0xff]  ;;  %v811_v34 = vld [vmem:[#allocation4 + $0x20] sm:$0xff]  ;;  %v812_v35 = vld [vmem:[#allocation4 + $0x28] sm:$0xff] }
  0x95   : > { %s4875_s19 = sshll.u32 %s9047_s29, 3  ;;  %5452 = vmatprep.subr.bf16.mxu0 %v5451_v5  ;;  %v5467_v33 = vpack.c.bf16 %v810_v32, %v809_v30  ;;  %v5471_v36 = vpack.c.bf16 %v812_v35, %v811_v34  ;;  %v813_v37 = vld [vmem:[#allocation4 + $0x30] sm:$0xff]  ;;  %v814_v38 = vld [vmem:[#allocation4 + $0x38] sm:$0xff]  ;;  %v4878_v40 = vld [vmem:[%s8951_s2] ss:$0 sm:$0xff] }
  0x96   : > { %s6670_s28 = scalar_lea.vmem %s8949_s0, %s4875_s19  ;;  %5464 = vmatprep.subr.bf16.mxu1 %v5463_v31  ;;  %v5475_v39 = vpack.c.bf16 %v814_v38, %v813_v37  ;;  %v1032_v4 = vld [vmem:[%s8954_s5 + $0x8] sm:$0xff]  ;;  %v1031_v6 = vld [vmem:[%s8954_s5] sm:$0xff]  ;;  %v1034_v11 = vld [vmem:[%s8954_s5 + $0x18] sm:$0xff] }
  0x97   : > { %v486_v8 = vld [vmem:[%s6670_s28] sm:$0xff]  ;;  %v487_v13 = vld [vmem:[%s6670_s28 + $0x8] sm:$0xff]  ;;  %v488_v14 = vld [vmem:[%s6670_s28 + $0x10] sm:$0xff]  ;;  %5466 = vmatpush3.bf16.msra.mxu1 %v5463_v31 }
  0x98   : > { %5191 = vmatprep.mubr.msk.f32.mxu0 %vm517_vm0, %v486_v8  ;;  %5454 = vmatpush3.bf16.msra.mxu0 %v5451_v5  ;;  %v489_v15 = vld [vmem:[%s6670_s28 + $0x18] sm:$0xff]  ;;  %v490_v16 = vld [vmem:[%s6670_s28 + $0x20] sm:$0xff]  ;;  %v491_v17 = vld [vmem:[%s6670_s28 + $0x28] sm:$0xff] }
  0x99   : > { %5456 = vmatprep.subr.bf16.mxu0 %v5455_v9  ;;  %v492_v18 = vld [vmem:[%s6670_s28 + $0x30] sm:$0xff]  ;;  %v493_v19 = vld [vmem:[%s6670_s28 + $0x38] sm:$0xff]  ;;  %v494_v20 = vld [vmem:[%s6670_s28 + $0x40] sm:$0xff]  ;;  %5468 = vmatprep.subr.bf16.mxu1 %v5467_v33 }
  0x9a   : > { %v495_v21 = vld [vmem:[%s6670_s28 + $0x48] sm:$0xff]  ;;  %v496_v22 = vld [vmem:[%s6670_s28 + $0x50] sm:$0xff]  ;;  %v497_v23 = vld [vmem:[%s6670_s28 + $0x58] sm:$0xff] }
  0x9b   : > { %v498_v24 = vld [vmem:[%s6670_s28 + $0x60] sm:$0xff]  ;;  %v499_v25 = vld [vmem:[%s6670_s28 + $0x68] sm:$0xff]  ;;  %v500_v26 = vld [vmem:[%s6670_s28 + $0x70] sm:$0xff]  ;;  %5470 = vmatpush3.bf16.msra.mxu1 %v5467_v33 }
  0x9c   : > { %5458 = vmatpush3.bf16.msra.mxu0 %v5455_v9  ;;  %v501_v27 = vld [vmem:[%s6670_s28 + $0x78] sm:$0xff]  ;;  %5472 = vmatprep.subr.bf16.mxu1 %v5471_v36  ;;  %v1036_v5 = vld [vmem:[%s8954_s5 + $0x28] sm:$0xff]  ;;  %v1035_v10 = vld [vmem:[%s8954_s5 + $0x20] sm:$0xff]  ;;  %s9045_s28 = sld [smem:[#allocation43_spill]] }
  0x9d   : > { %5460 = vmatprep.subr.bf16.mxu0 %v5459_v12  ;;  %v5479_v9 = vpack.c.bf16 %v1036_v5, %v1032_v4  ;;  %v1051_v28 = vld [vmem:[%s8954_s5 + $0xa0] sm:$0xff]  ;;  %v1056_v30 = vld [vmem:[%s8954_s5 + $0xc8] sm:$0xff] }
  0x9e   : > { %v1060_v31 = vld [vmem:[%s8954_s5 + $0xe8] sm:$0xff]  ;;  %v1055_v32 = vld [vmem:[%s8954_s5 + $0xc0] sm:$0xff] }
  0x9f   : > { %5474 = vmatpush3.bf16.msra.mxu1 %v5471_v36  ;;  %v1059_v33 = vld [vmem:[%s8954_s5 + $0xe0] sm:$0xff]  ;;  %v5491_v34 = vpack.c.bf16 %v1060_v31, %v1056_v30  ;;  %v1064_v35 = vld [vmem:[%s8954_s5 + $0x108] sm:$0xff]  ;;  %v1049_v30 = vld [vmem:[%s8954_s5 + $0x90] sm:$0xff] }
  0xa0   : > { %5462 = vmatpush3.bf16.msra.mxu0 %v5459_v12  ;;  %5476 = vmatprep.subr.bf16.mxu1 %v5475_v39  ;;  %v1068_v36 = vld [vmem:[%s8954_s5 + $0x128] sm:$0xff]  ;;  %v5493_v37 = vpack.c.bf16 %v1059_v33, %v1055_v32  ;;  %v1058_v32 = vld [vmem:[%s8954_s5 + $0xd8] sm:$0xff] }
  0xa1   : > { %5480 = vmatprep.subr.bf16.mxu0 %v5479_v9  ;;  %v5495_v38 = vpack.c.bf16 %v1068_v36, %v1064_v35  ;;  %v1062_v33 = vld [vmem:[%s8954_s5 + $0xf8] sm:$0xff] }
  0xa2   : > { %s8912_s23 = scalar_lea.vmem %s9045_s28, %s4875_s19 }
  0xa3   : > { %5192 = vmatmul.mubr.msk.f32.vlgmr.msra.gmra.mrb[0].mxu0 %vm517_vm0, %v487_v13  ;;  %5478 = vmatpush3.bf16.msra.mxu1 %v5475_v39  ;;  %v5481_v13 = vpack.c.bf16 %v1035_v10, %v1031_v6  ;;  %v1063_v39 = vld [vmem:[%s8954_s5 + $0x100] sm:$0xff]  ;;  %v1033_v6 = vld [vmem:[%s8954_s5 + $0x10] sm:$0xff] }
  0xa4   : > { %5194 = vmatprep.mubr.msk.f32.mxu0 %vm517_vm0, %v488_v14  ;;  %v1038_v14 = vld [vmem:[%s8954_s5 + $0x38] sm:$0xff] }
  0xa5   : > { %5482 = vmatpush1.bf16.msra.mxu0 %v5481_v13 }
  0xa7   : > { %5195 = vmatmul.mubr.msk.f32.gmra.mrb[2].mxu0 %vm517_vm0, %v489_v15 }
  0xa8   : > { %5197 = vmatprep.mubr.msk.f32.mxu0 %vm517_vm0, %v490_v16  ;;  %v5511_v16 = vpack.c.bf16 %v1038_v14, %v1034_v11  ;;  %v1042_v11 = vld [vmem:[%s8954_s5 + $0x58] sm:$0xff] }
  0xaa   : > { %5512 = vmatprep.subr.bf16.mxu1 %v5511_v16 }
  0xab   : > { %5198 = vmatmul.mubr.msk.f32.gmra.mrb[4].mxu0 %vm517_vm0, %v491_v17  ;;  %v1040_v17 = vld [vmem:[%s8954_s5 + $0x48] sm:$0xff] }
  0xac   : > { %5200 = vmatprep.mubr.msk.f32.mxu0 %vm517_vm0, %v492_v18  ;;  %v1044_v18 = vld [vmem:[%s8954_s5 + $0x68] sm:$0xff] }
  0xaf   : > { %5201 = vmatmul.mubr.msk.f32.gmra.mrb[6].mxu0 %vm517_vm0, %v493_v19  ;;  %v1039_v19 = vld [vmem:[%s8954_s5 + $0x40] sm:$0xff] }
  0xb0   : > { %5203 = vmatprep.mubr.msk.f32.mxu0 %vm517_vm0, %v494_v20  ;;  %v5483_v20 = vpack.c.bf16 %v1044_v18, %v1040_v17 }
  0xb2   : > { %5484 = vmatprep.subr.bf16.mxu0 %v5483_v20  ;;  %v1045_v20 = vld [vmem:[%s8954_s5 + $0x70] sm:$0xff] }
  0xb3   : > { %5204 = vmatmul.mubr.msk.f32.gmra.mrb[8].mxu0 %vm517_vm0, %v495_v21  ;;  %v1043_v21 = vld [vmem:[%s8954_s5 + $0x60] sm:$0xff] }
  0xb4   : > { %5206 = vmatprep.mubr.msk.f32.mxu0 %vm517_vm0, %v496_v22 }
  0xb7   : > { %5207 = vmatmul.mubr.msk.f32.gmra.mrb[10].mxu0 %vm517_vm0, %v497_v23  ;;  %v5485_v23 = vpack.c.bf16 %v1043_v21, %v1039_v19  ;;  %v1041_v19 = vld [vmem:[%s8954_s5 + $0x50] sm:$0xff] }
  0xb8   : > { %5209 = vmatprep.mubr.msk.f32.mxu0 %vm517_vm0, %v498_v24  ;;  %v1048_v24 = vld [vmem:[%s8954_s5 + $0x88] sm:$0xff] }
  0xb9   : > { %5486 = vmatpush1.bf16.msra.mxu0 %v5485_v23 }
  0xbb   : > { %5210 = vmatmul.mubr.msk.f32.gmra.mrb[12].mxu0 %vm517_vm0, %v499_v25  ;;  %v1052_v25 = vld [vmem:[%s8954_s5 + $0xa8] sm:$0xff] }
  0xbc   : > { %5212 = vmatprep.mubr.msk.f32.mxu0 %vm517_vm0, %v500_v26  ;;  %v1047_v26 = vld [vmem:[%s8954_s5 + $0x80] sm:$0xff] }
  0xbd   : > { %v5489_v29 = vpack.c.bf16 %v1051_v28, %v1047_v26  ;;  %v5517_v26 = vpack.c.bf16 %v1045_v20, %v1041_v19  ;;  %v1081_v20 = vld [vmem:[%s8954_s5 + $0x190] sm:$0xff] }
  0xbf   : > { %5213 = vmatmul.mubr.msk.f32.gmra.mrb[14].mxu0 %vm517_vm0, %v501_v27  ;;  %v5487_v27 = vpack.c.bf16 %v1052_v25, %v1048_v24 }
  0xc1   : > { %5488 = vmatprep.subr.bf16.mxu0 %v5487_v27 }
  0xc2   : > { %5490 = vmatpush1.bf16.msra.mxu0 %v5489_v29 }
  0xc3   : > { %5492 = vmatprep.subr.bf16.mxu0 %v5491_v34 }
  0xc6   : > { %5494 = vmatpush1.bf16.msra.mxu0 %v5493_v37 }
  0xc7   : > { %5496 = vmatprep.subr.bf16.mxu0 %v5495_v38 }
 0x176   : > { %v5193_v41 = vpop.f32.mrb[0].mxu0 }
 0x177   : > { %v632_v42 = vpop.f32.mrb[1].mxu0  ;;  %v6711_v46 = vadd.f32 %v5193_v41, %v4878_v40  ;;  %v1072_v41 = vld [vmem:[%s8954_s5 + $0x148] sm:$0xff] }
 0x178   : > { %v6707_v43 = vadd.f32 %v4878_v40, %v632_v42  ;;  %v1076_v42 = vld [vmem:[%s8954_s5 + $0x168] sm:$0xff] }
 0x17a   : > { %v5196_v44 = vpop.f32.mrb[2].mxu0  ;;  %727 = vrot.lane.b32.xlu0 %v6707_v43, %s6432_s15 }
 0x17b   : > { %v642_v45 = vpop.f32.mrb[3].mxu0  ;;  %v6715_v48 = vadd.f32 %v5196_v44, %v4878_v40 }
 0x17c   : > { %v6713_v47 = vadd.f32 %v4878_v40, %v642_v45  ;;  %v5499_v45 = vpack.c.bf16 %v1076_v42, %v1072_v41  ;;  %v1066_v42 = vld [vmem:[%s8954_s5 + $0x118] sm:$0xff] }
 0x17e   : > { %v5199_v49 = vpop.f32.mrb[4].mxu0  ;;  %731 = vrot.lane.b32.xlu1 %v6713_v47, %s6432_s15  ;;  %729 = vrot.lane.b32.xlu0 %v6711_v46, %s6432_s15 }
 0x17f   : > { %v652_v50 = vpop.f32.mrb[5].mxu0  ;;  %v6723_v52 = vadd.f32 %v5199_v49, %v4878_v40  ;;  %v1071_v49 = vld [vmem:[%s8954_s5 + $0x140] sm:$0xff] }
 0x180   : > { %v6721_v51 = vadd.f32 %v4878_v40, %v652_v50  ;;  %v1075_v50 = vld [vmem:[%s8954_s5 + $0x160] sm:$0xff] }
 0x182   : > { %v5202_v53 = vpop.f32.mrb[6].mxu0  ;;  %733 = vrot.lane.b32.xlu1 %v6715_v48, %s6432_s15  ;;  %735 = vrot.lane.b32.xlu0 %v6721_v51, %s6432_s15 }
 0x183   : > { %v662_v54 = vpop.f32.mrb[7].mxu0  ;;  %v6731_v56 = vadd.f32 %v5202_v53, %v4878_v40  ;;  %v1080_v53 = vld [vmem:[%s8954_s5 + $0x188] sm:$0xff] }
 0x184   : > { %v6729_v55 = vadd.f32 %v4878_v40, %v662_v54  ;;  %v1084_v54 = vld [vmem:[%s8954_s5 + $0x1a8] sm:$0xff] }
 0x186   : > { %v5205_v57 = vpop.f32.mrb[8].mxu0  ;;  %737 = vrot.lane.b32.xlu1 %v6723_v52, %s6432_s15  ;;  %739 = vrot.lane.b32.xlu0 %v6729_v55, %s6432_s15 }
 0x187   : > { %v672_v58 = vpop.f32.mrb[9].mxu0  ;;  %v6739_v60 = vadd.f32 %v5205_v57, %v4878_v40  ;;  %v5501_v57 = vpack.c.bf16 %v1075_v50, %v1071_v49 }
 0x188   : > { %v6737_v59 = vadd.f32 %v4878_v40, %v672_v58  ;;  %v5503_v58 = vpack.c.bf16 %v1084_v54, %v1080_v53 }
 0x18a   : > { %v5208_v61 = vpop.f32.mrb[10].mxu0  ;;  %741 = vrot.lane.b32.xlu1 %v6731_v56, %s6432_s15  ;;  %743 = vrot.lane.b32.xlu0 %v6737_v59, %s6432_s15 }
 0x18b   : > { %v682_v62 = vpop.f32.mrb[11].mxu0  ;;  %v6747_v0 = vadd.f32 %v5208_v61, %v4878_v40  ;;  %v1079_v61 = vld [vmem:[%s8954_s5 + $0x180] sm:$0xff] }
 0x18c   : > { %v6745_v63 = vadd.f32 %v4878_v40, %v682_v62  ;;  %v1083_v62 = vld [vmem:[%s8954_s5 + $0x1a0] sm:$0xff] }
 0x18e   : > { %v5211_v1 = vpop.f32.mrb[12].mxu0  ;;  %745 = vrot.lane.b32.xlu1 %v6739_v60, %s6432_s15  ;;  %747 = vrot.lane.b32.xlu0 %v6745_v63, %s6432_s15 }
 0x18f   : > { %v692_v2 = vpop.f32.mrb[13].mxu0  ;;  %v6764_v7 = vadd.f32 %v5211_v1, %v4878_v40  ;;  %v5505_v1 = vpack.c.bf16 %v1083_v62, %v1079_v61  ;;  %v1074_v62 = vld [vmem:[%s8954_s5 + $0x158] sm:$0xff] }
 0x190   : > { %v6753_v3 = vadd.f32 %v4878_v40, %v692_v2 }
 0x192   : > { %v5214_v8 = vpop.f32.mrb[14].mxu0  ;;  %749 = vrot.lane.b32.xlu1 %v6747_v0, %s6432_s15  ;;  %751 = vrot.lane.b32.xlu0 %v6753_v3, %s6432_s15 }
 0x193   : > { %v702_v12 = vpop.f32.mrb[15].mxu0  ;;  %v6793_v22 = vadd.f32 %v5214_v8, %v4878_v40  ;;  %v1037_v8 = vld [vmem:[%s8954_s5 + $0x30] sm:$0xff] }
 0x194   : > { %v6779_v15 = vadd.f32 %v4878_v40, %v702_v12  ;;  %v1067_v40 = vld [vmem:[%s8954_s5 + $0x120] sm:$0xff]  ;;  %v1046_v12 = vld [vmem:[%s8954_s5 + $0x78] sm:$0xff]  ;;  %v5513_v14 = vpack.c.bf16 %v1037_v8, %v1033_v6 }
 0x195   : > { %v5497_v44 = vpack.c.bf16 %v1067_v40, %v1063_v39  ;;  %v5515_v18 = vpack.c.bf16 %v1046_v12, %v1042_v11  ;;  %v5523_v39 = vpack.c.bf16 %v1062_v33, %v1058_v32  ;;  %v1057_v40 = vld [vmem:[%s8954_s5 + $0xd0] sm:$0xff]  ;;  %v1082_v12 = vld [vmem:[%s8954_s5 + $0x198] sm:$0xff] }
 0x196   : > { %753 = vrot.lane.b32.xlu1 %v6764_v7, %s6432_s15  ;;  %755 = vrot.lane.b32.xlu0 %v6779_v15, %s6432_s15  ;;  %v1089_v32 = vld [vmem:[%s8954_s5 + $0x1d0] sm:$0xff] }
 0x197   : > { %5498 = vmatpush1.bf16.msra.mxu0 %v5497_v44  ;;  %v1070_v44 = vld [vmem:[%s8954_s5 + $0x138] sm:$0xff]  ;;  %v1093_v33 = vld [vmem:[%s8954_s5 + $0x1f0] sm:$0xff] }
 0x198   : > { %5500 = vmatprep.subr.bf16.mxu0 %v5499_v45 }
 0x19a   : > { %757 = vrot.lane.b32.xlu1 %v6793_v22, %s6432_s15 }
 0x19b   : > { %5502 = vmatpush1.bf16.msra.mxu0 %v5501_v57  ;;  %v5527_v57 = vpack.c.bf16 %v1070_v44, %v1066_v42 }
 0x19c   : > { %5504 = vmatprep.subr.bf16.mxu0 %v5503_v58  ;;  %v1065_v58 = vld [vmem:[%s8954_s5 + $0x110] sm:$0xff] }
 0x19f   : > { %5506 = vmatpush1.bf16.msra.mxu0 %v5505_v1  ;;  %v1078_v1 = vld [vmem:[%s8954_s5 + $0x178] sm:$0xff] }
 0x1ec   : > { %v728_v2 = vpop.permute.xlu0 %727 }
 0x1ed   : > { %v775_v4 = vmax.f32 %v6707_v43, %v728_v2 }
 0x1ef   : > { %v791_v5 = vmax.f32 %v775_v4, 0.0 }
 0x1f0   : > { %v732_v9 = vpop.permute.xlu1 %731  ;;  %v730_v10 = vpop.permute.xlu0 %729 }
 0x1f1   : > { %v777_v43 = vmax.f32 %v6713_v47, %v732_v9  ;;  %v776_v13 = vmax.f32 %v6711_v46, %v730_v10  ;;  %5231 = vmatprep.mubr.msk.f32.mxu1 %vm517_vm0, %v791_v5  ;;  %v1050_v46 = vld [vmem:[%s8954_s5 + $0x98] sm:$0xff]  ;;  %v5531_v9 = vpack.c.bf16 %v1078_v1, %v1074_v62  ;;  %v1073_v10 = vld [vmem:[%s8954_s5 + $0x150] sm:$0xff] }
 0x1f2   : > { %v1054_v47 = vld [vmem:[%s8954_s5 + $0xb8] sm:$0xff] }
 0x1f3   : > { %v793_v16 = vmax.f32 %v777_v43, 0.0  ;;  %v792_v17 = vmax.f32 %v776_v13, 0.0  ;;  %v5519_v29 = vpack.c.bf16 %v1054_v47, %v1050_v46  ;;  %v1086_v43 = vld [vmem:[%s8954_s5 + $0x1b8] sm:$0xff] }
 0x1f4   : > { %v734_v21 = vpop.permute.xlu1 %733  ;;  %v736_v23 = vpop.permute.xlu0 %735  ;;  %v5535_v19 = vpack.c.bf16 %v1086_v43, %v1082_v12 }
 0x1f5   : > { %v778_v24 = vmax.f32 %v6715_v48, %v734_v21  ;;  %v779_v25 = vmax.f32 %v6721_v51, %v736_v23  ;;  %5232 = vmatmul.mubr.msk.f32.vlgmr.msra.gmra.mrb[0].mxu1 %vm517_vm0, %v792_v17  ;;  %v1053_v48 = vld [vmem:[%s8954_s5 + $0xb0] sm:$0xff] }
 0x1f6   : > { %5234 = vmatprep.mubr.msk.f32.mxu1 %vm517_vm0, %v793_v16  ;;  %5514 = vmatpush1.bf16.msra.mxu1 %v5513_v14  ;;  %v5521_v36 = vpack.c.bf16 %v1053_v48, %v1049_v30  ;;  %v1087_v30 = vld [vmem:[%s8954_s5 + $0x1c0] sm:$0xff] }
 0x1f7   : > { %v794_v27 = vmax.f32 %v778_v24, 0.0  ;;  %v795_v28 = vmax.f32 %v779_v25, 0.0  ;;  %5516 = vmatprep.subr.bf16.mxu1 %v5515_v18  ;;  %v1091_v48 = vld [vmem:[%s8954_s5 + $0x1e0] sm:$0xff] }
 0x1f8   : > { %v738_v31 = vpop.permute.xlu1 %737  ;;  %v740_v51 = vpop.permute.xlu0 %739 }
 0x1f9   : > { %v780_v34 = vmax.f32 %v6723_v52, %v738_v31  ;;  %v781_v35 = vmax.f32 %v6729_v55, %v740_v51  ;;  %5235 = vmatmul.mubr.msk.f32.gmra.mrb[2].mxu1 %vm517_vm0, %v794_v27  ;;  %v1061_v52 = vld [vmem:[%s8954_s5 + $0xf0] sm:$0xff]  ;;  %v5509_v31 = vpack.c.bf16 %v1091_v48, %v1087_v30  ;;  %v1094_v51 = vld [vmem:[%s8954_s5 + $0x1f8] sm:$0xff] }
 0x1fa   : > { %5237 = vmatprep.mubr.msk.f32.mxu1 %vm517_vm0, %v795_v28  ;;  %5518 = vmatpush1.bf16.msra.mxu1 %v5517_v26  ;;  %v5525_v50 = vpack.c.bf16 %v1061_v52, %v1057_v40  ;;  %v1092_v28 = vld [vmem:[%s8954_s5 + $0x1e8] sm:$0xff] }
 0x1fb   : > { %v796_v37 = vmax.f32 %v780_v34, 0.0  ;;  %v797_v38 = vmax.f32 %v781_v35, 0.0  ;;  %5520 = vmatprep.subr.bf16.mxu1 %v5519_v29  ;;  %v5541_v35 = vpack.c.bf16 %v1093_v33, %v1089_v32 }
 0x1fc   : > { %v742_v41 = vpop.permute.xlu1 %741  ;;  %v744_v55 = vpop.permute.xlu0 %743 }
 0x1fd   : > { %v782_v45 = vmax.f32 %v6731_v56, %v742_v41  ;;  %v783_v49 = vmax.f32 %v6737_v59, %v744_v55  ;;  %5238 = vmatmul.mubr.msk.f32.gmra.mrb[4].mxu1 %vm517_vm0, %v796_v37  ;;  %v1069_v56 = vld [vmem:[%s8954_s5 + $0x130] sm:$0xff]  ;;  %v7000_v37 = vld [vmem:[%s8953_s4] ss:$0 sm:$0xff] }
 0x1fe   : > { %5240 = vmatprep.mubr.msk.f32.mxu1 %vm517_vm0, %v797_v38  ;;  %5522 = vmatpush1.bf16.msra.mxu1 %v5521_v36  ;;  %v5529_v5 = vpack.c.bf16 %v1069_v56, %v1065_v58  ;;  %v8969_v36 = vmov 0.0  }
 0x1ff   : > { %v798_v53 = vmax.f32 %v782_v45, 0.0  ;;  %v799_v54 = vmax.f32 %v783_v49, 0.0  ;;  %5524 = vmatprep.subr.bf16.mxu1 %v5523_v39  ;;  %1181 = vmatprep.mubr.f32.mxu0 %v8969_v36 }
 0x200   : > { %v746_v61 = vpop.permute.xlu1 %745  ;;  %v748_v59 = vpop.permute.xlu0 %747 }
 0x201   : > { %v784_v2 = vmax.f32 %v6739_v60, %v746_v61  ;;  %v785_v4 = vmax.f32 %v6745_v63, %v748_v59  ;;  %5241 = vmatmul.mubr.msk.f32.gmra.mrb[6].mxu1 %vm517_vm0, %v798_v53  ;;  %v1077_v60 = vld [vmem:[%s8954_s5 + $0x170] sm:$0xff] }
 0x202   : > { %5243 = vmatprep.mubr.msk.f32.mxu1 %vm517_vm0, %v799_v54  ;;  %5526 = vmatpush1.bf16.msra.mxu1 %v5525_v50  ;;  %v5533_v16 = vpack.c.bf16 %v1077_v60, %v1073_v10 }
 0x203   : > { %v800_v6 = vmax.f32 %v784_v2, 0.0  ;;  %v801_v8 = vmax.f32 %v785_v4, 0.0  ;;  %5528 = vmatprep.subr.bf16.mxu1 %v5527_v57 }
 0x204   : > { %v750_v11 = vpop.permute.xlu1 %749  ;;  %v752_v63 = vpop.permute.xlu0 %751 }
 0x205   : > { %v786_v13 = vmax.f32 %v6747_v0, %v750_v11  ;;  %v787_v14 = vmax.f32 %v6753_v3, %v752_v63  ;;  %5244 = vmatmul.mubr.msk.f32.gmra.mrb[8].mxu1 %vm517_vm0, %v800_v6  ;;  %v1085_v0 = vld [vmem:[%s8954_s5 + $0x1b0] sm:$0xff] }
 0x206   : > { %5246 = vmatprep.mubr.msk.f32.mxu1 %vm517_vm0, %v801_v8  ;;  %5530 = vmatpush1.bf16.msra.mxu1 %v5529_v5  ;;  %v5537_v47 = vpack.c.bf16 %v1085_v0, %v1081_v20 }
 0x207   : > { %v802_v17 = vmax.f32 %v786_v13, 0.0  ;;  %v803_v18 = vmax.f32 %v787_v14, 0.0  ;;  %5532 = vmatprep.subr.bf16.mxu1 %v5531_v9 }
 0x208   : > { %v754_v21 = vpop.permute.xlu1 %753  ;;  %v756_v3 = vpop.permute.xlu0 %755 }
 0x209   : > { %v788_v23 = vmax.f32 %v6764_v7, %v754_v21  ;;  %v789_v46 = vmax.f32 %v6779_v15, %v756_v3  ;;  %5247 = vmatmul.mubr.msk.f32.gmra.mrb[10].mxu1 %vm517_vm0, %v802_v17  ;;  %v1088_v15 = vld [vmem:[%s8954_s5 + $0x1c8] sm:$0xff] }
 0x20a   : > { %5249 = vmatprep.mubr.msk.f32.mxu1 %vm517_vm0, %v803_v18  ;;  %5534 = vmatpush1.bf16.msra.mxu1 %v5533_v16  ;;  %v5507_v29 = vpack.c.bf16 %v1092_v28, %v1088_v15  ;;  %v7051_v28 = vld [vmem:[#allocation6] sm:$0xf] }
 0x20b   : > { %v804_v24 = vmax.f32 %v788_v23, 0.0  ;;  %v805_v25 = vmax.f32 %v789_v46, 0.0  ;;  %5536 = vmatprep.subr.bf16.mxu1 %v5535_v19 }
 0x20c   : > { %v758_v26 = vpop.permute.xlu1 %757  ;;  %5508 = vmatprep.subr.bf16.mxu0 %v5507_v29 }
 0x20d   : > { %v790_v27 = vmax.f32 %v6793_v22, %v758_v26  ;;  %5250 = vmatmul.mubr.msk.f32.gmra.mrb[12].mxu1 %vm517_vm0, %v804_v24  ;;  %v1090_v22 = vld [vmem:[%s8954_s5 + $0x1d8] sm:$0xff]  ;;  %5510 = vmatpush1.bf16.msra.mxu0 %v5509_v31 }
 0x20e   : > { %5252 = vmatprep.mubr.msk.f32.mxu1 %vm517_vm0, %v805_v25  ;;  %5538 = vmatpush1.bf16.msra.mxu1 %v5537_v47  ;;  %v5539_v34 = vpack.c.bf16 %v1094_v51, %v1090_v22 }
 0x20f   : > { %v806_v7 = vmax.f32 %v790_v27, 0.0  ;;  %v1097_v27 = vlaneseq }
 0x210   : > { %5540 = vmatprep.subr.bf16.mxu1 %v5539_v34 }
 0x211   : > { %5253 = vmatmul.mubr.msk.f32.gmra.mrb[14].mxu1 %vm517_vm0, %v806_v7  ;;  %v7048_v7 = vshrl.u32 %v1097_v27, 7 }
 0x212   : > { %5542 = vmatpush1.bf16.msra.mxu1 %v5541_v35  ;;  %1342 = vmatprep.mubr.f32.mxu1 %v8969_v36 }
 0x213   : > { %v8968_v15 = vsub.s32 0, %v7048_v7 }
 0x215   : > { %v7056_v22 = vrot.slane %v7051_v28, %v8968_v15 }
 0x2c8   : > { %v5233_v38 = vpop.f32.mrb[0].mxu1 }
 0x2c9   : > { %v936_v39 = vpop.f32.mrb[1].mxu1  ;;  %v942_v52 = vadd.f32 %v5233_v38, %v7000_v37 }
 0x2ca   : > { %v937_v40 = vadd.f32 %v7000_v37, %v936_v39 }
 0x2cb   : > { %v1016_v44 = vmax.f32 %v942_v52, 0.0 }
 0x2cc   : > { %v1015_v41 = vmax.f32 %v937_v40, 0.0  ;;  %v5236_v55 = vpop.f32.mrb[2].mxu1 }
 0x2cd   : > { %v946_v42 = vpop.f32.mrb[3].mxu1  ;;  %v952_v53 = vadd.f32 %v5236_v55, %v7000_v37 }
 0x2ce   : > { %1182 = vmatmul.mubr.f32.vlgmr.msra.gmra.mrb[16].mxu0 %v1015_v41  ;;  %1343 = vmatmul.mubr.f32.vlgmr.msra.gmra.mrb[16].mxu1 %v1015_v41  ;;  %v947_v45 = vadd.f32 %v7000_v37, %v946_v42 }
 0x2cf   : > { %1187 = vmatprep.mubr.f32.mxu0 %v8969_v36  ;;  %1348 = vmatprep.mubr.f32.mxu1 %v8969_v36  ;;  %v1018_v56 = vmax.f32 %v952_v53, 0.0 }
 0x2d0   : > { %v5239_v49 = vpop.f32.mrb[4].mxu1  ;;  %v1017_v54 = vmax.f32 %v947_v45, 0.0 }
 0x2d1   : > { %v956_v50 = vpop.f32.mrb[5].mxu1  ;;  %v962_v1 = vadd.f32 %v5239_v49, %v7000_v37 }
 0x2d2   : > { %1188 = vmatmul.mubr.f32.gmra.mrb[18].mxu0 %v1016_v44  ;;  %1349 = vmatmul.mubr.f32.gmra.mrb[18].mxu1 %v1016_v44  ;;  %v957_v61 = vadd.f32 %v7000_v37, %v956_v50 }
 0x2d3   : > { %1193 = vmatprep.mubr.f32.mxu0 %v8969_v36  ;;  %1354 = vmatprep.mubr.f32.mxu1 %v8969_v36  ;;  %v1020_v6 = vmax.f32 %v962_v1, 0.0 }
 0x2d4   : > { %v5242_v57 = vpop.f32.mrb[6].mxu1  ;;  %v1019_v2 = vmax.f32 %v957_v61, 0.0 }
 0x2d5   : > { %v966_v58 = vpop.f32.mrb[7].mxu1  ;;  %v972_v60 = vadd.f32 %v5242_v57, %v7000_v37 }
 0x2d6   : > { %1194 = vmatmul.mubr.f32.gmra.mrb[20].mxu0 %v1017_v54  ;;  %1355 = vmatmul.mubr.f32.gmra.mrb[20].mxu1 %v1017_v54  ;;  %v967_v8 = vadd.f32 %v7000_v37, %v966_v58 }
 0x2d7   : > { %1199 = vmatprep.mubr.f32.mxu0 %v8969_v36  ;;  %1360 = vmatprep.mubr.f32.mxu1 %v8969_v36  ;;  %v1022_v43 = vmax.f32 %v972_v60, 0.0 }
 0x2d8   : > { %v5245_v59 = vpop.f32.mrb[8].mxu1  ;;  %v1021_v11 = vmax.f32 %v967_v8, 0.0 }
 0x2d9   : > { %v976_v62 = vpop.f32.mrb[9].mxu1  ;;  %v982_v14 = vadd.f32 %v5245_v59, %v7000_v37 }
 0x2da   : > { %1200 = vmatmul.mubr.f32.gmra.mrb[22].mxu0 %v1018_v56  ;;  %1361 = vmatmul.mubr.f32.gmra.mrb[22].mxu1 %v1018_v56  ;;  %v977_v13 = vadd.f32 %v7000_v37, %v976_v62 }
 0x2db   : > { %1205 = vmatprep.mubr.f32.mxu0 %v8969_v36  ;;  %1366 = vmatprep.mubr.f32.mxu1 %v8969_v36  ;;  %v1024_v17 = vmax.f32 %v982_v14, 0.0 }
 0x2dc   : > { %v5248_v4 = vpop.f32.mrb[10].mxu1  ;;  %v1023_v16 = vmax.f32 %v977_v13, 0.0 }
 0x2dd   : > { %v986_v5 = vpop.f32.mrb[11].mxu1  ;;  %v992_v19 = vadd.f32 %v5248_v4, %v7000_v37 }
 0x2de   : > { %1206 = vmatmul.mubr.f32.gmra.mrb[24].mxu0 %v1019_v2  ;;  %1367 = vmatmul.mubr.f32.gmra.mrb[24].mxu1 %v1019_v2  ;;  %v987_v18 = vadd.f32 %v7000_v37, %v986_v5 }
 0x2df   : > { %1211 = vmatprep.mubr.f32.mxu0 %v8969_v36  ;;  %1372 = vmatprep.mubr.f32.mxu1 %v8969_v36  ;;  %v1026_v0 = vmax.f32 %v992_v19, 0.0 }
 0x2e0   : > { %v5251_v9 = vpop.f32.mrb[12].mxu1  ;;  %v1025_v20 = vmax.f32 %v987_v18, 0.0 }
 0x2e1   : > { %v996_v10 = vpop.f32.mrb[13].mxu1  ;;  %v1002_v3 = vadd.f32 %v5251_v9, %v7000_v37 }
 0x2e2   : > { %1212 = vmatmul.mubr.f32.gmra.mrb[26].mxu0 %v1020_v6  ;;  %1373 = vmatmul.mubr.f32.gmra.mrb[26].mxu1 %v1020_v6  ;;  %v997_v21 = vadd.f32 %v7000_v37, %v996_v10 }
 0x2e3   : > { %1217 = vmatprep.mubr.f32.mxu0 %v8969_v36  ;;  %1378 = vmatprep.mubr.f32.mxu1 %v8969_v36  ;;  %v1028_v46 = vmax.f32 %v1002_v3, 0.0 }
 0x2e4   : > { %v5254_v63 = vpop.f32.mrb[14].mxu1  ;;  %v1027_v23 = vmax.f32 %v997_v21, 0.0 }
 0x2e5   : > { %v1006_v12 = vpop.f32.mrb[15].mxu1  ;;  %v1012_v24 = vadd.f32 %v5254_v63, %v7000_v37 }
 0x2e6   : > { %1218 = vmatmul.mubr.f32.gmra.mrb[28].mxu0 %v1021_v11  ;;  %1379 = vmatmul.mubr.f32.gmra.mrb[28].mxu1 %v1021_v11  ;;  %v1007_v47 = vadd.f32 %v7000_v37, %v1006_v12 }
 0x2e7   : > { %1223 = vmatprep.mubr.f32.mxu0 %v8969_v36  ;;  %1384 = vmatprep.mubr.f32.mxu1 %v8969_v36  ;;  %v1030_v26 = vmax.f32 %v1012_v24, 0.0 }
 0x2e8   : > { %v1029_v25 = vmax.f32 %v1007_v47, 0.0 }
 0x2ea   : > { %1224 = vmatmul.mubr.f32.gmra.mrb[30].mxu0 %v1022_v43  ;;  %1385 = vmatmul.mubr.f32.gmra.mrb[30].mxu1 %v1022_v43 }
 0x2eb   : > { %1229 = vmatprep.mubr.f32.mxu0 %v8969_v36  ;;  %1390 = vmatprep.mubr.f32.mxu1 %v8969_v36 }
 0x2ee   : > { %1230 = vmatmul.mubr.f32.gmra.mrb[32].mxu0 %v1023_v16  ;;  %1391 = vmatmul.mubr.f32.gmra.mrb[32].mxu1 %v1023_v16 }
 0x2ef   : > { %1235 = vmatprep.mubr.f32.mxu0 %v8969_v36  ;;  %1396 = vmatprep.mubr.f32.mxu1 %v8969_v36 }
 0x2f2   : > { %1236 = vmatmul.mubr.f32.gmra.mrb[34].mxu0 %v1024_v17  ;;  %1397 = vmatmul.mubr.f32.gmra.mrb[34].mxu1 %v1024_v17 }
 0x2f3   : > { %1241 = vmatprep.mubr.f32.mxu0 %v8969_v36  ;;  %1402 = vmatprep.mubr.f32.mxu1 %v8969_v36 }
 0x2f6   : > { %1242 = vmatmul.mubr.f32.gmra.mrb[36].mxu0 %v1025_v20  ;;  %1403 = vmatmul.mubr.f32.gmra.mrb[36].mxu1 %v1025_v20 }
 0x2f7   : > { %1247 = vmatprep.mubr.f32.mxu0 %v8969_v36  ;;  %1408 = vmatprep.mubr.f32.mxu1 %v8969_v36 }
 0x2fa   : > { %1248 = vmatmul.mubr.f32.gmra.mrb[38].mxu0 %v1026_v0  ;;  %1409 = vmatmul.mubr.f32.gmra.mrb[38].mxu1 %v1026_v0 }
 0x2fb   : > { %1253 = vmatprep.mubr.f32.mxu0 %v8969_v36  ;;  %1414 = vmatprep.mubr.f32.mxu1 %v8969_v36 }
 0x2fe   : > { %1254 = vmatmul.mubr.f32.gmra.mrb[40].mxu0 %v1027_v23  ;;  %1415 = vmatmul.mubr.f32.gmra.mrb[40].mxu1 %v1027_v23 }
 0x2ff   : > { %1259 = vmatprep.mubr.f32.mxu0 %v8969_v36  ;;  %1420 = vmatprep.mubr.f32.mxu1 %v8969_v36 }
 0x302   : > { %1260 = vmatmul.mubr.f32.gmra.mrb[42].mxu0 %v1028_v46  ;;  %1421 = vmatmul.mubr.f32.gmra.mrb[42].mxu1 %v1028_v46 }
 0x303   : > { %1265 = vmatprep.mubr.f32.mxu0 %v8969_v36  ;;  %1426 = vmatprep.mubr.f32.mxu1 %v8969_v36 }
 0x306   : > { %1266 = vmatmul.mubr.f32.gmra.mrb[44].mxu0 %v1029_v25  ;;  %1427 = vmatmul.mubr.f32.gmra.mrb[44].mxu1 %v1029_v25 }
 0x307   : > { %1271 = vmatprep.mubr.f32.mxu0 %v8969_v36  ;;  %1432 = vmatprep.mubr.f32.mxu1 %v8969_v36 }
 0x30a   : > { %1272 = vmatmul.mubr.f32.gmra.mrb[46].mxu0 %v1030_v26  ;;  %1433 = vmatmul.mubr.f32.gmra.mrb[46].mxu1 %v1030_v26 }
 0x3a1   : > { %v1183_v29 = vpop.f32.mrb[16].mxu0  ;;  %v7058_v30 = vpop.f32.mrb[16].mxu1 }
 0x3a2   : > { %v7061_v48 = vadd.f32 %v1183_v29, %v7056_v22  ;;  %v7063_v31 = vpop.f32.mrb[17].mxu0  ;;  %v7065_v51 = vpop.f32.mrb[17].mxu1 }
 0x3a3   : > { %8983 = vst [vmem:[#allocation13_spill] sm:$0xff] %v7065_v51 }
 0x3a4   : > { %5718 = vtanh.f32 %v7061_v48 }
 0x3a5   : > { %v1189_v32 = vpop.f32.mrb[18].mxu0  ;;  %v7068_v33 = vpop.f32.mrb[18].mxu1 }
 0x3a6   : > { %v7071_v34 = vadd.f32 %v1189_v32, %v7056_v22  ;;  %v7073_v35 = vpop.f32.mrb[19].mxu0  ;;  %v7075_v37 = vpop.f32.mrb[19].mxu1 }
 0x3a7   : > { %8984 = vst [vmem:[#allocation14_spill] sm:$0xff] %v7075_v37 }
 0x3a8   : > { %5720 = vtanh.f32 %v7071_v34 }
 0x3a9   : > { %v1195_v38 = vpop.f32.mrb[20].mxu0  ;;  %v7078_v39 = vpop.f32.mrb[20].mxu1 }
 0x3aa   : > { %8985 = vst [vmem:[#allocation15_spill] sm:$0xff] %v7078_v39  ;;  %v7081_v40 = vadd.f32 %v1195_v38, %v7056_v22  ;;  %v7083_v52 = vpop.f32.mrb[21].mxu0  ;;  %v7085_v41 = vpop.f32.mrb[21].mxu1 }
 0x3ab   : > { %8986 = vst [vmem:[#allocation16_spill] sm:$0xff] %v7085_v41 }
 0x3ac   : > { %5722 = vtanh.f32 %v7081_v40 }
 0x3ad   : > { %v1201_v55 = vpop.f32.mrb[22].mxu0  ;;  %v7088_v42 = vpop.f32.mrb[22].mxu1 }
 0x3ae   : > { %v5719_v44 = vpop.eup %5718  ;;  %v7091_v45 = vadd.f32 %v1201_v55, %v7056_v22  ;;  %v7093_v49 = vpop.f32.mrb[23].mxu0 }
 0x3af   : > { %v7095_v50 = vpop.f32.mrb[23].mxu1  ;;  %1539 = vrot.lane.b32.xlu0 %v5719_v44, %s6432_s15 }
 0x3b0   : > { %8987 = vst [vmem:[#allocation17_spill] sm:$0xff] %v7095_v50  ;;  %5724 = vtanh.f32 %v7091_v45 }
 0x3b1   : > { %v1207_v53 = vpop.f32.mrb[24].mxu0  ;;  %v7099_v54 = vpop.f32.mrb[24].mxu1 }
 0x3b2   : > { %8988 = vst [vmem:[#allocation18_spill] sm:$0xff] %v7099_v54  ;;  %v5721_v57 = vpop.eup %5720  ;;  %v7102_v58 = vadd.f32 %v1207_v53, %v7056_v22  ;;  %v7104_v56 = vpop.f32.mrb[25].mxu0 }
 0x3b3   : > { %v7106_v61 = vpop.f32.mrb[25].mxu1  ;;  %1541 = vrot.lane.b32.xlu1 %v5721_v57, %s6432_s15 }
 0x3b4   : > { %8989 = vst [vmem:[#allocation19_spill] sm:$0xff] %v7106_v61  ;;  %5726 = vtanh.f32 %v7102_v58 }
 0x3b5   : > { %v1213_v59 = vpop.f32.mrb[26].mxu0  ;;  %v7110_v62 = vpop.f32.mrb[26].mxu1 }
 0x3b6   : > { %8990 = vst [vmem:[#allocation20_spill] sm:$0xff] %v7110_v62  ;;  %v5723_v1 = vpop.eup %5722  ;;  %v7113_v2 = vadd.f32 %v1213_v59, %v7056_v22  ;;  %v7115_v4 = vpop.f32.mrb[27].mxu0 }
 0x3b7   : > { %v7117_v5 = vpop.f32.mrb[27].mxu1  ;;  %1543 = vrot.lane.b32.xlu0 %v5723_v1, %s6432_s15 }
 0x3b8   : > { %8991 = vst [vmem:[#allocation21_spill] sm:$0xff] %v7117_v5  ;;  %5728 = vtanh.f32 %v7113_v2 }
 0x3b9   : > { %v1219_v6 = vpop.f32.mrb[28].mxu0  ;;  %v7121_v8 = vpop.f32.mrb[28].mxu1 }
 0x3ba   : > { %8992 = vst [vmem:[#allocation22_spill] sm:$0xff] %v7121_v8  ;;  %v5725_v9 = vpop.eup %5724  ;;  %v7124_v10 = vadd.f32 %v1219_v6, %v7056_v22  ;;  %v7126_v60 = vpop.f32.mrb[29].mxu0 }
 0x3bb   : > { %v7128_v11 = vpop.f32.mrb[29].mxu1  ;;  %1545 = vrot.lane.b32.xlu1 %v5725_v9, %s6432_s15 }
 0x3bc   : > { %8993 = vst [vmem:[#allocation23_spill] sm:$0xff] %v7128_v11  ;;  %5730 = vtanh.f32 %v7124_v10 }
 0x3bd   : > { %v1225_v63 = vpop.f32.mrb[30].mxu0  ;;  %v7132_v12 = vpop.f32.mrb[30].mxu1 }
 0x3be   : > { %8994 = vst [vmem:[#allocation24_spill] sm:$0xff] %v7132_v12  ;;  %v5727_v43 = vpop.eup %5726  ;;  %v7135_v13 = vadd.f32 %v1225_v63, %v7056_v22  ;;  %v7137_v14 = vpop.f32.mrb[31].mxu0 }
 0x3bf   : > { %v7139_v16 = vpop.f32.mrb[31].mxu1  ;;  %1547 = vrot.lane.b32.xlu0 %v5727_v43, %s6432_s15 }
 0x3c0   : > { %8995 = vst [vmem:[#allocation25_spill] sm:$0xff] %v7139_v16  ;;  %5732 = vtanh.f32 %v7135_v13 }
 0x3c1   : > { %v1231_v17 = vpop.f32.mrb[32].mxu0  ;;  %v7143_v18 = vpop.f32.mrb[32].mxu1 }
 0x3c2   : > { %8996 = vst [vmem:[#allocation26_spill] sm:$0xff] %v7143_v18  ;;  %v5729_v19 = vpop.eup %5728  ;;  %v7146_v20 = vadd.f32 %v1231_v17, %v7056_v22  ;;  %v7148_v0 = vpop.f32.mrb[33].mxu0 }
 0x3c3   : > { %v7150_v21 = vpop.f32.mrb[33].mxu1  ;;  %1549 = vrot.lane.b32.xlu1 %v5729_v19, %s6432_s15 }
 0x3c4   : > { %8997 = vst [vmem:[#allocation27_spill] sm:$0xff] %v7150_v21  ;;  %5734 = vtanh.f32 %v7146_v20 }
 0x3c5   : > { %v1237_v3 = vpop.f32.mrb[34].mxu0  ;;  %v7154_v23 = vpop.f32.mrb[34].mxu1 }
 0x3c6   : > { %8998 = vst [vmem:[#allocation28_spill] sm:$0xff] %v7154_v23  ;;  %v5731_v46 = vpop.eup %5730  ;;  %v7157_v47 = vadd.f32 %v1237_v3, %v7056_v22  ;;  %v7159_v24 = vpop.f32.mrb[35].mxu0 }
 0x3c7   : > { %v7161_v25 = vpop.f32.mrb[35].mxu1  ;;  %1551 = vrot.lane.b32.xlu0 %v5731_v46, %s6432_s15 }
 0x3c8   : > { %8999 = vst [vmem:[#allocation29_spill] sm:$0xff] %v7161_v25  ;;  %5736 = vtanh.f32 %v7157_v47 }
 0x3c9   : > { %v1243_v26 = vpop.f32.mrb[36].mxu0  ;;  %v7165_v27 = vpop.f32.mrb[36].mxu1 }
 0x3ca   : > { %9000 = vst [vmem:[#allocation30_spill] sm:$0xff] %v7165_v27  ;;  %v5733_v29 = vpop.eup %5732  ;;  %v7168_v32 = vadd.f32 %v1243_v26, %v7056_v22  ;;  %v7170_v38 = vpop.f32.mrb[37].mxu0 }
 0x3cb   : > { %v7172_v55 = vpop.f32.mrb[37].mxu1  ;;  %1553 = vrot.lane.b32.xlu1 %v5733_v29, %s6432_s15 }
 0x3cc   : > { %9001 = vst [vmem:[#allocation31_spill] sm:$0xff] %v7172_v55  ;;  %5738 = vtanh.f32 %v7168_v32 }
 0x3cd   : > { %v1249_v44 = vpop.f32.mrb[38].mxu0  ;;  %v7176_v53 = vpop.f32.mrb[38].mxu1 }
 0x3ce   : > { %9002 = vst [vmem:[#allocation32_spill] sm:$0xff] %v7176_v53  ;;  %v5735_v57 = vpop.eup %5734  ;;  %v7179_v59 = vadd.f32 %v1249_v44, %v7056_v22  ;;  %v7181_v1 = vpop.f32.mrb[39].mxu0 }
 0x3cf   : > { %v7183_v6 = vpop.f32.mrb[39].mxu1  ;;  %1555 = vrot.lane.b32.xlu0 %v5735_v57, %s6432_s15 }
 0x3d0   : > { %9003 = vst [vmem:[#allocation33_spill] sm:$0xff] %v7183_v6  ;;  %5740 = vtanh.f32 %v7179_v59 }
 0x3d1   : > { %v1255_v9 = vpop.f32.mrb[40].mxu0  ;;  %v7187_v63 = vpop.f32.mrb[40].mxu1 }
 0x3d2   : > { %9004 = vst [vmem:[#allocation34_spill] sm:$0xff] %v7187_v63  ;;  %v5737_v43 = vpop.eup %5736  ;;  %v7190_v17 = vadd.f32 %v1255_v9, %v7056_v22  ;;  %v7192_v19 = vpop.f32.mrb[41].mxu0 }
 0x3d3   : > { %v7194_v3 = vpop.f32.mrb[41].mxu1  ;;  %1557 = vrot.lane.b32.xlu1 %v5737_v43, %s6432_s15 }
 0x3d4   : > { %9005 = vst [vmem:[#allocation35_spill] sm:$0xff] %v7194_v3  ;;  %5742 = vtanh.f32 %v7190_v17 }
 0x3d5   : > { %v1261_v46 = vpop.f32.mrb[42].mxu0  ;;  %v7198_v26 = vpop.f32.mrb[42].mxu1 }
 0x3d6   : > { %9006 = vst [vmem:[#allocation36_spill] sm:$0xff] %v7198_v26  ;;  %v5739_v29 = vpop.eup %5738  ;;  %v7201_v44 = vadd.f32 %v1261_v46, %v7056_v22  ;;  %v7203_v57 = vpop.f32.mrb[43].mxu0 }
 0x3d7   : > { %v7205_v15 = vpop.f32.mrb[43].mxu1  ;;  %1559 = vrot.lane.b32.xlu0 %v5739_v29, %s6432_s15 }
 0x3d8   : > { %9007 = vst [vmem:[#allocation37_spill] sm:$0xff] %v7205_v15  ;;  %5744 = vtanh.f32 %v7201_v44 }
 0x3d9   : > { %v1267_v9 = vpop.f32.mrb[44].mxu0  ;;  %v7209_v36 = vpop.f32.mrb[44].mxu1 }
 0x3da   : > { %9008 = vst [vmem:[#allocation38_spill] sm:$0xff] %v7209_v36  ;;  %v5741_v43 = vpop.eup %5740  ;;  %v7212_v3 = vadd.f32 %v1267_v9, %v7056_v22  ;;  %v7214_v55 = vpop.f32.mrb[45].mxu0 }
 0x3db   : > { %v7216_v6 = vpop.f32.mrb[45].mxu1  ;;  %1561 = vrot.lane.b32.xlu1 %v5741_v43, %s6432_s15 }
 0x3dc   : > { %9009 = vst [vmem:[#allocation39_spill] sm:$0xff] %v7216_v6  ;;  %5746 = vtanh.f32 %v7212_v3 }
 0x3dd   : > { %v1273_v46 = vpop.f32.mrb[46].mxu0  ;;  %v7220_v15 = vpop.f32.mrb[46].mxu1 }
 0x3de   : > { %9010 = vst [vmem:[#allocation40_spill] sm:$0xff] %v7220_v15  ;;  %v5743_v29 = vpop.eup %5742  ;;  %v7223_v21 = vadd.f32 %v1273_v46, %v7056_v22  ;;  %v7225_v25 = vpop.f32.mrb[47].mxu0  ;;  %v1443_v22 = vmul.f32 0.5, %v7061_v48  ;;  %v1444_v46 = vmul.f32 0.5, %v7071_v34 }
 0x3df   : > { %v7227_v11 = vpop.f32.mrb[47].mxu1  ;;  %1563 = vrot.lane.b32.xlu0 %v5743_v29, %s6432_s15  ;;  %v1446_v29 = vmul.f32 0.5, %v7091_v45 }
 0x3e0   : > { %9011 = vst [vmem:[#allocation41_spill] sm:$0xff] %v7227_v11  ;;  %5748 = vtanh.f32 %v7223_v21  ;;  %v1445_v11 = vmul.f32 0.5, %v7081_v40  ;;  %v1449_v40 = vmul.f32 0.5, %v7124_v10 }
 0x3e1   : > { %5750 = vtanh.f32 %v1443_v22 }
 0x3e2   : > { %v5745_v9 = vpop.eup %5744  ;;  %5752 = vtanh.f32 %v1444_v46 }
 0x3e3   : > { %1565 = vrot.lane.b32.xlu1 %v5745_v9, %s6432_s15  ;;  %5754 = vtanh.f32 %v1445_v11  ;;  %v1447_v9 = vmul.f32 0.5, %v7102_v58 }
 0x3e4   : > { %5756 = vtanh.f32 %v1446_v29 }
 0x3e5   : > { %5758 = vtanh.f32 %v1447_v9 }
 0x3e6   : > { %v5747_v43 = vpop.eup %5746 }
 0x3e7   : > { %1567 = vrot.lane.b32.xlu0 %v5747_v43, %s6432_s15 }
 0x3ea   : > { %v5749_v6 = vpop.eup %5748 }
 0x3eb   : > { %1569 = vrot.lane.b32.xlu1 %v5749_v6, %s6432_s15  ;;  %v5751_v16 = vpop.eup %5750  ;;  %v1448_v6 = vmul.f32 0.5, %v7113_v2 }
 0x3ec   : > { %v1475_v61 = vmul.f32 0.5, %v5751_v16  ;;  %v5753_v43 = vpop.eup %5752 }
 0x3ed   : > { %v1476_v48 = vmul.f32 0.5, %v5753_v43  ;;  %v5755_v22 = vpop.eup %5754  ;;  %5760 = vtanh.f32 %v1448_v6 }
 0x3ee   : > { %v7240_v5 = vadd.f32 0.5, %v1475_v61  ;;  %v1477_v58 = vmul.f32 0.5, %v5755_v22  ;;  %v5757_v11 = vpop.eup %5756  ;;  %v1450_v61 = vmul.f32 0.5, %v7135_v13 }
 0x3ef   : > { %v7247_v45 = vadd.f32 0.5, %v1476_v48  ;;  %v1478_v9 = vmul.f32 0.5, %v5757_v11  ;;  %v5759_v43 = vpop.eup %5758  ;;  %v1451_v48 = vmul.f32 0.5, %v7146_v20  ;;  %v1452_v11 = vmul.f32 0.5, %v7157_v47 }
 0x3f0   : > { %v7254_v29 = vadd.f32 0.5, %v1477_v58 }
 0x3f1   : > { %v7261_v22 = vadd.f32 0.5, %v1478_v9 }
 0x421   : > { %v1540_v34 = vpop.permute.xlu0 %1539 }
 0x422   : > { %v7243_v46 = vmul.f32 %v1540_v34, %v7240_v5  ;;  %v1479_v34 = vmul.f32 0.5, %v5759_v43 }
 0x424   : > { %5762 = vtanh.f32 %v7243_v46  ;;  %v7269_v20 = vadd.f32 0.5, %v1479_v34 }
 0x425   : > { %v1542_v16 = vpop.permute.xlu1 %1541  ;;  %5764 = vtanh.f32 %v1449_v40  ;;  %v5761_v40 = vpop.eup %5760 }
 0x426   : > { %v7250_v2 = vmul.f32 %v1542_v16, %v7247_v45 }
 0x428   : > { %5766 = vtanh.f32 %v7250_v2 }
 0x429   : > { %v1544_v10 = vpop.permute.xlu0 %1543  ;;  %5768 = vtanh.f32 %v1450_v61  ;;  %v1480_v61 = vmul.f32 0.5, %v5761_v40 }
 0x42a   : > { %v7257_v6 = vmul.f32 %v1544_v10, %v7254_v29 }
 0x42b   : > { %v7277_v47 = vadd.f32 0.5, %v1480_v61 }
 0x42c   : > { %5770 = vtanh.f32 %v7257_v6 }
 0x42d   : > { %v1546_v13 = vpop.permute.xlu1 %1545  ;;  %5772 = vtanh.f32 %v1451_v48 }
 0x42e   : > { %v5763_v16 = vpop.eup %5762  ;;  %v7264_v58 = vmul.f32 %v1546_v13, %v7261_v22  ;;  %v1453_v13 = vmul.f32 0.5, %v7168_v32 }
 0x42f   : > { %1635 = vrot.lane.b32.xlu0 %v5763_v16, %s6434_s12  ;;  %v5765_v9 = vpop.eup %5764 }
 0x430   : > { %5774 = vtanh.f32 %v7264_v58  ;;  %v1481_v48 = vmul.f32 0.5, %v5765_v9 }
 0x431   : > { %v1548_v10 = vpop.permute.xlu0 %1547  ;;  %5776 = vtanh.f32 %v1452_v11 }
 0x432   : > { %v5767_v43 = vpop.eup %5766  ;;  %v7272_v41 = vmul.f32 %v1548_v10, %v7269_v20  ;;  %v1454_v10 = vmul.f32 0.5, %v7179_v59  ;;  %v7285_v32 = vadd.f32 0.5, %v1481_v48 }
 0x433   : > { %1637 = vrot.lane.b32.xlu1 %v5767_v43, %s6434_s12  ;;  %v5769_v16 = vpop.eup %5768 }
 0x434   : > { %5778 = vtanh.f32 %v7272_v41  ;;  %v1482_v11 = vmul.f32 0.5, %v5769_v16 }
 0x435   : > { %v1550_v34 = vpop.permute.xlu1 %1549  ;;  %5780 = vtanh.f32 %v1453_v13 }
 0x436   : > { %v5771_v50 = vpop.eup %5770  ;;  %v7280_v40 = vmul.f32 %v1550_v34, %v7277_v47  ;;  %v1455_v34 = vmul.f32 0.5, %v7190_v17  ;;  %v7293_v59 = vadd.f32 0.5, %v1482_v11 }
 0x437   : > { %1639 = vrot.lane.b32.xlu0 %v5771_v50, %s6434_s12  ;;  %v5773_v43 = vpop.eup %5772 }
 0x438   : > { %5782 = vtanh.f32 %v7280_v40  ;;  %v1483_v50 = vmul.f32 0.5, %v5773_v43 }
 0x439   : > { %v1552_v61 = vpop.permute.xlu0 %1551  ;;  %5784 = vtanh.f32 %v1454_v10 }
 0x43a   : > { %v5775_v51 = vpop.eup %5774  ;;  %v7288_v9 = vmul.f32 %v1552_v61, %v7285_v32  ;;  %v1456_v61 = vmul.f32 0.5, %v7201_v44  ;;  %v7301_v17 = vadd.f32 0.5, %v1483_v50 }
 0x43b   : > { %1641 = vrot.lane.b32.xlu1 %v5775_v51, %s6434_s12  ;;  %v5777_v13 = vpop.eup %5776 }
 0x43c   : > { %5786 = vtanh.f32 %v7288_v9  ;;  %v1484_v51 = vmul.f32 0.5, %v5777_v13 }
 0x43d   : > { %v1554_v48 = vpop.permute.xlu1 %1553  ;;  %5788 = vtanh.f32 %v1455_v34 }
 0x43e   : > { %v5779_v37 = vpop.eup %5778  ;;  %v7296_v16 = vmul.f32 %v1554_v48, %v7293_v59  ;;  %v1457_v48 = vmul.f32 0.5, %v7212_v3  ;;  %v7309_v44 = vadd.f32 0.5, %v1484_v51 }
 0x43f   : > { %1643 = vrot.lane.b32.xlu0 %v5779_v37, %s6434_s12  ;;  %v5781_v10 = vpop.eup %5780 }
 0x440   : > { %5790 = vtanh.f32 %v7296_v16  ;;  %v1485_v37 = vmul.f32 0.5, %v5781_v10 }
 0x441   : > { %v1556_v11 = vpop.permute.xlu0 %1555  ;;  %5792 = vtanh.f32 %v1456_v61 }
 0x442   : > { %v5783_v36 = vpop.eup %5782  ;;  %v7304_v43 = vmul.f32 %v1556_v11, %v7301_v17  ;;  %v1458_v11 = vmul.f32 0.5, %v7223_v21  ;;  %v7317_v3 = vadd.f32 0.5, %v1485_v37 }
 0x443   : > { %1645 = vrot.lane.b32.xlu1 %v5783_v36, %s6434_s12  ;;  %v5785_v34 = vpop.eup %5784 }
 0x444   : > { %5794 = vtanh.f32 %v7304_v43  ;;  %v1486_v36 = vmul.f32 0.5, %v5785_v34 }
 0x445   : > { %v1558_v50 = vpop.permute.xlu1 %1557  ;;  %5796 = vtanh.f32 %v1457_v48 }
 0x446   : > { %v5787_v15 = vpop.eup %5786  ;;  %v7312_v13 = vmul.f32 %v1558_v50, %v7309_v44  ;;  %v7324_v48 = vadd.f32 0.5, %v1486_v36 }
 0x447   : > { %1647 = vrot.lane.b32.xlu0 %v5787_v15, %s6434_s12  ;;  %v5789_v61 = vpop.eup %5788 }
 0x448   : > { %5798 = vtanh.f32 %v7312_v13  ;;  %v1487_v21 = vmul.f32 0.5, %v5789_v61 }
 0x449   : > { %v1560_v51 = vpop.permute.xlu0 %1559  ;;  %5800 = vtanh.f32 %v1458_v11 }
 0x44a   : > { %v5791_v63 = vpop.eup %5790  ;;  %v7320_v10 = vmul.f32 %v1560_v51, %v7317_v3  ;;  %v7331_v34 = vadd.f32 0.5, %v1487_v21 }
 0x44b   : > { %1649 = vrot.lane.b32.xlu1 %v5791_v63, %s6434_s12  ;;  %v5793_v15 = vpop.eup %5792 }
 0x44c   : > { %5802 = vtanh.f32 %v7320_v10  ;;  %v1488_v11 = vmul.f32 0.5, %v5793_v15 }
 0x44d   : > { %v1562_v50 = vpop.permute.xlu1 %1561 }
 0x44e   : > { %v5795_v26 = vpop.eup %5794  ;;  %v7327_v37 = vmul.f32 %v1562_v50, %v7324_v48  ;;  %v7338_v61 = vadd.f32 0.5, %v1488_v11  ;;  %v1439_v11 = vld [vmem:[%s8956_s7] sm:$0xff] }
 0x44f   : > { %1651 = vrot.lane.b32.xlu0 %v5795_v26, %s6434_s12  ;;  %v5797_v51 = vpop.eup %5796 }
 0x450   : > { %5804 = vtanh.f32 %v7327_v37  ;;  %v1489_v50 = vmul.f32 0.5, %v5797_v51  ;;  %v1440_v51 = vld [vmem:[%s8956_s7 + $0x8] sm:$0xff] }
 0x451   : > { %v1564_v63 = vpop.permute.xlu0 %1563 }
 0x452   : > { %v5799_v27 = vpop.eup %5798  ;;  %v7334_v36 = vmul.f32 %v1564_v63, %v7331_v34  ;;  %v7345_v15 = vadd.f32 0.5, %v1489_v50 }
 0x453   : > { %1653 = vrot.lane.b32.xlu1 %v5799_v27, %s6434_s12  ;;  %v5801_v53 = vpop.eup %5800 }
 0x454   : > { %5806 = vtanh.f32 %v7334_v36  ;;  %v1490_v63 = vmul.f32 0.5, %v5801_v53 }
 0x455   : > { %v1566_v26 = vpop.permute.xlu1 %1565 }
 0x456   : > { %v5803_v18 = vpop.eup %5802  ;;  %v7341_v21 = vmul.f32 %v1566_v26, %v7338_v61  ;;  %v7360_v53 = vadd.f32 0.5, %v1490_v63  ;;  %v1441_v63 = vld [vmem:[%s8956_s7 + $0x10] sm:$0xff] }
 0x457   : > { %1655 = vrot.lane.b32.xlu0 %v5803_v18, %s6434_s12  ;;  %v7357_v18 = vpack.c.bf16 %v1440_v51, %v1439_v11 }
 0x458   : > { %5808 = vtanh.f32 %v7341_v21 }
 0x459   : > { %v1568_v23 = vpop.permute.xlu0 %1567  ;;  %5544 = vmatprep.subr.bf16.mxu0 %v7357_v18  ;;  %5647 = vmatprep.subr.bf16.mxu1 %v7357_v18 }
 0x45a   : > { %v5805_v27 = vpop.eup %5804  ;;  %v7348_v8 = vmul.f32 %v1568_v23, %v7345_v15  ;;  %5546 = vmatpush3.bf16.msra.mxu0 %v7357_v18  ;;  %5649 = vmatpush3.bf16.msra.mxu1 %v7357_v18 }
 0x45b   : > { %1657 = vrot.lane.b32.xlu1 %v5805_v27, %s6434_s12  ;;  %v1442_v27 = vld [vmem:[%s8956_s7 + $0x18] sm:$0xff] }
 0x45c   : > { %5810 = vtanh.f32 %v7348_v8  ;;  %v7377_v11 = vpack.c.bf16 %v1442_v27, %v1441_v63 }
 0x45d   : > { %v1570_v50 = vpop.permute.xlu1 %1569 }
 0x45e   : > { %v5807_v23 = vpop.eup %5806  ;;  %v7365_v26 = vmul.f32 %v1570_v50, %v7360_v53  ;;  %5548 = vmatprep.subr.bf16.mxu0 %v7377_v11  ;;  %5648 = vmatprep.subr.bf16.mxu1 %v7377_v11 }
 0x45f   : > { %1659 = vrot.lane.b32.xlu0 %v5807_v23, %s6434_s12  ;;  %5550 = vmatpush3.bf16.msra.mxu0 %v7377_v11 }
 0x460   : > { %5812 = vtanh.f32 %v7365_v26  ;;  %5650 = vmatpush3.bf16.msra.mxu1 %v7377_v11  ;;  %5560 = vmatprep.subr.bf16.mxu0 %v7357_v18 }
 0x461   : > { %5552 = vmatprep.subr.bf16.mxu1 %v7357_v18 }
 0x462   : > { %v5809_v51 = vpop.eup %5808 }
 0x463   : > { %1661 = vrot.lane.b32.xlu1 %v5809_v51, %s6434_s12 }
 0x466   : > { %v5811_v50 = vpop.eup %5810 }
 0x467   : > { %1663 = vrot.lane.b32.xlu0 %v5811_v50, %s6434_s12 }
 0x46a   : > { %v5813_v23 = vpop.eup %5812 }
 0x46b   : > { %1665 = vrot.lane.b32.xlu1 %v5813_v23, %s6434_s12 }
 0x4a1   : > { %v1636_v63 = vpop.permute.xlu0 %1635 }
 0x4a2   : > { %v1683_v27 = vmul.f32 %v1636_v63, %v7240_v5 }
 0x4a4   : > { %1715 = vrot.lane.b32.xlu0 %v1683_v27, %s6435_s26 }
 0x4a5   : > { %v1638_v51 = vpop.permute.xlu1 %1637 }
 0x4a6   : > { %v1684_v12 = vmul.f32 %v1638_v51, %v7247_v45 }
 0x4a8   : > { %1717 = vrot.lane.b32.xlu1 %v1684_v12, %s6435_s26 }
 0x4a9   : > { %v1640_v54 = vpop.permute.xlu0 %1639 }
 0x4aa   : > { %v1685_v62 = vmul.f32 %v1640_v54, %v7254_v29 }
 0x4ac   : > { %1719 = vrot.lane.b32.xlu0 %v1685_v62, %s6435_s26 }
 0x4ad   : > { %v1642_v50 = vpop.permute.xlu1 %1641 }
 0x4ae   : > { %v1686_v39 = vmul.f32 %v1642_v50, %v7261_v22 }
 0x4b0   : > { %1721 = vrot.lane.b32.xlu1 %v1686_v39, %s6435_s26 }
 0x4b1   : > { %v1644_v23 = vpop.permute.xlu0 %1643 }
 0x4b2   : > { %v1687_v5 = vmul.f32 %v1644_v23, %v7269_v20 }
 0x4b4   : > { %1723 = vrot.lane.b32.xlu0 %v1687_v5, %s6435_s26 }
 0x4b5   : > { %v1646_v63 = vpop.permute.xlu1 %1645 }
 0x4b6   : > { %v1688_v45 = vmul.f32 %v1646_v63, %v7277_v47 }
 0x4b8   : > { %1725 = vrot.lane.b32.xlu1 %v1688_v45, %s6435_s26 }
 0x4b9   : > { %v1648_v12 = vpop.permute.xlu0 %1647 }
 0x4ba   : > { %v1689_v54 = vmul.f32 %v1648_v12, %v7285_v32 }
 0x4bc   : > { %1727 = vrot.lane.b32.xlu0 %v1689_v54, %s6435_s26 }
 0x4bd   : > { %v1650_v62 = vpop.permute.xlu1 %1649 }
 0x4be   : > { %v1690_v29 = vmul.f32 %v1650_v62, %v7293_v59 }
 0x4c0   : > { %1729 = vrot.lane.b32.xlu1 %v1690_v29, %s6435_s26 }
 0x4c1   : > { %v1652_v39 = vpop.permute.xlu0 %1651 }
 0x4c2   : > { %v1691_v22 = vmul.f32 %v1652_v39, %v7301_v17 }
 0x4c4   : > { %1731 = vrot.lane.b32.xlu0 %v1691_v22, %s6435_s26 }
 0x4c5   : > { %v1654_v20 = vpop.permute.xlu1 %1653 }
 0x4c6   : > { %v1692_v47 = vmul.f32 %v1654_v20, %v7309_v44 }
 0x4c8   : > { %1733 = vrot.lane.b32.xlu1 %v1692_v47, %s6435_s26 }
 0x4c9   : > { %v1656_v27 = vpop.permute.xlu0 %1655 }
 0x4ca   : > { %v1693_v32 = vmul.f32 %v1656_v27, %v7317_v3 }
 0x4cc   : > { %1735 = vrot.lane.b32.xlu0 %v1693_v32, %s6435_s26 }
 0x4cd   : > { %v1658_v51 = vpop.permute.xlu1 %1657 }
 0x4ce   : > { %v1694_v59 = vmul.f32 %v1658_v51, %v7324_v48  ;;  %v1103_v51 = vsub.s32 1, %v7048_v7 }
 0x4d0   : > { %1737 = vrot.lane.b32.xlu1 %v1694_v59, %s6435_s26 }
 0x4d1   : > { %v1660_v50 = vpop.permute.xlu0 %1659 }
 0x4d2   : > { %v1695_v17 = vmul.f32 %v1660_v50, %v7331_v34 }
 0x4d4   : > { %1739 = vrot.lane.b32.xlu0 %v1695_v17, %s6435_s26 }
 0x4d5   : > { %v1662_v23 = vpop.permute.xlu1 %1661 }
 0x4d6   : > { %v1696_v44 = vmul.f32 %v1662_v23, %v7338_v61 }
 0x4d8   : > { %1741 = vrot.lane.b32.xlu1 %v1696_v44, %s6435_s26 }
 0x4d9   : > { %v1664_v5 = vpop.permute.xlu0 %1663 }
 0x4da   : > { %v1697_v3 = vmul.f32 %v1664_v5, %v7345_v15 }
 0x4dc   : > { %1743 = vrot.lane.b32.xlu0 %v1697_v3, %s6435_s26 }
 0x4dd   : > { %v1666_v63 = vpop.permute.xlu1 %1665 }
 0x4de   : > { %v1698_v48 = vmul.f32 %v1666_v63, %v7360_v53 }
 0x4e0   : > { %1745 = vrot.lane.b32.xlu1 %v1698_v48, %s6435_s26 }
 0x516   : > { %v1716_v45 = vpop.permute.xlu0 %1715 }
 0x517   : > { %5263 = vmatprep.mubr.msk.f32.mxu0 %vm1747_vm1, %v1716_v45 }
 0x51a   : > { %v1718_v34 = vpop.permute.xlu1 %1717 }
 0x51b   : > { %5264 = vmatmul.mubr.msk.f32.vlgmr.msra.gmra.mrb[48].mxu0 %vm1747_vm1, %v1718_v34 }
 0x51c   : > { %5562 = vmatpush3.bf16.msra.mxu0 %v7357_v18 }
 0x51d   : > { %5564 = vmatprep.subr.bf16.mxu0 %v7377_v11 }
 0x51e   : > { %v1720_v61 = vpop.permute.xlu0 %1719 }
 0x51f   : > { %5266 = vmatprep.mubr.msk.f32.mxu0 %vm1747_vm1, %v1720_v61 }
 0x520   : > { %5566 = vmatpush3.bf16.msra.mxu0 %v7377_v11 }
 0x522   : > { %v1722_v15 = vpop.permute.xlu1 %1721 }
 0x523   : > { %5267 = vmatmul.mubr.msk.f32.gmra.mrb[50].mxu0 %vm1747_vm1, %v1722_v15 }
 0x526   : > { %v1724_v53 = vpop.permute.xlu0 %1723 }
 0x527   : > { %5269 = vmatprep.mubr.msk.f32.mxu0 %vm1747_vm1, %v1724_v53 }
 0x52a   : > { %v1726_v12 = vpop.permute.xlu1 %1725 }
 0x52b   : > { %5270 = vmatmul.mubr.msk.f32.gmra.mrb[52].mxu0 %vm1747_vm1, %v1726_v12 }
 0x52e   : > { %v1728_v54 = vpop.permute.xlu0 %1727 }
 0x52f   : > { %5272 = vmatprep.mubr.msk.f32.mxu0 %vm1747_vm1, %v1728_v54 }
 0x532   : > { %v1730_v62 = vpop.permute.xlu1 %1729 }
 0x533   : > { %5273 = vmatmul.mubr.msk.f32.gmra.mrb[54].mxu0 %vm1747_vm1, %v1730_v62 }
 0x536   : > { %v1732_v29 = vpop.permute.xlu0 %1731 }
 0x537   : > { %5275 = vmatprep.mubr.msk.f32.mxu1 %vm1747_vm1, %v1732_v29 }
 0x53a   : > { %v1734_v39 = vpop.permute.xlu1 %1733 }
 0x53b   : > { %5276 = vmatmul.mubr.msk.f32.vlgmr.msra.gmra.mrb[48].mxu1 %vm1747_vm1, %v1734_v39 }
 0x53c   : > { %5554 = vmatpush3.bf16.msra.mxu1 %v7357_v18 }
 0x53d   : > { %5556 = vmatprep.subr.bf16.mxu1 %v7377_v11 }
 0x53e   : > { %v1736_v22 = vpop.permute.xlu0 %1735 }
 0x53f   : > { %5278 = vmatprep.mubr.msk.f32.mxu1 %vm1747_vm1, %v1736_v22 }
 0x540   : > { %5558 = vmatpush3.bf16.msra.mxu1 %v7377_v11  ;;  %v7446_v11 = vrot.slane %v7051_v28, %v1103_v51 }
 0x542   : > { %v1738_v20 = vpop.permute.xlu1 %1737  ;;  %v1192_v59 = vadd.f32 %v7073_v35, %v7446_v11  ;;  %v1186_v50 = vadd.f32 %v7063_v31, %v7446_v11  ;;  %v1204_v28 = vadd.f32 %v7093_v49, %v7446_v11  ;;  %v1198_v3 = vadd.f32 %v7083_v52, %v7446_v11 }
 0x543   : > { %5279 = vmatmul.mubr.msk.f32.gmra.mrb[50].mxu1 %vm1747_vm1, %v1738_v20  ;;  %v1216_v49 = vadd.f32 %v7115_v4, %v7446_v11  ;;  %v1210_v52 = vadd.f32 %v7104_v56, %v7446_v11  ;;  %v1228_v4 = vadd.f32 %v7137_v14, %v7446_v11  ;;  %v1222_v56 = vadd.f32 %v7126_v60, %v7446_v11 }
 0x544   : > { %v1240_v14 = vadd.f32 %v7159_v24, %v7446_v11  ;;  %v1234_v60 = vadd.f32 %v7148_v0, %v7446_v11  ;;  %v1252_v24 = vadd.f32 %v7181_v1, %v7446_v11  ;;  %v1246_v0 = vadd.f32 %v7170_v38, %v7446_v11 }
 0x545   : > { %v1264_v1 = vadd.f32 %v7203_v57, %v7446_v11  ;;  %v1258_v38 = vadd.f32 %v7192_v19, %v7446_v11  ;;  %v1276_v57 = vadd.f32 %v7225_v25, %v7446_v11  ;;  %v1270_v19 = vadd.f32 %v7214_v55, %v7446_v11 }
 0x546   : > { %v1740_v47 = vpop.permute.xlu0 %1739 }
 0x547   : > { %5281 = vmatprep.mubr.msk.f32.mxu1 %vm1747_vm1, %v1740_v47 }
 0x54a   : > { %v1742_v27 = vpop.permute.xlu1 %1741 }
 0x54b   : > { %5282 = vmatmul.mubr.msk.f32.gmra.mrb[52].mxu1 %vm1747_vm1, %v1742_v27 }
 0x54e   : > { %v1744_v32 = vpop.permute.xlu0 %1743 }
 0x54f   : > { %5284 = vmatprep.mubr.msk.f32.mxu1 %vm1747_vm1, %v1744_v32 }
 0x552   : > { %v1746_v18 = vpop.permute.xlu1 %1745 }
 0x553   : > { %5285 = vmatmul.mubr.msk.f32.gmra.mrb[54].mxu1 %vm1747_vm1, %v1746_v18 }
 0x5ee   : > { %v5265_v17 = vpop.f32.mrb[48].mxu0 }
 0x5ef   : > { %v7452_v23 = vadd.f32 %v5265_v17, %v1192_v59  ;;  %v1846_v44 = vpop.f32.mrb[49].mxu0 }
 0x5f0   : > { %v7454_v5 = vadd.f32 %v1846_v44, %v1186_v50 }
 0x5f1   : > { %5814 = vtanh.f32 %v7452_v23  ;;  %v1942_v11 = vmul.f32 0.5, %v7452_v23 }
 0x5f2   : > { %5816 = vtanh.f32 %v7454_v5 }
 0x5f6   : > { %v5268_v35 = vpop.f32.mrb[50].mxu0 }
 0x5f7   : > { %v7462_v63 = vadd.f32 %v5268_v35, %v1204_v28  ;;  %v1856_v31 = vpop.f32.mrb[51].mxu0 }
 0x5f8   : > { %v7464_v48 = vadd.f32 %v1856_v31, %v1198_v3 }
 0x5f9   : > { %5818 = vtanh.f32 %v7462_v63 }
 0x5fa   : > { %5820 = vtanh.f32 %v7464_v48 }
 0x5fb   : > { %v5815_v45 = vpop.eup %5814 }
 0x5fc   : > { %v5817_v34 = vpop.eup %5816  ;;  %2119 = vrot.lane.b32.xlu1 %v5815_v45, %s6432_s15 }
 0x5fd   : > { %2117 = vrot.lane.b32.xlu0 %v5817_v34, %s6432_s15 }
 0x5fe   : > { %v5271_v61 = vpop.f32.mrb[52].mxu0 }
 0x5ff   : > { %v7474_v15 = vadd.f32 %v5271_v61, %v1216_v49  ;;  %v1866_v53 = vpop.f32.mrb[53].mxu0 }
 0x600   : > { %v7476_v12 = vadd.f32 %v1866_v53, %v1210_v52 }
 0x601   : > { %5822 = vtanh.f32 %v7474_v15 }
 0x602   : > { %5824 = vtanh.f32 %v7476_v12 }
 0x603   : > { %v5819_v54 = vpop.eup %5818 }
 0x604   : > { %v5821_v62 = vpop.eup %5820  ;;  %2123 = vrot.lane.b32.xlu1 %v5819_v54, %s6432_s15 }
 0x605   : > { %2121 = vrot.lane.b32.xlu0 %v5821_v62, %s6432_s15 }
 0x606   : > { %v5274_v29 = vpop.f32.mrb[54].mxu0 }
 0x607   : > { %v7486_v39 = vadd.f32 %v5274_v29, %v1228_v4  ;;  %v1876_v22 = vpop.f32.mrb[55].mxu0 }
 0x608   : > { %v7488_v20 = vadd.f32 %v1876_v22, %v1222_v56 }
 0x609   : > { %5826 = vtanh.f32 %v7486_v39 }
 0x60a   : > { %5828 = vtanh.f32 %v7488_v20 }
 0x60b   : > { %v5823_v47 = vpop.eup %5822 }
 0x60c   : > { %v5825_v27 = vpop.eup %5824  ;;  %2127 = vrot.lane.b32.xlu1 %v5823_v47, %s6432_s15 }
 0x60d   : > { %2125 = vrot.lane.b32.xlu0 %v5825_v27, %s6432_s15 }
 0x60e   : > { %v5277_v32 = vpop.f32.mrb[48].mxu1 }
 0x60f   : > { %v7498_v18 = vadd.f32 %v5277_v32, %v1240_v14  ;;  %v1886_v59 = vpop.f32.mrb[49].mxu1  ;;  %v1941_v14 = vmul.f32 0.5, %v7454_v5  ;;  %v1943_v32 = vmul.f32 0.5, %v7464_v48 }
 0x610   : > { %v7500_v50 = vadd.f32 %v1886_v59, %v1234_v60  ;;  %v1944_v60 = vmul.f32 0.5, %v7462_v63  ;;  %v1946_v59 = vmul.f32 0.5, %v7474_v15 }
 0x611   : > { %5830 = vtanh.f32 %v7498_v18 }
 0x612   : > { %5832 = vtanh.f32 %v7500_v50 }
 0x613   : > { %v5827_v17 = vpop.eup %5826 }
 0x614   : > { %v5829_v44 = vpop.eup %5828  ;;  %2131 = vrot.lane.b32.xlu1 %v5827_v17, %s6432_s15 }
 0x615   : > { %2129 = vrot.lane.b32.xlu0 %v5829_v44, %s6432_s15  ;;  %v1945_v44 = vmul.f32 0.5, %v7476_v12  ;;  %v1947_v12 = vmul.f32 0.5, %v7488_v20 }
 0x616   : > { %v5280_v28 = vpop.f32.mrb[50].mxu1 }
 0x617   : > { %v7510_v3 = vadd.f32 %v5280_v28, %v1252_v24  ;;  %v1896_v35 = vpop.f32.mrb[51].mxu1 }
 0x618   : > { %v7512_v31 = vadd.f32 %v1896_v35, %v1246_v0 }
 0x619   : > { %5834 = vtanh.f32 %v7510_v3 }
 0x61a   : > { %5836 = vtanh.f32 %v7512_v31 }
 0x61b   : > { %v5831_v45 = vpop.eup %5830 }
 0x61c   : > { %v5833_v34 = vpop.eup %5832  ;;  %2135 = vrot.lane.b32.xlu1 %v5831_v45, %s6432_s15  ;;  %v1948_v45 = vmul.f32 0.5, %v7486_v39 }
 0x61d   : > { %2133 = vrot.lane.b32.xlu0 %v5833_v34, %s6432_s15 }
 0x61e   : > { %v5283_v49 = vpop.f32.mrb[52].mxu1 }
 0x61f   : > { %v7522_v52 = vadd.f32 %v5283_v49, %v1264_v1  ;;  %v1906_v61 = vpop.f32.mrb[53].mxu1 }
 0x620   : > { %v7524_v53 = vadd.f32 %v1906_v61, %v1258_v38 }
 0x621   : > { %5838 = vtanh.f32 %v7522_v52 }
 0x622   : > { %5840 = vtanh.f32 %v7524_v53 }
 0x623   : > { %v5835_v54 = vpop.eup %5834 }
 0x624   : > { %v5837_v62 = vpop.eup %5836  ;;  %2139 = vrot.lane.b32.xlu1 %v5835_v54, %s6432_s15 }
 0x625   : > { %2137 = vrot.lane.b32.xlu0 %v5837_v62, %s6432_s15 }
 0x626   : > { %v5286_v4 = vpop.f32.mrb[54].mxu1 }
 0x627   : > { %v7534_v56 = vadd.f32 %v5286_v4, %v1276_v57  ;;  %v1916_v29 = vpop.f32.mrb[55].mxu1  ;;  %v1950_v57 = vmul.f32 0.5, %v7498_v18 }
 0x628   : > { %v7536_v22 = vadd.f32 %v1916_v29, %v1270_v19 }
 0x629   : > { %5842 = vtanh.f32 %v7534_v56 }
 0x62a   : > { %5844 = vtanh.f32 %v7536_v22 }
 0x62b   : > { %v5839_v47 = vpop.eup %5838  ;;  %5846 = vtanh.f32 %v1942_v11  ;;  %v1952_v11 = vmul.f32 0.5, %v7510_v3 }
 0x62c   : > { %v5841_v27 = vpop.eup %5840  ;;  %2143 = vrot.lane.b32.xlu1 %v5839_v47, %s6432_s15  ;;  %5848 = vtanh.f32 %v1941_v14 }
 0x62d   : > { %2141 = vrot.lane.b32.xlu0 %v5841_v27, %s6432_s15  ;;  %5850 = vtanh.f32 %v1944_v60 }
 0x62e   : > { %5852 = vtanh.f32 %v1943_v32 }
 0x62f   : > { %5854 = vtanh.f32 %v1946_v59 }
 0x630   : > { %2039 = vrot.lane.b32.xlu1 %v7250_v2, %s6435_s26  ;;  %5856 = vtanh.f32 %v1945_v44  ;;  %v1954_v44 = vmul.f32 0.5, %v7522_v52 }
 0x631   : > { %2037 = vrot.lane.b32.xlu0 %v7243_v46, %s6435_s26  ;;  %5858 = vtanh.f32 %v1948_v45 }
 0x632   : > { %5860 = vtanh.f32 %v1947_v12 }
 0x633   : > { %v5843_v25 = vpop.eup %5842  ;;  %5862 = vtanh.f32 %v1950_v57 }
 0x634   : > { %v5845_v55 = vpop.eup %5844  ;;  %2147 = vrot.lane.b32.xlu1 %v5843_v25, %s6432_s15 }
 0x635   : > { %2145 = vrot.lane.b32.xlu0 %v5845_v55, %s6432_s15  ;;  %v5847_v2 = vpop.eup %5846 }
 0x636   : > { %v5849_v46 = vpop.eup %5848  ;;  %v1974_v17 = vmul.f32 0.5, %v5847_v2 }
 0x637   : > { %v1973_v24 = vmul.f32 0.5, %v5849_v46  ;;  %v5851_v5 = vpop.eup %5850 }
 0x638   : > { %v7554_v23 = vadd.f32 0.5, %v1974_v17  ;;  %v5853_v63 = vpop.eup %5852  ;;  %v1976_v34 = vmul.f32 0.5, %v5851_v5 }
 0x639   : > { %v7556_v28 = vadd.f32 0.5, %v1973_v24  ;;  %v1975_v1 = vmul.f32 0.5, %v5853_v63  ;;  %v5855_v49 = vpop.eup %5854 }
 0x63a   : > { %v7566_v38 = vadd.f32 0.5, %v1976_v34  ;;  %v5857_v20 = vpop.eup %5856  ;;  %v1978_v4 = vmul.f32 0.5, %v5855_v49 }
 0x63b   : > { %v7570_v39 = vadd.f32 0.5, %v1975_v1  ;;  %v1977_v29 = vmul.f32 0.5, %v5857_v20  ;;  %v5859_v47 = vpop.eup %5858 }
 0x63c   : > { %v1980_v60 = vmul.f32 0.5, %v5859_v47 }
 0x63d   : > { %v7584_v18 = vadd.f32 0.5, %v1977_v29 }
 0x66e   : > { %v2120_v0 = vpop.permute.xlu1 %2119 }
 0x66f   : > { %v2166_v48 = vmul.f32 %v2120_v0, %v7554_v23  ;;  %v2118_v35 = vpop.permute.xlu0 %2117 }
 0x670   : > { %v2165_v15 = vmul.f32 %v2118_v35, %v7556_v28 }
 0x671   : > { %2199 = vrot.lane.b32.xlu1 %v2166_v48, %s6435_s26 }
 0x672   : > { %2197 = vrot.lane.b32.xlu0 %v2165_v15, %s6435_s26  ;;  %v1956_v15 = vmul.f32 0.5, %v7534_v56 }
 0x675   : > { %2043 = vrot.lane.b32.xlu1 %v7264_v58, %s6435_s26  ;;  %v1949_v58 = vmul.f32 0.5, %v7500_v50  ;;  %v5861_v50 = vpop.eup %5860 }
 0x676   : > { %v2124_v61 = vpop.permute.xlu1 %2123  ;;  %2041 = vrot.lane.b32.xlu0 %v7257_v6, %s6435_s26  ;;  %v7580_v6 = vadd.f32 0.5, %v1978_v4  ;;  %v1979_v32 = vmul.f32 0.5, %v5861_v50  ;;  %v5863_v2 = vpop.eup %5862 }
 0x677   : > { %v2168_v54 = vmul.f32 %v2124_v61, %v7566_v38  ;;  %v2122_v62 = vpop.permute.xlu0 %2121  ;;  %5864 = vtanh.f32 %v1949_v58  ;;  %v1982_v5 = vmul.f32 0.5, %v5863_v2 }
 0x678   : > { %v2167_v19 = vmul.f32 %v2122_v62, %v7570_v39  ;;  %5866 = vtanh.f32 %v1952_v11  ;;  %v7598_v3 = vadd.f32 0.5, %v1979_v32 }
 0x679   : > { %2203 = vrot.lane.b32.xlu1 %v2168_v54, %s6435_s26 }
 0x67a   : > { %2201 = vrot.lane.b32.xlu0 %v2167_v19, %s6435_s26 }
 0x67d   : > { %2047 = vrot.lane.b32.xlu1 %v7280_v40, %s6435_s26  ;;  %v1951_v40 = vmul.f32 0.5, %v7512_v31 }
 0x67e   : > { %v2128_v27 = vpop.permute.xlu1 %2127  ;;  %2045 = vrot.lane.b32.xlu0 %v7272_v41, %s6435_s26  ;;  %v7594_v41 = vadd.f32 0.5, %v1980_v60 }
 0x67f   : > { %v2170_v25 = vmul.f32 %v2128_v27, %v7580_v6  ;;  %v2126_v55 = vpop.permute.xlu0 %2125  ;;  %5868 = vtanh.f32 %v1951_v40 }
 0x680   : > { %v2169_v14 = vmul.f32 %v2126_v55, %v7584_v18  ;;  %5870 = vtanh.f32 %v1954_v44 }
 0x681   : > { %2207 = vrot.lane.b32.xlu1 %v2170_v25, %s6435_s26  ;;  %v5865_v31 = vpop.eup %5864 }
 0x682   : > { %2205 = vrot.lane.b32.xlu0 %v2169_v14, %s6435_s26  ;;  %v1981_v0 = vmul.f32 0.5, %v5865_v31  ;;  %v5867_v63 = vpop.eup %5866 }
 0x683   : > { %v1984_v12 = vmul.f32 0.5, %v5867_v63 }
 0x684   : > { %v7612_v52 = vadd.f32 0.5, %v1981_v0 }
 0x685   : > { %2051 = vrot.lane.b32.xlu1 %v7296_v16, %s6435_s26  ;;  %v1953_v16 = vmul.f32 0.5, %v7524_v53 }
 0x686   : > { %v2132_v46 = vpop.permute.xlu1 %2131  ;;  %2049 = vrot.lane.b32.xlu0 %v7288_v9, %s6435_s26  ;;  %v7608_v9 = vadd.f32 0.5, %v1982_v5 }
 0x687   : > { %v2172_v59 = vmul.f32 %v2132_v46, %v7594_v41  ;;  %v2130_v17 = vpop.permute.xlu0 %2129  ;;  %5872 = vtanh.f32 %v1953_v16 }
 0x688   : > { %v2171_v24 = vmul.f32 %v2130_v17, %v7598_v3  ;;  %5874 = vtanh.f32 %v1956_v15 }
 0x689   : > { %2211 = vrot.lane.b32.xlu1 %v2172_v59, %s6435_s26  ;;  %v5869_v53 = vpop.eup %5868 }
 0x68a   : > { %2209 = vrot.lane.b32.xlu0 %v2171_v24, %s6435_s26  ;;  %v1983_v1 = vmul.f32 0.5, %v5869_v53  ;;  %v5871_v49 = vpop.eup %5870 }
 0x68b   : > { %v1986_v57 = vmul.f32 0.5, %v5871_v49 }
 0x68c   : > { %v7626_v56 = vadd.f32 0.5, %v1983_v1 }
 0x68d   : > { %2055 = vrot.lane.b32.xlu1 %v7312_v13, %s6435_s26  ;;  %v1955_v13 = vmul.f32 0.5, %v7536_v22 }
 0x68e   : > { %v2136_v48 = vpop.permute.xlu1 %2135  ;;  %2053 = vrot.lane.b32.xlu0 %v7304_v43, %s6435_s26  ;;  %v7622_v43 = vadd.f32 0.5, %v1984_v12 }
 0x68f   : > { %v2174_v35 = vmul.f32 %v2136_v48, %v7608_v9  ;;  %v2134_v45 = vpop.permute.xlu0 %2133  ;;  %5876 = vtanh.f32 %v1955_v13 }
 0x690   : > { %v2173_v34 = vmul.f32 %v2134_v45, %v7612_v52 }
 0x691   : > { %2215 = vrot.lane.b32.xlu1 %v2174_v35, %s6435_s26  ;;  %v5873_v22 = vpop.eup %5872 }
 0x692   : > { %2213 = vrot.lane.b32.xlu0 %v2173_v34, %s6435_s26  ;;  %v1985_v19 = vmul.f32 0.5, %v5873_v22 }
 0x694   : > { %v7638_v58 = vadd.f32 0.5, %v1985_v19 }
 0x695   : > { %2059 = vrot.lane.b32.xlu1 %v7327_v37, %s6435_s26  ;;  %v7634_v37 = vadd.f32 0.5, %v1986_v57 }
 0x696   : > { %v2140_v61 = vpop.permute.xlu1 %2139  ;;  %2057 = vrot.lane.b32.xlu0 %v7320_v10, %s6435_s26  ;;  %v5875_v10 = vpop.eup %5874 }
 0x697   : > { %v2176_v20 = vmul.f32 %v2140_v61, %v7622_v43  ;;  %v2138_v54 = vpop.permute.xlu0 %2137  ;;  %v1988_v25 = vmul.f32 0.5, %v5875_v10 }
 0x698   : > { %v2175_v62 = vmul.f32 %v2138_v54, %v7626_v56 }
 0x699   : > { %2219 = vrot.lane.b32.xlu1 %v2176_v20, %s6435_s26  ;;  %v5877_v29 = vpop.eup %5876 }
 0x69a   : > { %2217 = vrot.lane.b32.xlu0 %v2175_v62, %s6435_s26  ;;  %v1987_v55 = vmul.f32 0.5, %v5877_v29 }
 0x69c   : > { %v7650_v60 = vadd.f32 0.5, %v1987_v55 }
 0x69d   : > { %2063 = vrot.lane.b32.xlu1 %v7341_v21, %s6435_s26 }
 0x69e   : > { %v2144_v4 = vpop.permute.xlu1 %2143  ;;  %2061 = vrot.lane.b32.xlu0 %v7334_v36, %s6435_s26  ;;  %v7646_v36 = vadd.f32 0.5, %v1988_v25 }
 0x69f   : > { %v2178_v47 = vmul.f32 %v2144_v4, %v7634_v37  ;;  %v2142_v27 = vpop.permute.xlu0 %2141 }
 0x6a0   : > { %v2177_v50 = vmul.f32 %v2142_v27, %v7638_v58 }
 0x6a1   : > { %2223 = vrot.lane.b32.xlu1 %v2178_v47, %s6435_s26 }
 0x6a2   : > { %v2040_v21 = vpop.permute.xlu1 %2039  ;;  %2221 = vrot.lane.b32.xlu0 %v2177_v50, %s6435_s26 }
 0x6a3   : > { %v2038_v11 = vpop.permute.xlu0 %2037  ;;  %v2086_v46 = vmul.f32 %v2040_v21, %v7554_v23 }
 0x6a5   : > { %2067 = vrot.lane.b32.xlu1 %v7365_v26, %s6435_s26  ;;  %v2085_v26 = vmul.f32 %v2038_v11, %v7556_v28 }
 0x6a6   : > { %v2148_v14 = vpop.permute.xlu1 %2147  ;;  %2065 = vrot.lane.b32.xlu0 %v7348_v8, %s6435_s26 }
 0x6a7   : > { %v2180_v40 = vmul.f32 %v2148_v14, %v7646_v36  ;;  %v2146_v32 = vpop.permute.xlu0 %2145 }
 0x6a8   : > { %v2179_v2 = vmul.f32 %v2146_v32, %v7650_v60 }
 0x6a9   : > { %2227 = vrot.lane.b32.xlu1 %v2180_v40, %s6435_s26 }
 0x6aa   : > { %2225 = vrot.lane.b32.xlu0 %v2179_v2, %s6435_s26 }
 0x6e3   : > { %v2200_v31 = vpop.permute.xlu1 %2199 }
 0x6e4   : > { %v7658_v59 = vadd.f32 %v2200_v31, %v2086_v46  ;;  %v2198_v17 = vpop.permute.xlu0 %2197 }
 0x6e5   : > { %v7660_v8 = vadd.f32 %v2198_v17, %v2085_v26 }
 0x6e6   : > { %5878 = vtanh.f32 %v7658_v59 }
 0x6e7   : > { %5880 = vtanh.f32 %v7660_v8  ;;  %v2044_v44 = vpop.permute.xlu1 %2043 }
 0x6e8   : > { %v2042_v24 = vpop.permute.xlu0 %2041  ;;  %v2088_v5 = vmul.f32 %v2044_v44, %v7566_v38 }
 0x6e9   : > { %v2087_v16 = vmul.f32 %v2042_v24, %v7570_v39 }
 0x6eb   : > { %v2204_v0 = vpop.permute.xlu1 %2203 }
 0x6ec   : > { %v7666_v63 = vadd.f32 %v2204_v0, %v2088_v5  ;;  %v2202_v48 = vpop.permute.xlu0 %2201 }
 0x6ed   : > { %v7668_v53 = vadd.f32 %v2202_v48, %v2087_v16 }
 0x6ee   : > { %5882 = vtanh.f32 %v7666_v63 }
 0x6ef   : > { %5884 = vtanh.f32 %v7668_v53  ;;  %v2048_v35 = vpop.permute.xlu1 %2047 }
 0x6f0   : > { %v5879_v45 = vpop.eup %5878  ;;  %v2046_v15 = vpop.permute.xlu0 %2045  ;;  %v2090_v12 = vmul.f32 %v2048_v35, %v7580_v6 }
 0x6f1   : > { %v5881_v34 = vpop.eup %5880  ;;  %2295 = vrot.lane.b32.xlu1 %v5879_v45, %s6432_s15  ;;  %v2089_v13 = vmul.f32 %v2046_v15, %v7584_v18 }
 0x6f2   : > { %2293 = vrot.lane.b32.xlu0 %v5881_v34, %s6432_s15 }
 0x6f3   : > { %v2208_v1 = vpop.permute.xlu1 %2207 }
 0x6f4   : > { %v7676_v49 = vadd.f32 %v2208_v1, %v2090_v12  ;;  %v2206_v61 = vpop.permute.xlu0 %2205 }
 0x6f5   : > { %v7678_v22 = vadd.f32 %v2206_v61, %v2089_v13 }
 0x6f6   : > { %5886 = vtanh.f32 %v7676_v49 }
 0x6f7   : > { %5888 = vtanh.f32 %v7678_v22  ;;  %v2052_v20 = vpop.permute.xlu1 %2051 }
 0x6f8   : > { %v5883_v54 = vpop.eup %5882  ;;  %v2050_v62 = vpop.permute.xlu0 %2049  ;;  %v2092_v19 = vmul.f32 %v2052_v20, %v7594_v41 }
 0x6f9   : > { %v5885_v57 = vpop.eup %5884  ;;  %2299 = vrot.lane.b32.xlu1 %v5883_v54, %s6432_s15  ;;  %v2091_v10 = vmul.f32 %v2050_v62, %v7598_v3 }
 0x6fa   : > { %2297 = vrot.lane.b32.xlu0 %v5885_v57, %s6432_s15 }
 0x6fb   : > { %v2212_v4 = vpop.permute.xlu1 %2211 }
 0x6fc   : > { %v7686_v29 = vadd.f32 %v2212_v4, %v2092_v19  ;;  %v2210_v47 = vpop.permute.xlu0 %2209 }
 0x6fd   : > { %v7688_v27 = vadd.f32 %v2210_v47, %v2091_v10 }
 0x6fe   : > { %5890 = vtanh.f32 %v7686_v29 }
 0x6ff   : > { %5892 = vtanh.f32 %v7688_v27  ;;  %v2056_v50 = vpop.permute.xlu1 %2055 }
 0x700   : > { %v5887_v25 = vpop.eup %5886  ;;  %v2054_v55 = vpop.permute.xlu0 %2053  ;;  %v2094_v11 = vmul.f32 %v2056_v50, %v7608_v9 }
 0x701   : > { %v5889_v21 = vpop.eup %5888  ;;  %2303 = vrot.lane.b32.xlu1 %v5887_v25, %s6432_s15  ;;  %v2093_v14 = vmul.f32 %v2054_v55, %v7612_v52 }
 0x702   : > { %2301 = vrot.lane.b32.xlu0 %v5889_v21, %s6432_s15 }
 0x703   : > { %v2216_v40 = vpop.permute.xlu1 %2215 }
 0x704   : > { %v7696_v32 = vadd.f32 %v2216_v40, %v2094_v11  ;;  %v2214_v2 = vpop.permute.xlu0 %2213 }
 0x705   : > { %v7698_v46 = vadd.f32 %v2214_v2, %v2093_v14 }
 0x706   : > { %5894 = vtanh.f32 %v7696_v32 }
 0x707   : > { %5896 = vtanh.f32 %v7698_v46  ;;  %v2060_v26 = vpop.permute.xlu1 %2059 }
 0x708   : > { %v5891_v31 = vpop.eup %5890  ;;  %v2058_v17 = vpop.permute.xlu0 %2057  ;;  %v2096_v24 = vmul.f32 %v2060_v26, %v7622_v43 }
 0x709   : > { %v5893_v44 = vpop.eup %5892  ;;  %2307 = vrot.lane.b32.xlu1 %v5891_v31, %s6432_s15  ;;  %v2095_v5 = vmul.f32 %v2058_v17, %v7626_v56 }
 0x70a   : > { %2305 = vrot.lane.b32.xlu0 %v5893_v44, %s6432_s15 }
 0x70b   : > { %v2220_v16 = vpop.permute.xlu1 %2219 }
 0x70c   : > { %v7706_v0 = vadd.f32 %v2220_v16, %v2096_v24  ;;  %v2218_v48 = vpop.permute.xlu0 %2217 }
 0x70d   : > { %v7708_v35 = vadd.f32 %v2218_v48, %v2095_v5 }
 0x70e   : > { %5898 = vtanh.f32 %v7706_v0 }
 0x70f   : > { %5900 = vtanh.f32 %v7708_v35  ;;  %v2064_v45 = vpop.permute.xlu1 %2063 }
 0x710   : > { %v5895_v15 = vpop.eup %5894  ;;  %v2062_v34 = vpop.permute.xlu0 %2061  ;;  %v2098_v13 = vmul.f32 %v2064_v45, %v7634_v37 }
 0x711   : > { %v5897_v12 = vpop.eup %5896  ;;  %2311 = vrot.lane.b32.xlu1 %v5895_v15, %s6432_s15  ;;  %v2097_v1 = vmul.f32 %v2062_v34, %v7638_v58 }
 0x712   : > { %2309 = vrot.lane.b32.xlu0 %v5897_v12, %s6432_s15 }
 0x713   : > { %v2224_v61 = vpop.permute.xlu1 %2223 }
 0x714   : > { %v7716_v20 = vadd.f32 %v2224_v61, %v2098_v13  ;;  %v2222_v54 = vpop.permute.xlu0 %2221 }
 0x715   : > { %v7718_v62 = vadd.f32 %v2222_v54, %v2097_v1 }
 0x716   : > { %5902 = vtanh.f32 %v7716_v20 }
 0x717   : > { %5904 = vtanh.f32 %v7718_v62  ;;  %v2068_v57 = vpop.permute.xlu1 %2067 }
 0x718   : > { %v5899_v19 = vpop.eup %5898  ;;  %v2066_v10 = vpop.permute.xlu0 %2065  ;;  %v2100_v47 = vmul.f32 %v2068_v57, %v7646_v36 }
 0x719   : > { %v5901_v4 = vpop.eup %5900  ;;  %2315 = vrot.lane.b32.xlu1 %v5899_v19, %s6432_s15  ;;  %v2099_v50 = vmul.f32 %v2066_v10, %v7650_v60 }
 0x71a   : > { %2313 = vrot.lane.b32.xlu0 %v5901_v4, %s6432_s15 }
 0x71b   : > { %v2228_v25 = vpop.permute.xlu1 %2227 }
 0x71c   : > { %v7726_v55 = vadd.f32 %v2228_v25, %v2100_v47  ;;  %v2226_v21 = vpop.permute.xlu0 %2225 }
 0x71d   : > { %v7728_v11 = vadd.f32 %v2226_v21, %v2099_v50 }
 0x71e   : > { %5906 = vtanh.f32 %v7726_v55 }
 0x71f   : > { %5908 = vtanh.f32 %v7728_v11 }
 0x720   : > { %v5903_v14 = vpop.eup %5902 }
 0x721   : > { %v5905_v40 = vpop.eup %5904  ;;  %2319 = vrot.lane.b32.xlu1 %v5903_v14, %s6432_s15 }
 0x722   : > { %2317 = vrot.lane.b32.xlu0 %v5905_v40, %s6432_s15 }
 0x728   : > { %v5907_v2 = vpop.eup %5906 }
 0x729   : > { %v5909_v26 = vpop.eup %5908  ;;  %2323 = vrot.lane.b32.xlu1 %v5907_v2, %s6432_s15 }
 0x72a   : > { %2321 = vrot.lane.b32.xlu0 %v5909_v26, %s6432_s15 }
 0x763   : > { %v2296_v31 = vpop.permute.xlu1 %2295 }
 0x764   : > { %v2342_v17 = vmul.f32 %v2296_v31, %v7554_v23  ;;  %v2294_v44 = vpop.permute.xlu0 %2293 }
 0x765   : > { %v2341_v24 = vmul.f32 %v2294_v44, %v7556_v28 }
 0x766   : > { %2375 = vrot.lane.b32.xlu1 %v2342_v17, %s6435_s26 }
 0x767   : > { %2373 = vrot.lane.b32.xlu0 %v2341_v24, %s6435_s26 }
 0x76b   : > { %v2300_v5 = vpop.permute.xlu1 %2299 }
 0x76c   : > { %v2344_v16 = vmul.f32 %v2300_v5, %v7566_v38  ;;  %v2298_v48 = vpop.permute.xlu0 %2297 }
 0x76d   : > { %v2343_v45 = vmul.f32 %v2298_v48, %v7570_v39  ;;  %v1107_v48 = vsub.s32 2, %v7048_v7 }
 0x76e   : > { %2379 = vrot.lane.b32.xlu1 %v2344_v16, %s6435_s26  ;;  %v9012_v16 = vmov 0.0  }
 0x76f   : > { %2377 = vrot.lane.b32.xlu0 %v2343_v45, %s6435_s26  ;;  %v7786_v45 = vld [vmem:[#allocation6] sm:$0xf] }
 0x773   : > { %v2304_v15 = vpop.permute.xlu1 %2303 }
 0x774   : > { %v2346_v23 = vmul.f32 %v2304_v15, %v7580_v6  ;;  %v2302_v34 = vpop.permute.xlu0 %2301  ;;  %v7791_v15 = vrot.slane %v7786_v45, %v1107_v48 }
 0x775   : > { %v2345_v28 = vmul.f32 %v2302_v34, %v7584_v18 }
 0x776   : > { %2383 = vrot.lane.b32.xlu1 %v2346_v23, %s6435_s26  ;;  %v1351_v23 = vadd.f32 %v7068_v33, %v7791_v15  ;;  %v1345_v34 = vadd.f32 %v7058_v30, %v7791_v15 }
 0x777   : > { %2381 = vrot.lane.b32.xlu0 %v2345_v28, %s6435_s26 }
 0x77b   : > { %v2308_v12 = vpop.permute.xlu1 %2307 }
 0x77c   : > { %v2348_v38 = vmul.f32 %v2308_v12, %v7594_v41  ;;  %v2306_v13 = vpop.permute.xlu0 %2305 }
 0x77d   : > { %v2347_v39 = vmul.f32 %v2306_v13, %v7598_v3 }
 0x77e   : > { %2387 = vrot.lane.b32.xlu1 %v2348_v38, %s6435_s26 }
 0x77f   : > { %2385 = vrot.lane.b32.xlu0 %v2347_v39, %s6435_s26  ;;  %v1363_v39 = vadd.f32 %v7088_v42, %v7791_v15 }
 0x783   : > { %v2312_v1 = vpop.permute.xlu1 %2311 }
 0x784   : > { %v2350_v6 = vmul.f32 %v2312_v1, %v7608_v9  ;;  %v2310_v61 = vpop.permute.xlu0 %2309  ;;  %v9013_v1 = vld [vmem:[#allocation15_spill] sm:$0xff] }
 0x785   : > { %v2349_v18 = vmul.f32 %v2310_v61, %v7612_v52 }
 0x786   : > { %2391 = vrot.lane.b32.xlu1 %v2350_v6, %s6435_s26  ;;  %v1357_v6 = vadd.f32 %v9013_v1, %v7791_v15  ;;  %v9021_v1 = vld [vmem:[#allocation30_spill] sm:$0xff] }
 0x787   : > { %2389 = vrot.lane.b32.xlu0 %v2349_v18, %s6435_s26 }
 0x78b   : > { %v2316_v54 = vpop.permute.xlu1 %2315 }
 0x78c   : > { %v2352_v41 = vmul.f32 %v2316_v54, %v7622_v43  ;;  %v2314_v57 = vpop.permute.xlu0 %2313 }
 0x78d   : > { %v2351_v3 = vmul.f32 %v2314_v57, %v7626_v56  ;;  %v9014_v57 = vld [vmem:[#allocation20_spill] sm:$0xff] }
 0x78e   : > { %2395 = vrot.lane.b32.xlu1 %v2352_v41, %s6435_s26  ;;  %v1375_v42 = vadd.f32 %v9014_v57, %v7791_v15 }
 0x78f   : > { %2393 = vrot.lane.b32.xlu0 %v2351_v3, %s6435_s26  ;;  %v9015_v3 = vld [vmem:[#allocation18_spill] sm:$0xff] }
 0x793   : > { %v2320_v19 = vpop.permute.xlu1 %2319 }
 0x794   : > { %v2354_v9 = vmul.f32 %v2320_v19, %v7634_v37  ;;  %v2318_v10 = vpop.permute.xlu0 %2317  ;;  %v1369_v19 = vadd.f32 %v9015_v3, %v7791_v15  ;;  %v9022_v3 = vld [vmem:[#allocation36_spill] sm:$0xff] }
 0x795   : > { %v2353_v52 = vmul.f32 %v2318_v10, %v7638_v58 }
 0x796   : > { %2399 = vrot.lane.b32.xlu1 %v2354_v9, %s6435_s26 }
 0x797   : > { %2397 = vrot.lane.b32.xlu0 %v2353_v52, %s6435_s26 }
 0x79b   : > { %v2324_v4 = vpop.permute.xlu1 %2323 }
 0x79c   : > { %v2356_v43 = vmul.f32 %v2324_v4, %v7646_v36  ;;  %v2322_v47 = vpop.permute.xlu0 %2321 }
 0x79d   : > { %v2355_v56 = vmul.f32 %v2322_v47, %v7650_v60 }
 0x79e   : > { %2403 = vrot.lane.b32.xlu1 %v2356_v43, %s6435_s26 }
 0x79f   : > { %2401 = vrot.lane.b32.xlu0 %v2355_v56, %s6435_s26  ;;  %v9016_v56 = vld [vmem:[#allocation24_spill] sm:$0xff] }
 0x7d8   : > { %v2376_v25 = vpop.permute.xlu1 %2375 }
 0x7d9   : > { %v2374_v50 = vpop.permute.xlu0 %2373 }
 0x7da   : > { %5295 = vmatprep.mubr.msk.f32.mxu1 %vm1747_vm1, %v2374_v50  ;;  %v1387_v50 = vadd.f32 %v9016_v56, %v7791_v15 }
 0x7db   : > { %5296 = vmatmul.mubr.msk.f32.vlgmr.msra.gmra.mrb[56].mxu1 %vm1747_vm1, %v2376_v25  ;;  %v9017_v25 = vld [vmem:[#allocation22_spill] sm:$0xff] }
 0x7e0   : > { %v2380_v58 = vpop.permute.xlu1 %2379 }
 0x7e1   : > { %v2378_v37 = vpop.permute.xlu0 %2377 }
 0x7e2   : > { %5298 = vmatprep.mubr.msk.f32.mxu1 %vm1747_vm1, %v2378_v37  ;;  %v1381_v37 = vadd.f32 %v9017_v25, %v7791_v15 }
 0x7e3   : > { %5299 = vmatmul.mubr.msk.f32.gmra.mrb[58].mxu1 %vm1747_vm1, %v2380_v58 }
 0x7e8   : > { %v2384_v21 = vpop.permute.xlu1 %2383 }
 0x7e9   : > { %v2382_v36 = vpop.permute.xlu0 %2381 }
 0x7ea   : > { %5301 = vmatprep.mubr.msk.f32.mxu1 %vm1747_vm1, %v2382_v36 }
 0x7eb   : > { %5302 = vmatmul.mubr.msk.f32.gmra.mrb[60].mxu1 %vm1747_vm1, %v2384_v21 }
 0x7f0   : > { %v2388_v14 = vpop.permute.xlu1 %2387 }
 0x7f1   : > { %v2386_v60 = vpop.permute.xlu0 %2385 }
 0x7f2   : > { %5304 = vmatprep.mubr.msk.f32.mxu1 %vm1747_vm1, %v2386_v60 }
 0x7f3   : > { %5305 = vmatmul.mubr.msk.f32.gmra.mrb[62].mxu1 %vm1747_vm1, %v2388_v14 }
 0x7f8   : > { %v2392_v2 = vpop.permute.xlu1 %2391 }
 0x7f9   : > { %v2390_v40 = vpop.permute.xlu0 %2389 }
 0x7fa   : > { %5307 = vmatprep.mubr.msk.f32.mxu1 %vm1747_vm1, %v2390_v40 }
 0x7fb   : > { %5308 = vmatmul.mubr.msk.f32.gmra.mrb[64].mxu1 %vm1747_vm1, %v2392_v2  ;;  %v9018_v2 = vld [vmem:[#allocation28_spill] sm:$0xff] }
 0x800   : > { %v2396_v31 = vpop.permute.xlu1 %2395 }
 0x801   : > { %v2394_v26 = vpop.permute.xlu0 %2393 }
 0x802   : > { %5310 = vmatprep.mubr.msk.f32.mxu1 %vm1747_vm1, %v2394_v26  ;;  %v1399_v26 = vadd.f32 %v9018_v2, %v7791_v15 }
 0x803   : > { %5311 = vmatmul.mubr.msk.f32.gmra.mrb[66].mxu1 %vm1747_vm1, %v2396_v31  ;;  %v9019_v31 = vld [vmem:[#allocation26_spill] sm:$0xff] }
 0x808   : > { %v2400_v44 = vpop.permute.xlu1 %2399 }
 0x809   : > { %v2398_v17 = vpop.permute.xlu0 %2397 }
 0x80a   : > { %5313 = vmatprep.mubr.msk.f32.mxu1 %vm1747_vm1, %v2398_v17  ;;  %v1393_v17 = vadd.f32 %v9019_v31, %v7791_v15 }
 0x80b   : > { %5314 = vmatmul.mubr.msk.f32.gmra.mrb[68].mxu1 %vm1747_vm1, %v2400_v44 }
 0x810   : > { %v2404_v5 = vpop.permute.xlu1 %2403 }
 0x811   : > { %v2402_v24 = vpop.permute.xlu0 %2401 }
 0x812   : > { %5316 = vmatprep.mubr.msk.f32.mxu1 %vm1747_vm1, %v2402_v24 }
 0x813   : > { %5317 = vmatmul.mubr.msk.f32.gmra.mrb[70].mxu1 %vm1747_vm1, %v2404_v5 }
 0x814   : > { %3775 = vmatprep.mubr.f32.mxu1 %v9012_v16 }
 0x8ae   : > { %v5297_v28 = vpop.f32.mrb[56].mxu1 }
 0x8af   : > { %v7797_v12 = vadd.f32 %v5297_v28, %v1351_v23  ;;  %v2503_v38 = vpop.f32.mrb[57].mxu1 }
 0x8b0   : > { %v7799_v13 = vadd.f32 %v2503_v38, %v1345_v34  ;;  %v9020_v38 = vld [vmem:[#allocation32_spill] sm:$0xff] }
 0x8b1   : > { %5910 = vtanh.f32 %v7797_v12 }
 0x8b2   : > { %5912 = vtanh.f32 %v7799_v13 }
 0x8b6   : > { %v5300_v33 = vpop.f32.mrb[58].mxu1 }
 0x8b7   : > { %v7807_v61 = vadd.f32 %v5300_v33, %v1363_v39  ;;  %v2513_v30 = vpop.f32.mrb[59].mxu1  ;;  %v1411_v39 = vadd.f32 %v9020_v38, %v7791_v15  ;;  %v2598_v38 = vmul.f32 0.5, %v7799_v13 }
 0x8b8   : > { %v7809_v18 = vadd.f32 %v2513_v30, %v1357_v6  ;;  %v1405_v6 = vadd.f32 %v9021_v1, %v7791_v15 }
 0x8b9   : > { %5914 = vtanh.f32 %v7807_v61 }
 0x8ba   : > { %5916 = vtanh.f32 %v7809_v18  ;;  %v2600_v1 = vmul.f32 0.5, %v7809_v18 }
 0x8bb   : > { %v5911_v54 = vpop.eup %5910 }
 0x8bc   : > { %v5913_v41 = vpop.eup %5912  ;;  %2712 = vrot.lane.b32.xlu1 %v5911_v54, %s6432_s15 }
 0x8bd   : > { %2710 = vrot.lane.b32.xlu0 %v5913_v41, %s6432_s15 }
 0x8be   : > { %v5303_v9 = vpop.f32.mrb[60].mxu1 }
 0x8bf   : > { %v7819_v10 = vadd.f32 %v5303_v9, %v1375_v42  ;;  %v2523_v52 = vpop.f32.mrb[61].mxu1  ;;  %v9023_v9 = vld [vmem:[#allocation34_spill] sm:$0xff] }
 0x8c0   : > { %v7821_v4 = vadd.f32 %v2523_v52, %v1369_v19  ;;  %v1423_v19 = vadd.f32 %v9022_v3, %v7791_v15  ;;  %v1417_v52 = vadd.f32 %v9023_v9, %v7791_v15 }
 0x8c1   : > { %5918 = vtanh.f32 %v7819_v10 }
 0x8c2   : > { %5920 = vtanh.f32 %v7821_v4 }
 0x8c3   : > { %v5915_v43 = vpop.eup %5914 }
 0x8c4   : > { %v5917_v47 = vpop.eup %5916  ;;  %2716 = vrot.lane.b32.xlu1 %v5915_v43, %s6432_s15 }
 0x8c5   : > { %2714 = vrot.lane.b32.xlu0 %v5917_v47, %s6432_s15 }
 0x8c6   : > { %v5306_v58 = vpop.f32.mrb[62].mxu1 }
 0x8c7   : > { %v7831_v36 = vadd.f32 %v5306_v58, %v1387_v50  ;;  %v2533_v21 = vpop.f32.mrb[63].mxu1  ;;  %v9024_v58 = vld [vmem:[#allocation40_spill] sm:$0xff] }
 0x8c8   : > { %v7833_v60 = vadd.f32 %v2533_v21, %v1381_v37  ;;  %v1435_v21 = vadd.f32 %v9024_v58, %v7791_v15 }
 0x8c9   : > { %5922 = vtanh.f32 %v7831_v36 }
 0x8ca   : > { %5924 = vtanh.f32 %v7833_v60 }
 0x8cb   : > { %v5919_v14 = vpop.eup %5918 }
 0x8cc   : > { %v5921_v40 = vpop.eup %5920  ;;  %2720 = vrot.lane.b32.xlu1 %v5919_v14, %s6432_s15  ;;  %v9025_v14 = vld [vmem:[#allocation38_spill] sm:$0xff] }
 0x8cd   : > { %2718 = vrot.lane.b32.xlu0 %v5921_v40, %s6432_s15  ;;  %v1429_v40 = vadd.f32 %v9025_v14, %v7791_v15  ;;  %v2599_v15 = vmul.f32 0.5, %v7797_v12 }
 0x8ce   : > { %v5309_v44 = vpop.f32.mrb[64].mxu1 }
 0x8cf   : > { %v7843_v24 = vadd.f32 %v5309_v44, %v1399_v26  ;;  %v2543_v5 = vpop.f32.mrb[65].mxu1 }
 0x8d0   : > { %v7845_v23 = vadd.f32 %v2543_v5, %v1393_v17 }
 0x8d1   : > { %5926 = vtanh.f32 %v7843_v24 }
 0x8d2   : > { %5928 = vtanh.f32 %v7845_v23 }
 0x8d3   : > { %v5923_v34 = vpop.eup %5922 }
 0x8d4   : > { %v5925_v28 = vpop.eup %5924  ;;  %2724 = vrot.lane.b32.xlu1 %v5923_v34, %s6432_s15 }
 0x8d5   : > { %2722 = vrot.lane.b32.xlu0 %v5925_v28, %s6432_s15 }
 0x8d6   : > { %v5312_v33 = vpop.f32.mrb[66].mxu1 }
 0x8d7   : > { %v7855_v30 = vadd.f32 %v5312_v33, %v1411_v39  ;;  %v2553_v54 = vpop.f32.mrb[67].mxu1  ;;  %v2601_v39 = vmul.f32 0.5, %v7807_v61 }
 0x8d8   : > { %v7857_v41 = vadd.f32 %v2553_v54, %v1405_v6  ;;  %v2603_v54 = vmul.f32 0.5, %v7819_v10 }
 0x8d9   : > { %5930 = vtanh.f32 %v7855_v30 }
 0x8da   : > { %5932 = vtanh.f32 %v7857_v41 }
 0x8db   : > { %v5927_v57 = vpop.eup %5926 }
 0x8dc   : > { %v5929_v42 = vpop.eup %5928  ;;  %2728 = vrot.lane.b32.xlu1 %v5927_v57, %s6432_s15 }
 0x8dd   : > { %2726 = vrot.lane.b32.xlu0 %v5929_v42, %s6432_s15  ;;  %v2602_v42 = vmul.f32 0.5, %v7821_v4  ;;  %v2604_v4 = vmul.f32 0.5, %v7833_v60 }
 0x8de   : > { %v5315_v43 = vpop.f32.mrb[68].mxu1 }
 0x8df   : > { %v7867_v47 = vadd.f32 %v5315_v43, %v1423_v19  ;;  %v2563_v56 = vpop.f32.mrb[69].mxu1  ;;  %v2605_v43 = vmul.f32 0.5, %v7831_v36 }
 0x8e0   : > { %v7869_v50 = vadd.f32 %v2563_v56, %v1417_v52 }
 0x8e1   : > { %5934 = vtanh.f32 %v7867_v47 }
 0x8e2   : > { %5936 = vtanh.f32 %v7869_v50 }
 0x8e3   : > { %v5931_v25 = vpop.eup %5930 }
 0x8e4   : > { %v5933_v37 = vpop.eup %5932  ;;  %2732 = vrot.lane.b32.xlu1 %v5931_v25, %s6432_s15 }
 0x8e5   : > { %2730 = vrot.lane.b32.xlu0 %v5933_v37, %s6432_s15 }
 0x8e6   : > { %v5318_v2 = vpop.f32.mrb[70].mxu1 }
 0x8e7   : > { %v7879_v26 = vadd.f32 %v5318_v2, %v1435_v21  ;;  %v2573_v31 = vpop.f32.mrb[71].mxu1 }
 0x8e8   : > { %v7881_v17 = vadd.f32 %v2573_v31, %v1429_v40  ;;  %v2607_v31 = vmul.f32 0.5, %v7843_v24 }
 0x8e9   : > { %5938 = vtanh.f32 %v7879_v26 }
 0x8ea   : > { %5940 = vtanh.f32 %v7881_v17 }
 0x8eb   : > { %v5935_v44 = vpop.eup %5934  ;;  %5942 = vtanh.f32 %v2599_v15 }
 0x8ec   : > { %v5937_v5 = vpop.eup %5936  ;;  %2736 = vrot.lane.b32.xlu1 %v5935_v44, %s6432_s15  ;;  %5944 = vtanh.f32 %v2598_v38 }
 0x8ed   : > { %2734 = vrot.lane.b32.xlu0 %v5937_v5, %s6432_s15  ;;  %5946 = vtanh.f32 %v2601_v39  ;;  %v2606_v5 = vmul.f32 0.5, %v7845_v23 }
 0x8ee   : > { %5948 = vtanh.f32 %v2600_v1 }
 0x8ef   : > { %5950 = vtanh.f32 %v2603_v54 }
 0x8f0   : > { %5952 = vtanh.f32 %v2602_v42 }
 0x8f1   : > { %5954 = vtanh.f32 %v2605_v43  ;;  %v2611_v43 = vmul.f32 0.5, %v7867_v47 }
 0x8f2   : > { %5956 = vtanh.f32 %v2604_v4 }
 0x8f3   : > { %v5939_v34 = vpop.eup %5938  ;;  %5958 = vtanh.f32 %v2607_v31  ;;  %v2613_v31 = vmul.f32 0.5, %v7879_v26 }
 0x8f4   : > { %v5941_v28 = vpop.eup %5940  ;;  %2740 = vrot.lane.b32.xlu1 %v5939_v34, %s6432_s15  ;;  %5960 = vtanh.f32 %v2606_v5 }
 0x8f5   : > { %2738 = vrot.lane.b32.xlu0 %v5941_v28, %s6432_s15  ;;  %v5943_v6 = vpop.eup %5942 }
 0x8f6   : > { %v5945_v33 = vpop.eup %5944  ;;  %v2631_v57 = vmul.f32 0.5, %v5943_v6 }
 0x8f7   : > { %v2630_v3 = vmul.f32 0.5, %v5945_v33  ;;  %v5947_v13 = vpop.eup %5946  ;;  %v2609_v33 = vmul.f32 0.5, %v7855_v30 }
 0x8f8   : > { %v7895_v12 = vadd.f32 0.5, %v2631_v57  ;;  %v5949_v61 = vpop.eup %5948  ;;  %v2633_v56 = vmul.f32 0.5, %v5947_v13  ;;  %v2608_v57 = vmul.f32 0.5, %v7857_v41 }
 0x8f9   : > { %v7897_v9 = vadd.f32 0.5, %v2630_v3  ;;  %v2632_v25 = vmul.f32 0.5, %v5949_v61  ;;  %v5951_v58 = vpop.eup %5950  ;;  %5962 = vtanh.f32 %v2609_v33 }
 0x8fa   : > { %v7905_v37 = vadd.f32 0.5, %v2633_v56  ;;  %v5953_v40 = vpop.eup %5952  ;;  %v2635_v44 = vmul.f32 0.5, %v5951_v58  ;;  %5964 = vtanh.f32 %v2608_v57  ;;  %v2610_v56 = vmul.f32 0.5, %v7869_v50 }
 0x8fb   : > { %v7907_v14 = vadd.f32 0.5, %v2632_v25  ;;  %v2634_v34 = vmul.f32 0.5, %v5953_v40  ;;  %v5955_v15 = vpop.eup %5954  ;;  %5966 = vtanh.f32 %v2611_v43 }
 0x8fc   : > { %v7915_v28 = vadd.f32 0.5, %v2635_v44  ;;  %v5957_v1 = vpop.eup %5956  ;;  %v2637_v54 = vmul.f32 0.5, %v5955_v15  ;;  %5968 = vtanh.f32 %v2610_v56  ;;  %v2612_v44 = vmul.f32 0.5, %v7881_v17 }
 0x8fd   : > { %v7917_v39 = vadd.f32 0.5, %v2634_v34  ;;  %v2636_v42 = vmul.f32 0.5, %v5957_v1  ;;  %v5959_v13 = vpop.eup %5958  ;;  %5970 = vtanh.f32 %v2613_v31  ;;  %v2678_v31 = vmul.f32 %v7897_v9, %v7660_v8 }
 0x8fe   : > { %v7925_v3 = vadd.f32 0.5, %v2637_v54  ;;  %5972 = vtanh.f32 %v2612_v44 }
 0x8ff   : > { %v7927_v61 = vadd.f32 0.5, %v2636_v42 }
 0x92e   : > { %v2713_v19 = vpop.permute.xlu1 %2712 }
 0x92f   : > { %v2759_v18 = vmul.f32 %v2713_v19, %v7895_v12  ;;  %v2711_v52 = vpop.permute.xlu0 %2710 }
 0x930   : > { %v2758_v10 = vmul.f32 %v2711_v52, %v7897_v9 }
 0x931   : > { %2792 = vrot.lane.b32.xlu1 %v2759_v18, %s6435_s26  ;;  %v5961_v18 = vpop.eup %5960 }
 0x932   : > { %2790 = vrot.lane.b32.xlu0 %v2758_v10, %s6435_s26  ;;  %v2639_v10 = vmul.f32 0.5, %v5959_v13  ;;  %v2638_v4 = vmul.f32 0.5, %v5961_v18  ;;  %v5963_v58 = vpop.eup %5962 }
 0x934   : > { %v7935_v25 = vadd.f32 0.5, %v2639_v10  ;;  %v7937_v40 = vadd.f32 0.5, %v2638_v4 }
 0x936   : > { %v2717_v21 = vpop.permute.xlu1 %2716 }
 0x937   : > { %v2761_v36 = vmul.f32 %v2717_v21, %v7905_v37  ;;  %v2715_v2 = vpop.permute.xlu0 %2714 }
 0x938   : > { %v2760_v60 = vmul.f32 %v2715_v2, %v7907_v14 }
 0x939   : > { %2796 = vrot.lane.b32.xlu1 %v2761_v36, %s6435_s26  ;;  %v5965_v36 = vpop.eup %5964 }
 0x93a   : > { %2794 = vrot.lane.b32.xlu0 %v2760_v60, %s6435_s26  ;;  %v2641_v60 = vmul.f32 0.5, %v5963_v58  ;;  %v2640_v5 = vmul.f32 0.5, %v5965_v36  ;;  %v5967_v15 = vpop.eup %5966 }
 0x93b   : > { %v2643_v17 = vmul.f32 0.5, %v5967_v15 }
 0x93c   : > { %v7945_v34 = vadd.f32 0.5, %v2641_v60  ;;  %v7947_v1 = vadd.f32 0.5, %v2640_v5  ;;  %v2681_v5 = vmul.f32 %v7905_v37, %v7666_v63  ;;  %v2683_v63 = vmul.f32 %v7915_v28, %v7676_v49 }
 0x93d   : > { %v7953_v54 = vadd.f32 0.5, %v2643_v17  ;;  %v2685_v49 = vmul.f32 %v7925_v3, %v7686_v29  ;;  %v2687_v29 = vmul.f32 %v7935_v25, %v7696_v32 }
 0x93e   : > { %v2721_v38 = vpop.permute.xlu1 %2720  ;;  %v2689_v32 = vmul.f32 %v7945_v34, %v7706_v0 }
 0x93f   : > { %v2763_v24 = vmul.f32 %v2721_v38, %v7915_v28  ;;  %v2719_v6 = vpop.permute.xlu0 %2718  ;;  %v2691_v0 = vmul.f32 %v7953_v54, %v7716_v20 }
 0x940   : > { %v2762_v23 = vmul.f32 %v2719_v6, %v7917_v39 }
 0x941   : > { %2800 = vrot.lane.b32.xlu1 %v2763_v24, %s6435_s26  ;;  %v5969_v24 = vpop.eup %5968 }
 0x942   : > { %2798 = vrot.lane.b32.xlu0 %v2762_v23, %s6435_s26  ;;  %v2642_v23 = vmul.f32 0.5, %v5969_v24  ;;  %v5971_v57 = vpop.eup %5970 }
 0x943   : > { %v2645_v43 = vmul.f32 0.5, %v5971_v57 }
 0x944   : > { %v7955_v13 = vadd.f32 0.5, %v2642_v23 }
 0x945   : > { %v7961_v10 = vadd.f32 0.5, %v2645_v43 }
 0x946   : > { %v2725_v19 = vpop.permute.xlu1 %2724 }
 0x947   : > { %v2765_v30 = vmul.f32 %v2725_v19, %v7925_v3  ;;  %v2723_v52 = vpop.permute.xlu0 %2722  ;;  %v5973_v19 = vpop.eup %5972  ;;  %v2693_v20 = vmul.f32 %v7961_v10, %v7726_v55 }
 0x948   : > { %v2764_v41 = vmul.f32 %v2723_v52, %v7927_v61 }
 0x949   : > { %2804 = vrot.lane.b32.xlu1 %v2765_v30, %s6435_s26 }
 0x94a   : > { %2802 = vrot.lane.b32.xlu0 %v2764_v41, %s6435_s26  ;;  %v2644_v41 = vmul.f32 0.5, %v5973_v19 }
 0x94c   : > { %v7963_v4 = vadd.f32 0.5, %v2644_v41 }
 0x94e   : > { %v2729_v21 = vpop.permute.xlu1 %2728 }
 0x94f   : > { %v2767_v47 = vmul.f32 %v2729_v21, %v7935_v25  ;;  %v2727_v2 = vpop.permute.xlu0 %2726 }
 0x950   : > { %v2766_v50 = vmul.f32 %v2727_v2, %v7937_v40 }
 0x951   : > { %2808 = vrot.lane.b32.xlu1 %v2767_v47, %s6435_s26  ;;  %v2679_v47 = vmul.f32 %v7895_v12, %v7658_v59  ;;  %v2680_v59 = vmul.f32 %v7907_v14, %v7668_v53  ;;  %v2682_v53 = vmul.f32 %v7917_v39, %v7678_v22  ;;  %v2684_v22 = vmul.f32 %v7927_v61, %v7688_v27 }
 0x952   : > { %2806 = vrot.lane.b32.xlu0 %v2766_v50, %s6435_s26  ;;  %v2686_v27 = vmul.f32 %v7937_v40, %v7698_v46  ;;  %v2688_v46 = vmul.f32 %v7947_v1, %v7708_v35  ;;  %v2690_v35 = vmul.f32 %v7955_v13, %v7718_v62  ;;  %v2692_v62 = vmul.f32 %v7963_v4, %v7728_v11 }
 0x956   : > { %v2733_v38 = vpop.permute.xlu1 %2732 }
 0x957   : > { %v2769_v26 = vmul.f32 %v2733_v38, %v7945_v34  ;;  %v2731_v6 = vpop.permute.xlu0 %2730 }
 0x958   : > { %v2768_v33 = vmul.f32 %v2731_v6, %v7947_v1 }
 0x959   : > { %2812 = vrot.lane.b32.xlu1 %v2769_v26, %s6435_s26 }
 0x95a   : > { %2810 = vrot.lane.b32.xlu0 %v2768_v33, %s6435_s26 }
 0x95e   : > { %v2737_v42 = vpop.permute.xlu1 %2736 }
 0x95f   : > { %v2771_v18 = vmul.f32 %v2737_v42, %v7953_v54  ;;  %v2735_v30 = vpop.permute.xlu0 %2734 }
 0x960   : > { %v2770_v52 = vmul.f32 %v2735_v30, %v7955_v13 }
 0x961   : > { %2816 = vrot.lane.b32.xlu1 %v2771_v18, %s6435_s26 }
 0x962   : > { %2814 = vrot.lane.b32.xlu0 %v2770_v52, %s6435_s26 }
 0x966   : > { %v2741_v56 = vpop.permute.xlu1 %2740 }
 0x967   : > { %v2773_v58 = vmul.f32 %v2741_v56, %v7961_v10  ;;  %v2739_v21 = vpop.permute.xlu0 %2738 }
 0x968   : > { %v2772_v36 = vmul.f32 %v2739_v21, %v7963_v4 }
 0x969   : > { %2820 = vrot.lane.b32.xlu1 %v2773_v58, %s6435_s26 }
 0x96a   : > { %2818 = vrot.lane.b32.xlu0 %v2772_v36, %s6435_s26 }
 0x9a3   : > { %v2793_v2 = vpop.permute.xlu1 %2792 }
 0x9a4   : > { %v7973_v50 = vadd.f32 %v2793_v2, %v2679_v47  ;;  %v2791_v60 = vpop.permute.xlu0 %2790 }
 0x9a5   : > { %v7975_v44 = vadd.f32 %v2791_v60, %v2678_v31 }
 0x9a6   : > { %5974 = vtanh.f32 %v7973_v50 }
 0x9a7   : > { %5976 = vtanh.f32 %v7975_v44 }
 0x9ab   : > { %v2797_v15 = vpop.permute.xlu1 %2796 }
 0x9ac   : > { %v7983_v38 = vadd.f32 %v2797_v15, %v2681_v5  ;;  %v2795_v24 = vpop.permute.xlu0 %2794 }
 0x9ad   : > { %v7985_v8 = vadd.f32 %v2795_v24, %v2680_v59 }
 0x9ae   : > { %5978 = vtanh.f32 %v7983_v38 }
 0x9af   : > { %5980 = vtanh.f32 %v7985_v8 }
 0x9b0   : > { %v5975_v26 = vpop.eup %5974 }
 0x9b1   : > { %v5977_v6 = vpop.eup %5976  ;;  %2888 = vrot.lane.b32.xlu1 %v5975_v26, %s6432_s15 }
 0x9b2   : > { %2886 = vrot.lane.b32.xlu0 %v5977_v6, %s6432_s15 }
 0x9b3   : > { %v2801_v33 = vpop.permute.xlu1 %2800 }
 0x9b4   : > { %v7995_v17 = vadd.f32 %v2801_v33, %v2683_v63  ;;  %v2799_v23 = vpop.permute.xlu0 %2798 }
 0x9b5   : > { %v7997_v57 = vadd.f32 %v2799_v23, %v2682_v53 }
 0x9b6   : > { %5982 = vtanh.f32 %v7995_v17 }
 0x9b7   : > { %5984 = vtanh.f32 %v7997_v57 }
 0x9b8   : > { %v5979_v42 = vpop.eup %5978 }
 0x9b9   : > { %v5981_v19 = vpop.eup %5980  ;;  %2892 = vrot.lane.b32.xlu1 %v5979_v42, %s6432_s15 }
 0x9ba   : > { %2890 = vrot.lane.b32.xlu0 %v5981_v19, %s6432_s15 }
 0x9bb   : > { %v2805_v18 = vpop.permute.xlu1 %2804 }
 0x9bc   : > { %v8007_v30 = vadd.f32 %v2805_v18, %v2685_v49  ;;  %v2803_v52 = vpop.permute.xlu0 %2802 }
 0x9bd   : > { %v8009_v43 = vadd.f32 %v2803_v52, %v2684_v22 }
 0x9be   : > { %5986 = vtanh.f32 %v8007_v30 }
 0x9bf   : > { %5988 = vtanh.f32 %v8009_v43 }
 0x9c0   : > { %v5983_v41 = vpop.eup %5982 }
 0x9c1   : > { %v5985_v56 = vpop.eup %5984  ;;  %2896 = vrot.lane.b32.xlu1 %v5983_v41, %s6432_s15 }
 0x9c2   : > { %2894 = vrot.lane.b32.xlu0 %v5985_v56, %s6432_s15 }
 0x9c3   : > { %v2809_v58 = vpop.permute.xlu1 %2808 }
 0x9c4   : > { %v8019_v21 = vadd.f32 %v2809_v58, %v2687_v29  ;;  %v2807_v36 = vpop.permute.xlu0 %2806 }
 0x9c5   : > { %v8021_v47 = vadd.f32 %v2807_v36, %v2686_v27 }
 0x9c6   : > { %5990 = vtanh.f32 %v8019_v21 }
 0x9c7   : > { %5992 = vtanh.f32 %v8021_v47 }
 0x9c8   : > { %v5987_v2 = vpop.eup %5986 }
 0x9c9   : > { %v5989_v31 = vpop.eup %5988  ;;  %2900 = vrot.lane.b32.xlu1 %v5987_v2, %s6432_s15 }
 0x9ca   : > { %2898 = vrot.lane.b32.xlu0 %v5989_v31, %s6432_s15 }
 0x9cb   : > { %v2813_v60 = vpop.permute.xlu1 %2812 }
 0x9cc   : > { %v8031_v5 = vadd.f32 %v2813_v60, %v2689_v32  ;;  %v2811_v15 = vpop.permute.xlu0 %2810 }
 0x9cd   : > { %v8033_v59 = vadd.f32 %v2811_v15, %v2688_v46 }
 0x9ce   : > { %5994 = vtanh.f32 %v8031_v5 }
 0x9cf   : > { %5996 = vtanh.f32 %v8033_v59 }
 0x9d0   : > { %v5991_v24 = vpop.eup %5990 }
 0x9d1   : > { %v5993_v26 = vpop.eup %5992  ;;  %2904 = vrot.lane.b32.xlu1 %v5991_v24, %s6432_s15 }
 0x9d2   : > { %2902 = vrot.lane.b32.xlu0 %v5993_v26, %s6432_s15 }
 0x9d3   : > { %v2817_v6 = vpop.permute.xlu1 %2816 }
 0x9d4   : > { %v8043_v63 = vadd.f32 %v2817_v6, %v2691_v0  ;;  %v2815_v33 = vpop.permute.xlu0 %2814 }
 0x9d5   : > { %v8045_v53 = vadd.f32 %v2815_v33, %v2690_v35 }
 0x9d6   : > { %5998 = vtanh.f32 %v8043_v63 }
 0x9d7   : > { %6000 = vtanh.f32 %v8045_v53 }
 0x9d8   : > { %v5995_v23 = vpop.eup %5994 }
 0x9d9   : > { %v5997_v42 = vpop.eup %5996  ;;  %2908 = vrot.lane.b32.xlu1 %v5995_v23, %s6432_s15 }
 0x9da   : > { %2906 = vrot.lane.b32.xlu0 %v5997_v42, %s6432_s15 }
 0x9db   : > { %v2821_v19 = vpop.permute.xlu1 %2820 }
 0x9dc   : > { %v8055_v49 = vadd.f32 %v2821_v19, %v2693_v20  ;;  %v2819_v18 = vpop.permute.xlu0 %2818 }
 0x9dd   : > { %v8057_v22 = vadd.f32 %v2819_v18, %v2692_v62 }
 0x9de   : > { %6002 = vtanh.f32 %v8055_v49 }
 0x9df   : > { %6004 = vtanh.f32 %v8057_v22 }
 0x9e0   : > { %v5999_v52 = vpop.eup %5998 }
 0x9e1   : > { %v6001_v41 = vpop.eup %6000  ;;  %2912 = vrot.lane.b32.xlu1 %v5999_v52, %s6432_s15 }
 0x9e2   : > { %2910 = vrot.lane.b32.xlu0 %v6001_v41, %s6432_s15 }
 0x9e8   : > { %v6003_v55 = vpop.eup %6002 }
 0x9e9   : > { %v6005_v56 = vpop.eup %6004  ;;  %2916 = vrot.lane.b32.xlu1 %v6003_v55, %s6432_s15 }
 0x9ea   : > { %2914 = vrot.lane.b32.xlu0 %v6005_v56, %s6432_s15 }
 0xa23   : > { %v2889_v11 = vpop.permute.xlu1 %2888 }
 0xa24   : > { %v2935_v29 = vmul.f32 %v2889_v11, %v7895_v12  ;;  %v2887_v58 = vpop.permute.xlu0 %2886 }
 0xa25   : > { %v2934_v27 = vmul.f32 %v2887_v58, %v7897_v9 }
 0xa26   : > { %2968 = vrot.lane.b32.xlu1 %v2935_v29, %s6435_s26 }
 0xa27   : > { %2966 = vrot.lane.b32.xlu0 %v2934_v27, %s6435_s26 }
 0xa2b   : > { %v2893_v36 = vpop.permute.xlu1 %2892 }
 0xa2c   : > { %v2937_v2 = vmul.f32 %v2893_v36, %v7905_v37  ;;  %v2891_v31 = vpop.permute.xlu0 %2890 }
 0xa2d   : > { %v2936_v32 = vmul.f32 %v2891_v31, %v7907_v14 }
 0xa2e   : > { %2972 = vrot.lane.b32.xlu1 %v2937_v2, %s6435_s26  ;;  %v1111_v2 = vsub.s32 3, %v7048_v7 }
 0xa2f   : > { %2970 = vrot.lane.b32.xlu0 %v2936_v32, %s6435_s26  ;;  %v9026_v32 = vld [vmem:[#allocation14_spill] sm:$0xff] }
 0xa30   : > { %v8118_v31 = vrot.slane %v7786_v45, %v1111_v2 }
 0xa33   : > { %v2897_v60 = vpop.permute.xlu1 %2896 }
 0xa34   : > { %v2939_v12 = vmul.f32 %v2897_v60, %v7915_v28  ;;  %v2895_v46 = vpop.permute.xlu0 %2894  ;;  %v1353_v60 = vadd.f32 %v9026_v32, %v8118_v31 }
 0xa35   : > { %v2938_v9 = vmul.f32 %v2895_v46, %v7917_v39 }
 0xa36   : > { %2976 = vrot.lane.b32.xlu1 %v2939_v12, %s6435_s26  ;;  %v9027_v12 = vld [vmem:[#allocation13_spill] sm:$0xff] }
 0xa37   : > { %2974 = vrot.lane.b32.xlu0 %v2938_v9, %s6435_s26  ;;  %v1347_v46 = vadd.f32 %v9027_v12, %v8118_v31 }
 0xa3b   : > { %v2901_v15 = vpop.permute.xlu1 %2900 }
 0xa3c   : > { %v2941_v37 = vmul.f32 %v2901_v15, %v7925_v3  ;;  %v2899_v24 = vpop.permute.xlu0 %2898 }
 0xa3d   : > { %v2940_v14 = vmul.f32 %v2899_v24, %v7927_v61 }
 0xa3e   : > { %2980 = vrot.lane.b32.xlu1 %v2941_v37, %s6435_s26 }
 0xa3f   : > { %2978 = vrot.lane.b32.xlu0 %v2940_v14, %s6435_s26  ;;  %v9028_v14 = vld [vmem:[#allocation17_spill] sm:$0xff] }
 0xa40   : > { %v1365_v45 = vadd.f32 %v9028_v14, %v8118_v31  ;;  %v9036_v14 = vld [vmem:[#allocation33_spill] sm:$0xff] }
 0xa43   : > { %v2905_v26 = vpop.permute.xlu1 %2904 }
 0xa44   : > { %v2943_v28 = vmul.f32 %v2905_v26, %v7935_v25  ;;  %v2903_v0 = vpop.permute.xlu0 %2902  ;;  %v9029_v26 = vld [vmem:[#allocation16_spill] sm:$0xff] }
 0xa45   : > { %v2942_v39 = vmul.f32 %v2903_v0, %v7937_v40 }
 0xa46   : > { %2984 = vrot.lane.b32.xlu1 %v2943_v28, %s6435_s26  ;;  %v1359_v28 = vadd.f32 %v9029_v26, %v8118_v31  ;;  %v9037_v26 = vld [vmem:[#allocation31_spill] sm:$0xff] }
 0xa47   : > { %2982 = vrot.lane.b32.xlu0 %v2942_v39, %s6435_s26 }
 0xa4b   : > { %v2909_v6 = vpop.permute.xlu1 %2908 }
 0xa4c   : > { %v2945_v3 = vmul.f32 %v2909_v6, %v7945_v34  ;;  %v2907_v35 = vpop.permute.xlu0 %2906 }
 0xa4d   : > { %v2944_v61 = vmul.f32 %v2907_v35, %v7947_v1 }
 0xa4e   : > { %2988 = vrot.lane.b32.xlu1 %v2945_v3, %s6435_s26 }
 0xa4f   : > { %2986 = vrot.lane.b32.xlu0 %v2944_v61, %s6435_s26 }
 0xa53   : > { %v2913_v33 = vpop.permute.xlu1 %2912 }
 0xa54   : > { %v2947_v25 = vmul.f32 %v2913_v33, %v7953_v54  ;;  %v2911_v23 = vpop.permute.xlu0 %2910  ;;  %v9030_v33 = vld [vmem:[#allocation21_spill] sm:$0xff] }
 0xa55   : > { %v2946_v40 = vmul.f32 %v2911_v23, %v7955_v13  ;;  %v9031_v23 = vld [vmem:[#allocation19_spill] sm:$0xff] }
 0xa56   : > { %2992 = vrot.lane.b32.xlu1 %v2947_v25, %s6435_s26  ;;  %v1377_v25 = vadd.f32 %v9030_v33, %v8118_v31 }
 0xa57   : > { %2990 = vrot.lane.b32.xlu0 %v2946_v40, %s6435_s26  ;;  %v1371_v40 = vadd.f32 %v9031_v23, %v8118_v31  ;;  %v9038_v23 = vld [vmem:[#allocation37_spill] sm:$0xff] }
 0xa5b   : > { %v2917_v42 = vpop.permute.xlu1 %2916 }
 0xa5c   : > { %v2949_v34 = vmul.f32 %v2917_v42, %v7961_v10  ;;  %v2915_v20 = vpop.permute.xlu0 %2914 }
 0xa5d   : > { %v2948_v1 = vmul.f32 %v2915_v20, %v7963_v4 }
 0xa5e   : > { %2996 = vrot.lane.b32.xlu1 %v2949_v34, %s6435_s26 }
 0xa5f   : > { %2994 = vrot.lane.b32.xlu0 %v2948_v1, %s6435_s26 }
 0xa98   : > { %v2969_v62 = vpop.permute.xlu1 %2968 }
 0xa99   : > { %v2967_v19 = vpop.permute.xlu0 %2966 }
 0xa9a   : > { %5327 = vmatprep.mubr.msk.f32.mxu0 %vm1747_vm1, %v2967_v19 }
 0xa9b   : > { %5328 = vmatmul.mubr.msk.f32.vlgmr.msra.gmra.mrb[56].mxu0 %vm1747_vm1, %v2969_v62 }
 0xaa0   : > { %v2973_v13 = vpop.permute.xlu1 %2972 }
 0xaa1   : > { %v2971_v54 = vpop.permute.xlu0 %2970 }
 0xaa2   : > { %5330 = vmatprep.mubr.msk.f32.mxu0 %vm1747_vm1, %v2971_v54  ;;  %v9032_v54 = vld [vmem:[#allocation25_spill] sm:$0xff] }
 0xaa3   : > { %5331 = vmatmul.mubr.msk.f32.gmra.mrb[58].mxu0 %vm1747_vm1, %v2973_v13  ;;  %v1389_v13 = vadd.f32 %v9032_v54, %v8118_v31 }
 0xaa8   : > { %v2977_v18 = vpop.permute.xlu1 %2976 }
 0xaa9   : > { %v2975_v10 = vpop.permute.xlu0 %2974 }
 0xaaa   : > { %5333 = vmatprep.mubr.msk.f32.mxu0 %vm1747_vm1, %v2975_v10  ;;  %v9033_v10 = vld [vmem:[#allocation23_spill] sm:$0xff] }
 0xaab   : > { %5334 = vmatmul.mubr.msk.f32.gmra.mrb[60].mxu0 %vm1747_vm1, %v2977_v18  ;;  %v1383_v18 = vadd.f32 %v9033_v10, %v8118_v31 }
 0xab0   : > { %v2981_v52 = vpop.permute.xlu1 %2980 }
 0xab1   : > { %v2979_v4 = vpop.permute.xlu0 %2978 }
 0xab2   : > { %5336 = vmatprep.mubr.msk.f32.mxu0 %vm1747_vm1, %v2979_v4 }
 0xab3   : > { %5337 = vmatmul.mubr.msk.f32.gmra.mrb[62].mxu0 %vm1747_vm1, %v2981_v52 }
 0xab8   : > { %v2985_v55 = vpop.permute.xlu1 %2984 }
 0xab9   : > { %v2983_v41 = vpop.permute.xlu0 %2982 }
 0xaba   : > { %5339 = vmatprep.mubr.msk.f32.mxu0 %vm1747_vm1, %v2983_v41 }
 0xabb   : > { %5340 = vmatmul.mubr.msk.f32.gmra.mrb[64].mxu0 %vm1747_vm1, %v2985_v55 }
 0xac0   : > { %v2989_v11 = vpop.permute.xlu1 %2988 }
 0xac1   : > { %v2987_v56 = vpop.permute.xlu0 %2986 }
 0xac2   : > { %5342 = vmatprep.mubr.msk.f32.mxu0 %vm1747_vm1, %v2987_v56 }
 0xac3   : > { %5343 = vmatmul.mubr.msk.f32.gmra.mrb[66].mxu0 %vm1747_vm1, %v2989_v11 }
 0xac8   : > { %v2993_v58 = vpop.permute.xlu1 %2992 }
 0xac9   : > { %v2991_v29 = vpop.permute.xlu0 %2990 }
 0xaca   : > { %5345 = vmatprep.mubr.msk.f32.mxu0 %vm1747_vm1, %v2991_v29  ;;  %v9034_v29 = vld [vmem:[#allocation29_spill] sm:$0xff] }
 0xacb   : > { %5346 = vmatmul.mubr.msk.f32.gmra.mrb[68].mxu0 %vm1747_vm1, %v2993_v58  ;;  %v1401_v58 = vadd.f32 %v9034_v29, %v8118_v31 }
 0xad0   : > { %v2997_v36 = vpop.permute.xlu1 %2996 }
 0xad1   : > { %v2995_v27 = vpop.permute.xlu0 %2994 }
 0xad2   : > { %5348 = vmatprep.mubr.msk.f32.mxu0 %vm1747_vm1, %v2995_v27  ;;  %v9035_v27 = vld [vmem:[#allocation27_spill] sm:$0xff] }
 0xad3   : > { %5349 = vmatmul.mubr.msk.f32.gmra.mrb[70].mxu0 %vm1747_vm1, %v2997_v36  ;;  %v1395_v36 = vadd.f32 %v9035_v27, %v8118_v31 }
 0xad4   : > { %3936 = vmatprep.mubr.f32.mxu0 %v9012_v16 }
 0xb6e   : > { %v5329_v9 = vpop.f32.mrb[56].mxu0 }
 0xb6f   : > { %v8124_v15 = vadd.f32 %v5329_v9, %v1353_v60  ;;  %v3096_v37 = vpop.f32.mrb[57].mxu0 }
 0xb70   : > { %v8126_v24 = vadd.f32 %v3096_v37, %v1347_v46 }
 0xb71   : > { %6006 = vtanh.f32 %v8124_v15 }
 0xb72   : > { %6008 = vtanh.f32 %v8126_v24 }
 0xb76   : > { %v5332_v0 = vpop.f32.mrb[58].mxu0 }
 0xb77   : > { %v8134_v39 = vadd.f32 %v5332_v0, %v1365_v45  ;;  %v3106_v6 = vpop.f32.mrb[59].mxu0  ;;  %v1413_v45 = vadd.f32 %v9036_v14, %v8118_v31  ;;  %v3191_v14 = vmul.f32 0.5, %v8126_v24 }
 0xb78   : > { %v8136_v3 = vadd.f32 %v3106_v6, %v1359_v28  ;;  %v1407_v28 = vadd.f32 %v9037_v26, %v8118_v31 }
 0xb79   : > { %6010 = vtanh.f32 %v8134_v39 }
 0xb7a   : > { %6012 = vtanh.f32 %v8136_v3  ;;  %v3193_v26 = vmul.f32 0.5, %v8136_v3 }
 0xb7b   : > { %v6007_v35 = vpop.eup %6006 }
 0xb7c   : > { %v6009_v61 = vpop.eup %6008  ;;  %3305 = vrot.lane.b32.xlu1 %v6007_v35, %s6432_s15 }
 0xb7d   : > { %3303 = vrot.lane.b32.xlu0 %v6009_v61, %s6432_s15 }
 0xb7e   : > { %v5335_v42 = vpop.f32.mrb[60].mxu0 }
 0xb7f   : > { %v8146_v34 = vadd.f32 %v5335_v42, %v1377_v25  ;;  %v3116_v20 = vpop.f32.mrb[61].mxu0  ;;  %v9039_v42 = vld [vmem:[#allocation35_spill] sm:$0xff] }
 0xb80   : > { %v8148_v1 = vadd.f32 %v3116_v20, %v1371_v40  ;;  %v1425_v40 = vadd.f32 %v9038_v23, %v8118_v31  ;;  %v1419_v20 = vadd.f32 %v9039_v42, %v8118_v31 }
 0xb81   : > { %6014 = vtanh.f32 %v8146_v34 }
 0xb82   : > { %6016 = vtanh.f32 %v8148_v1 }
 0xb83   : > { %v6011_v19 = vpop.eup %6010 }
 0xb84   : > { %v6013_v62 = vpop.eup %6012  ;;  %3309 = vrot.lane.b32.xlu1 %v6011_v19, %s6432_s15 }
 0xb85   : > { %3307 = vrot.lane.b32.xlu0 %v6013_v62, %s6432_s15 }
 0xb86   : > { %v5338_v4 = vpop.f32.mrb[62].mxu0 }
 0xb87   : > { %v8158_v52 = vadd.f32 %v5338_v4, %v1389_v13  ;;  %v3126_v41 = vpop.f32.mrb[63].mxu0  ;;  %v9040_v4 = vld [vmem:[#allocation41_spill] sm:$0xff] }
 0xb88   : > { %v8160_v55 = vadd.f32 %v3126_v41, %v1383_v18  ;;  %v1437_v41 = vadd.f32 %v9040_v4, %v8118_v31 }
 0xb89   : > { %6018 = vtanh.f32 %v8158_v52 }
 0xb8a   : > { %6020 = vtanh.f32 %v8160_v55 }
 0xb8b   : > { %v6015_v56 = vpop.eup %6014 }
 0xb8c   : > { %v6017_v11 = vpop.eup %6016  ;;  %3313 = vrot.lane.b32.xlu1 %v6015_v56, %s6432_s15  ;;  %v9041_v56 = vld [vmem:[#allocation39_spill] sm:$0xff] }
 0xb8d   : > { %3311 = vrot.lane.b32.xlu0 %v6017_v11, %s6432_s15  ;;  %v1431_v11 = vadd.f32 %v9041_v56, %v8118_v31  ;;  %v3192_v31 = vmul.f32 0.5, %v8124_v15 }
 0xb8e   : > { %v5341_v32 = vpop.f32.mrb[64].mxu0 }
 0xb8f   : > { %v8170_v60 = vadd.f32 %v5341_v32, %v1401_v58  ;;  %v3136_v12 = vpop.f32.mrb[65].mxu0 }
 0xb90   : > { %v8172_v46 = vadd.f32 %v3136_v12, %v1395_v36 }
 0xb91   : > { %6022 = vtanh.f32 %v8170_v60 }
 0xb92   : > { %6024 = vtanh.f32 %v8172_v46 }
 0xb93   : > { %v6019_v9 = vpop.eup %6018 }
 0xb94   : > { %v6021_v37 = vpop.eup %6020  ;;  %3317 = vrot.lane.b32.xlu1 %v6019_v9, %s6432_s15 }
 0xb95   : > { %3315 = vrot.lane.b32.xlu0 %v6021_v37, %s6432_s15 }
 0xb96   : > { %v5344_v0 = vpop.f32.mrb[66].mxu0 }
 0xb97   : > { %v8182_v6 = vadd.f32 %v5344_v0, %v1413_v45  ;;  %v3146_v35 = vpop.f32.mrb[67].mxu0  ;;  %v3194_v45 = vmul.f32 0.5, %v8134_v39 }
 0xb98   : > { %v8184_v61 = vadd.f32 %v3146_v35, %v1407_v28  ;;  %v3196_v35 = vmul.f32 0.5, %v8146_v34 }
 0xb99   : > { %6026 = vtanh.f32 %v8182_v6 }
 0xb9a   : > { %6028 = vtanh.f32 %v8184_v61 }
 0xb9b   : > { %v6023_v33 = vpop.eup %6022 }
 0xb9c   : > { %v6025_v25 = vpop.eup %6024  ;;  %3321 = vrot.lane.b32.xlu1 %v6023_v33, %s6432_s15  ;;  %v3195_v33 = vmul.f32 0.5, %v8148_v1  ;;  %v3197_v1 = vmul.f32 0.5, %v8160_v55  ;;  %v3200_v55 = vmul.f32 0.5, %v8170_v60 }
 0xb9d   : > { %3319 = vrot.lane.b32.xlu0 %v6025_v25, %s6432_s15 }
 0xb9e   : > { %v5347_v19 = vpop.f32.mrb[68].mxu0 }
 0xb9f   : > { %v8194_v62 = vadd.f32 %v5347_v19, %v1425_v40  ;;  %v3156_v54 = vpop.f32.mrb[69].mxu0  ;;  %v3198_v19 = vmul.f32 0.5, %v8158_v52 }
 0xba0   : > { %v8196_v13 = vadd.f32 %v3156_v54, %v1419_v20 }
 0xba1   : > { %6030 = vtanh.f32 %v8194_v62 }
 0xba2   : > { %6032 = vtanh.f32 %v8196_v13 }
 0xba3   : > { %v6027_v10 = vpop.eup %6026 }
 0xba4   : > { %v6029_v18 = vpop.eup %6028  ;;  %3325 = vrot.lane.b32.xlu1 %v6027_v10, %s6432_s15 }
 0xba5   : > { %3323 = vrot.lane.b32.xlu0 %v6029_v18, %s6432_s15 }
 0xba6   : > { %v5350_v29 = vpop.f32.mrb[70].mxu0 }
 0xba7   : > { %v8206_v58 = vadd.f32 %v5350_v29, %v1437_v41  ;;  %v3166_v27 = vpop.f32.mrb[71].mxu0 }
 0xba8   : > { %v8208_v36 = vadd.f32 %v3166_v27, %v1431_v11 }
 0xba9   : > { %6034 = vtanh.f32 %v8206_v58 }
 0xbaa   : > { %6036 = vtanh.f32 %v8208_v36 }
 0xbab   : > { %v6031_v32 = vpop.eup %6030  ;;  %6038 = vtanh.f32 %v3192_v31 }
 0xbac   : > { %v6033_v12 = vpop.eup %6032  ;;  %3329 = vrot.lane.b32.xlu1 %v6031_v32, %s6432_s15  ;;  %6040 = vtanh.f32 %v3191_v14  ;;  %v3199_v32 = vmul.f32 0.5, %v8172_v46  ;;  %v3202_v46 = vmul.f32 0.5, %v8182_v6 }
 0xbad   : > { %3327 = vrot.lane.b32.xlu0 %v6033_v12, %s6432_s15  ;;  %6042 = vtanh.f32 %v3194_v45 }
 0xbae   : > { %6044 = vtanh.f32 %v3193_v26 }
 0xbaf   : > { %6046 = vtanh.f32 %v3196_v35  ;;  %v3201_v35 = vmul.f32 0.5, %v8184_v61  ;;  %v3204_v61 = vmul.f32 0.5, %v8194_v62 }
 0xbb0   : > { %6048 = vtanh.f32 %v3195_v33 }
 0xbb1   : > { %6050 = vtanh.f32 %v3198_v19 }
 0xbb2   : > { %6052 = vtanh.f32 %v3197_v1 }
 0xbb3   : > { %v6035_v9 = vpop.eup %6034  ;;  %6054 = vtanh.f32 %v3200_v55 }
 0xbb4   : > { %v6037_v37 = vpop.eup %6036  ;;  %3333 = vrot.lane.b32.xlu1 %v6035_v9, %s6432_s15  ;;  %6056 = vtanh.f32 %v3199_v32 }
 0xbb5   : > { %3331 = vrot.lane.b32.xlu0 %v6037_v37, %s6432_s15  ;;  %v6039_v28 = vpop.eup %6038  ;;  %6058 = vtanh.f32 %v3202_v46 }
 0xbb6   : > { %v6041_v0 = vpop.eup %6040  ;;  %v3224_v25 = vmul.f32 0.5, %v6039_v28  ;;  %6060 = vtanh.f32 %v3201_v35 }
 0xbb7   : > { %v3223_v23 = vmul.f32 0.5, %v6041_v0  ;;  %v6043_v24 = vpop.eup %6042  ;;  %6062 = vtanh.f32 %v3204_v61 }
 0xbb8   : > { %v8222_v15 = vadd.f32 0.5, %v3224_v25  ;;  %v6045_v39 = vpop.eup %6044  ;;  %v3226_v54 = vmul.f32 0.5, %v6043_v24 }
 0xbb9   : > { %v8224_v42 = vadd.f32 0.5, %v3223_v23  ;;  %v3225_v10 = vmul.f32 0.5, %v6045_v39  ;;  %v6047_v4 = vpop.eup %6046 }
 0xbba   : > { %v8232_v18 = vadd.f32 0.5, %v3226_v54  ;;  %v6049_v11 = vpop.eup %6048  ;;  %v3228_v12 = vmul.f32 0.5, %v6047_v4 }
 0xbbb   : > { %v8234_v56 = vadd.f32 0.5, %v3225_v10  ;;  %v3227_v9 = vmul.f32 0.5, %v6049_v11  ;;  %v6051_v31 = vpop.eup %6050 }
 0xbbc   : > { %v8242_v37 = vadd.f32 0.5, %v3228_v12  ;;  %v6053_v26 = vpop.eup %6052  ;;  %v3230_v33 = vmul.f32 0.5, %v6051_v31 }
 0xbbd   : > { %v8244_v45 = vadd.f32 0.5, %v3227_v9  ;;  %v3229_v25 = vmul.f32 0.5, %v6053_v26  ;;  %v6055_v24 = vpop.eup %6054 }
 0xbbe   : > { %v8252_v23 = vadd.f32 0.5, %v3230_v33  ;;  %v3232_v1 = vmul.f32 0.5, %v6055_v24 }
 0xbbf   : > { %v8254_v39 = vadd.f32 0.5, %v3229_v25 }
 0xbc0   : > { %v8262_v10 = vadd.f32 0.5, %v3232_v1 }
 0xbee   : > { %v3306_v40 = vpop.permute.xlu1 %3305 }
 0xbef   : > { %v3352_v3 = vmul.f32 %v3306_v40, %v8222_v15  ;;  %v3304_v20 = vpop.permute.xlu0 %3303 }
 0xbf0   : > { %v3351_v34 = vmul.f32 %v3304_v20, %v8224_v42 }
 0xbf1   : > { %3385 = vrot.lane.b32.xlu1 %v3352_v3, %s6435_s26  ;;  %v6057_v3 = vpop.eup %6056 }
 0xbf2   : > { %3383 = vrot.lane.b32.xlu0 %v3351_v34, %s6435_s26  ;;  %v3203_v34 = vmul.f32 0.5, %v8196_v13  ;;  %v3231_v54 = vmul.f32 0.5, %v6057_v3  ;;  %v6059_v4 = vpop.eup %6058  ;;  %v3206_v13 = vmul.f32 0.5, %v8206_v58 }
 0xbf3   : > { %v3234_v32 = vmul.f32 0.5, %v6059_v4 }
 0xbf4   : > { %6064 = vtanh.f32 %v3203_v34  ;;  %v8264_v11 = vadd.f32 0.5, %v3231_v54 }
 0xbf5   : > { %6066 = vtanh.f32 %v3206_v13  ;;  %v8272_v9 = vadd.f32 0.5, %v3234_v32  ;;  %v3271_v13 = vmul.f32 %v8224_v42, %v7975_v44 }
 0xbf6   : > { %v3310_v41 = vpop.permute.xlu1 %3309 }
 0xbf7   : > { %v3354_v52 = vmul.f32 %v3310_v41, %v8232_v18  ;;  %v3308_v29 = vpop.permute.xlu0 %3307 }
 0xbf8   : > { %v3353_v27 = vmul.f32 %v3308_v29, %v8234_v56 }
 0xbf9   : > { %3389 = vrot.lane.b32.xlu1 %v3354_v52, %s6435_s26  ;;  %v6061_v52 = vpop.eup %6060 }
 0xbfa   : > { %3387 = vrot.lane.b32.xlu0 %v3353_v27, %s6435_s26  ;;  %v3205_v27 = vmul.f32 0.5, %v8208_v36  ;;  %v3233_v12 = vmul.f32 0.5, %v6061_v52  ;;  %v6063_v31 = vpop.eup %6062 }
 0xbfb   : > { %v3236_v46 = vmul.f32 0.5, %v6063_v31 }
 0xbfc   : > { %6068 = vtanh.f32 %v3205_v27  ;;  %v8274_v26 = vadd.f32 0.5, %v3233_v12  ;;  %v3274_v12 = vmul.f32 %v8232_v18, %v7983_v38  ;;  %v3276_v38 = vmul.f32 %v8242_v37, %v7995_v17 }
 0xbfd   : > { %v8280_v35 = vadd.f32 0.5, %v3236_v46  ;;  %v3278_v17 = vmul.f32 %v8252_v23, %v8007_v30  ;;  %v3280_v30 = vmul.f32 %v8262_v10, %v8019_v21  ;;  %v3282_v21 = vmul.f32 %v8272_v9, %v8031_v5 }
 0xbfe   : > { %v3314_v14 = vpop.permute.xlu1 %3313 }
 0xbff   : > { %v3356_v60 = vmul.f32 %v3314_v14, %v8242_v37  ;;  %v3312_v28 = vpop.permute.xlu0 %3311  ;;  %v3284_v5 = vmul.f32 %v8280_v35, %v8043_v63 }
 0xc00   : > { %v3355_v0 = vmul.f32 %v3312_v28, %v8244_v45 }
 0xc01   : > { %3393 = vrot.lane.b32.xlu1 %v3356_v60, %s6435_s26  ;;  %v6065_v60 = vpop.eup %6064 }
 0xc02   : > { %3391 = vrot.lane.b32.xlu0 %v3355_v0, %s6435_s26  ;;  %v3235_v0 = vmul.f32 0.5, %v6065_v60  ;;  %v6067_v33 = vpop.eup %6066 }
 0xc03   : > { %v3238_v61 = vmul.f32 0.5, %v6067_v33 }
 0xc04   : > { %v8282_v24 = vadd.f32 0.5, %v3235_v0 }
 0xc05   : > { %v8288_v34 = vadd.f32 0.5, %v3238_v61 }
 0xc06   : > { %v3318_v40 = vpop.permute.xlu1 %3317 }
 0xc07   : > { %v3358_v6 = vmul.f32 %v3318_v40, %v8252_v23  ;;  %v3316_v20 = vpop.permute.xlu0 %3315  ;;  %v6069_v40 = vpop.eup %6068  ;;  %v3286_v63 = vmul.f32 %v8288_v34, %v8055_v49  ;;  %v3634_v49 = vld [vmem:[#allocation7 + $0x58] sm:$0xff] }
 0xc08   : > { %v3357_v19 = vmul.f32 %v3316_v20, %v8254_v39 }
 0xc09   : > { %3397 = vrot.lane.b32.xlu1 %v3358_v6, %s6435_s26 }
 0xc0a   : > { %3395 = vrot.lane.b32.xlu0 %v3357_v19, %s6435_s26  ;;  %v3237_v19 = vmul.f32 0.5, %v6069_v40 }
 0xc0c   : > { %v8290_v54 = vadd.f32 0.5, %v3237_v19 }
 0xc0e   : > { %v3322_v41 = vpop.permute.xlu1 %3321 }
 0xc0f   : > { %v3360_v62 = vmul.f32 %v3322_v41, %v8262_v10  ;;  %v3320_v29 = vpop.permute.xlu0 %3319 }
 0xc10   : > { %v3359_v55 = vmul.f32 %v3320_v29, %v8264_v11 }
 0xc11   : > { %3401 = vrot.lane.b32.xlu1 %v3360_v62, %s6435_s26  ;;  %v3272_v62 = vmul.f32 %v8222_v15, %v7973_v50  ;;  %v3273_v50 = vmul.f32 %v8234_v56, %v7985_v8  ;;  %v3275_v8 = vmul.f32 %v8244_v45, %v7997_v57  ;;  %v3277_v57 = vmul.f32 %v8254_v39, %v8009_v43 }
 0xc12   : > { %3399 = vrot.lane.b32.xlu0 %v3359_v55, %s6435_s26  ;;  %v3279_v43 = vmul.f32 %v8264_v11, %v8021_v47  ;;  %v3281_v47 = vmul.f32 %v8274_v26, %v8033_v59  ;;  %v3283_v59 = vmul.f32 %v8282_v24, %v8045_v53  ;;  %v3285_v53 = vmul.f32 %v8290_v54, %v8057_v22 }
 0xc16   : > { %v3326_v14 = vpop.permute.xlu1 %3325 }
 0xc17   : > { %v3362_v58 = vmul.f32 %v3326_v14, %v8272_v9  ;;  %v3324_v28 = vpop.permute.xlu0 %3323 }
 0xc18   : > { %v3361_v36 = vmul.f32 %v3324_v28, %v8274_v26 }
 0xc19   : > { %3405 = vrot.lane.b32.xlu1 %v3362_v58, %s6435_s26 }
 0xc1a   : > { %3403 = vrot.lane.b32.xlu0 %v3361_v36, %s6435_s26 }
 0xc1e   : > { %v3330_v25 = vpop.permute.xlu1 %3329 }
 0xc1f   : > { %v3364_v3 = vmul.f32 %v3330_v25, %v8280_v35  ;;  %v3328_v6 = vpop.permute.xlu0 %3327 }
 0xc20   : > { %v3363_v20 = vmul.f32 %v3328_v6, %v8282_v24 }
 0xc21   : > { %3409 = vrot.lane.b32.xlu1 %v3364_v3, %s6435_s26 }
 0xc22   : > { %3407 = vrot.lane.b32.xlu0 %v3363_v20, %s6435_s26 }
 0xc26   : > { %v3334_v1 = vpop.permute.xlu1 %3333 }
 0xc27   : > { %v3366_v4 = vmul.f32 %v3334_v1, %v8288_v34  ;;  %v3332_v41 = vpop.permute.xlu0 %3331 }
 0xc28   : > { %v3365_v52 = vmul.f32 %v3332_v41, %v8290_v54 }
 0xc29   : > { %3413 = vrot.lane.b32.xlu1 %v3366_v4, %s6435_s26 }
 0xc2a   : > { %3411 = vrot.lane.b32.xlu0 %v3365_v52, %s6435_s26 }
 0xc63   : > { %v3386_v29 = vpop.permute.xlu1 %3385 }
 0xc64   : > { %v8300_v55 = vadd.f32 %v3386_v29, %v3272_v62  ;;  %v3384_v27 = vpop.permute.xlu0 %3383 }
 0xc65   : > { %v8302_v32 = vadd.f32 %v3384_v27, %v3271_v13 }
 0xc66   : > { %6070 = vtanh.f32 %v8300_v55 }
 0xc67   : > { %6072 = vtanh.f32 %v8302_v32 }
 0xc6b   : > { %v3390_v31 = vpop.permute.xlu1 %3389 }
 0xc6c   : > { %v8310_v14 = vadd.f32 %v3390_v31, %v3274_v12  ;;  %v3388_v60 = vpop.permute.xlu0 %3387 }
 0xc6d   : > { %v8312_v44 = vadd.f32 %v3388_v60, %v3273_v50 }
 0xc6e   : > { %6074 = vtanh.f32 %v8310_v14 }
 0xc6f   : > { %6076 = vtanh.f32 %v8312_v44 }
 0xc70   : > { %v6071_v58 = vpop.eup %6070 }
 0xc71   : > { %v6073_v28 = vpop.eup %6072  ;;  %3481 = vrot.lane.b32.xlu1 %v6071_v58, %s6432_s15 }
 0xc72   : > { %3479 = vrot.lane.b32.xlu0 %v6073_v28, %s6432_s15 }
 0xc73   : > { %v3394_v36 = vpop.permute.xlu1 %3393 }
 0xc74   : > { %v8322_v46 = vadd.f32 %v3394_v36, %v3276_v38  ;;  %v3392_v0 = vpop.permute.xlu0 %3391 }
 0xc75   : > { %v8324_v33 = vadd.f32 %v3392_v0, %v3275_v8 }
 0xc76   : > { %6078 = vtanh.f32 %v8322_v46 }
 0xc77   : > { %6080 = vtanh.f32 %v8324_v33 }
 0xc78   : > { %v6075_v25 = vpop.eup %6074 }
 0xc79   : > { %v6077_v40 = vpop.eup %6076  ;;  %3485 = vrot.lane.b32.xlu1 %v6075_v25, %s6432_s15 }
 0xc7a   : > { %3483 = vrot.lane.b32.xlu0 %v6077_v40, %s6432_s15 }
 0xc7b   : > { %v3398_v3 = vpop.permute.xlu1 %3397 }
 0xc7c   : > { %v8334_v6 = vadd.f32 %v3398_v3, %v3278_v17  ;;  %v3396_v20 = vpop.permute.xlu0 %3395 }
 0xc7d   : > { %v8336_v61 = vadd.f32 %v3396_v20, %v3277_v57  ;;  %v3624_v20 = vld [vmem:[#allocation7 + $0x8] sm:$0xff] }
 0xc7e   : > { %6082 = vtanh.f32 %v8334_v6 }
 0xc7f   : > { %6084 = vtanh.f32 %v8336_v61 }
 0xc80   : > { %v6079_v19 = vpop.eup %6078 }
 0xc81   : > { %v6081_v1 = vpop.eup %6080  ;;  %3489 = vrot.lane.b32.xlu1 %v6079_v19, %s6432_s15  ;;  %v3629_v19 = vld [vmem:[#allocation7 + $0x30] sm:$0xff] }
 0xc82   : > { %3487 = vrot.lane.b32.xlu0 %v6081_v1, %s6432_s15  ;;  %v3623_v1 = vld [vmem:[#allocation7] sm:$0xff] }
 0xc83   : > { %v3402_v4 = vpop.permute.xlu1 %3401 }
 0xc84   : > { %v8346_v41 = vadd.f32 %v3402_v4, %v3280_v30  ;;  %v3400_v52 = vpop.permute.xlu0 %3399  ;;  %v5567_v4 = vpack.c.bf16 %v3629_v19, %v3624_v20  ;;  %v3635_v19 = vld [vmem:[#allocation7 + $0x60] sm:$0xff] }
 0xc85   : > { %v8348_v62 = vadd.f32 %v3400_v52, %v3279_v43  ;;  %v3628_v43 = vld [vmem:[#allocation7 + $0x28] sm:$0xff]  ;;  %v3639_v52 = vld [vmem:[#allocation7 + $0x80] sm:$0xff] }
 0xc86   : > { %6086 = vtanh.f32 %v8346_v41  ;;  %v5569_v22 = vpack.c.bf16 %v3628_v43, %v3623_v1  ;;  %5568 = vmatprep.subr.bf16.mxu1 %v5567_v4  ;;  %v3640_v1 = vld [vmem:[#allocation7 + $0x88] sm:$0xff]  ;;  %v3659_v4 = vld [vmem:[#allocation7 + $0x120] sm:$0xff] }
 0xc87   : > { %6088 = vtanh.f32 %v8348_v62 }
 0xc88   : > { %v6083_v29 = vpop.eup %6082  ;;  %5570 = vmatpush1.bf16.msra.mxu1 %v5569_v22  ;;  %v3651_v22 = vld [vmem:[#allocation7 + $0xe0] sm:$0xff] }
 0xc89   : > { %v6085_v13 = vpop.eup %6084  ;;  %3493 = vrot.lane.b32.xlu1 %v6083_v29, %s6432_s15 }
 0xc8a   : > { %3491 = vrot.lane.b32.xlu0 %v6085_v13, %s6432_s15  ;;  %v5571_v13 = vpack.c.bf16 %v3639_v52, %v3634_v49  ;;  %v5589_v49 = vpack.c.bf16 %v3640_v1, %v3635_v19  ;;  %v3653_v52 = vld [vmem:[#allocation7 + $0xf0] sm:$0xff] }
 0xc8b   : > { %v3406_v27 = vpop.permute.xlu1 %3405 }
 0xc8c   : > { %v8358_v12 = vadd.f32 %v3406_v27, %v3282_v21  ;;  %v3404_v31 = vpop.permute.xlu0 %3403  ;;  %v3633_v21 = vld [vmem:[#allocation7 + $0x50] sm:$0xff]  ;;  %v3638_v27 = vld [vmem:[#allocation7 + $0x78] sm:$0xff]  ;;  %5572 = vmatprep.subr.bf16.mxu1 %v5571_v13 }
 0xc8d   : > { %v8360_v50 = vadd.f32 %v3404_v31, %v3281_v47  ;;  %v3644_v47 = vld [vmem:[#allocation7 + $0xa8] sm:$0xff]  ;;  %v3649_v31 = vld [vmem:[#allocation7 + $0xd0] sm:$0xff] }
 0xc8e   : > { %6090 = vtanh.f32 %v8358_v12 }
 0xc8f   : > { %6092 = vtanh.f32 %v8360_v50 }
 0xc90   : > { %v6087_v60 = vpop.eup %6086 }
 0xc91   : > { %v6089_v58 = vpop.eup %6088  ;;  %3497 = vrot.lane.b32.xlu1 %v6087_v60, %s6432_s15  ;;  %v3643_v60 = vld [vmem:[#allocation7 + $0xa0] sm:$0xff] }
 0xc92   : > { %3495 = vrot.lane.b32.xlu0 %v6089_v58, %s6432_s15  ;;  %v3648_v58 = vld [vmem:[#allocation7 + $0xc8] sm:$0xff] }
 0xc93   : > { %v3410_v28 = vpop.permute.xlu1 %3409  ;;  %v5577_v43 = vpack.c.bf16 %v3648_v58, %v3643_v60 }
 0xc94   : > { %v8370_v38 = vadd.f32 %v3410_v28, %v3284_v5  ;;  %v3408_v36 = vpop.permute.xlu0 %3407  ;;  %v5573_v5 = vpack.c.bf16 %v3638_v27, %v3633_v21  ;;  %v3626_v28 = vld [vmem:[#allocation7 + $0x18] sm:$0xff] }
 0xc95   : > { %v8372_v8 = vadd.f32 %v3408_v36, %v3283_v59  ;;  %v3631_v59 = vld [vmem:[#allocation7 + $0x40] sm:$0xff]  ;;  %v3625_v36 = vld [vmem:[#allocation7 + $0x10] sm:$0xff]  ;;  %v3658_v27 = vld [vmem:[#allocation7 + $0x118] sm:$0xff] }
 0xc96   : > { %6094 = vtanh.f32 %v8370_v38  ;;  %5574 = vmatpush1.bf16.msra.mxu1 %v5573_v5  ;;  %v5581_v60 = vpack.c.bf16 %v3658_v27, %v3653_v52 }
 0xc97   : > { %6096 = vtanh.f32 %v8372_v8 }
 0xc98   : > { %v6091_v0 = vpop.eup %6090 }
 0xc99   : > { %v6093_v25 = vpop.eup %6092  ;;  %3501 = vrot.lane.b32.xlu1 %v6091_v0, %s6432_s15  ;;  %v5575_v0 = vpack.c.bf16 %v3649_v31, %v3644_v47  ;;  %v3645_v31 = vld [vmem:[#allocation7 + $0xb0] sm:$0xff] }
 0xc9a   : > { %3499 = vrot.lane.b32.xlu0 %v6093_v25, %s6432_s15  ;;  %v5583_v25 = vpack.c.bf16 %v3631_v59, %v3626_v28  ;;  %v3650_v28 = vld [vmem:[#allocation7 + $0xd8] sm:$0xff] }
 0xc9b   : > { %v3414_v40 = vpop.permute.xlu1 %3413  ;;  %5576 = vmatprep.subr.bf16.mxu1 %v5575_v0  ;;  %v5593_v58 = vpack.c.bf16 %v3650_v28, %v3645_v31  ;;  %v3655_v0 = vld [vmem:[#allocation7 + $0x100] sm:$0xff] }
 0xc9c   : > { %v8382_v17 = vadd.f32 %v3414_v40, %v3286_v63  ;;  %v3412_v3 = vpop.permute.xlu0 %3411  ;;  %v3630_v63 = vld [vmem:[#allocation7 + $0x38] sm:$0xff]  ;;  %v3636_v40 = vld [vmem:[#allocation7 + $0x68] sm:$0xff]  ;;  %5584 = vmatprep.subr.bf16.mxu0 %v5583_v25  ;;  %v3661_v25 = vld [vmem:[#allocation7 + $0x130] sm:$0xff]  ;;  %5578 = vmatpush1.bf16.msra.mxu1 %v5577_v43 }
 0xc9d   : > { %v8384_v57 = vadd.f32 %v3412_v3, %v3285_v53  ;;  %v3641_v53 = vld [vmem:[#allocation7 + $0x90] sm:$0xff]  ;;  %v5585_v3 = vpack.c.bf16 %v3630_v63, %v3625_v36  ;;  %v3656_v36 = vld [vmem:[#allocation7 + $0x108] sm:$0xff] }
 0xc9e   : > { %6098 = vtanh.f32 %v8382_v17  ;;  %v5587_v20 = vpack.c.bf16 %v3641_v53, %v3636_v40  ;;  %v5595_v5 = vpack.c.bf16 %v3661_v25, %v3656_v36  ;;  %v3660_v63 = vld [vmem:[#allocation7 + $0x128] sm:$0xff]  ;;  %v3627_v53 = vld [vmem:[#allocation7 + $0x20] sm:$0xff] }
 0xc9f   : > { %6100 = vtanh.f32 %v8384_v57  ;;  %5586 = vmatpush1.bf16.msra.mxu0 %v5585_v3  ;;  %v5597_v40 = vpack.c.bf16 %v3660_v63, %v3655_v0  ;;  %v3632_v3 = vld [vmem:[#allocation7 + $0x48] sm:$0xff]  ;;  %v3642_v0 = vld [vmem:[#allocation7 + $0x98] sm:$0xff] }
 0xca0   : > { %v6095_v30 = vpop.eup %6094  ;;  %5588 = vmatprep.subr.bf16.mxu0 %v5587_v20  ;;  %v5599_v20 = vpack.c.bf16 %v3632_v3, %v3627_v53  ;;  %v3657_v3 = vld [vmem:[#allocation7 + $0x110] sm:$0xff] }
 0xca1   : > { %v6097_v29 = vpop.eup %6096  ;;  %3505 = vrot.lane.b32.xlu1 %v6095_v30, %s6432_s15  ;;  %v3654_v30 = vld [vmem:[#allocation7 + $0xf8] sm:$0xff] }
 0xca2   : > { %3503 = vrot.lane.b32.xlu0 %v6097_v29, %s6432_s15  ;;  %v3646_v29 = vld [vmem:[#allocation7 + $0xb8] sm:$0xff]  ;;  %v5579_v21 = vpack.c.bf16 %v3659_v4, %v3654_v30 }
 0xca3   : > { %v5591_v47 = vpack.c.bf16 %v3651_v22, %v3646_v29  ;;  %5590 = vmatpush1.bf16.msra.mxu0 %v5589_v49 }
 0xca4   : > { %5580 = vmatprep.subr.bf16.mxu1 %v5579_v21 }
 0xca5   : > { %5592 = vmatprep.subr.bf16.mxu0 %v5591_v47  ;;  %5582 = vmatpush1.bf16.msra.mxu1 %v5581_v60 }
 0xca6   : > { %5600 = vmatprep.subr.bf16.mxu1 %v5599_v20 }
 0xca7   : > { %5594 = vmatpush1.bf16.msra.mxu0 %v5593_v58 }
 0xca8   : > { %v6099_v13 = vpop.eup %6098  ;;  %5596 = vmatprep.subr.bf16.mxu0 %v5595_v5  ;;  %v3637_v5 = vld [vmem:[#allocation7 + $0x70] sm:$0xff] }
 0xca9   : > { %v6101_v59 = vpop.eup %6100  ;;  %3509 = vrot.lane.b32.xlu1 %v6099_v13, %s6432_s15  ;;  %v5603_v63 = vpack.c.bf16 %v3642_v0, %v3637_v5  ;;  %v4565_v5 = vld [vmem:[%s8959_s10 + $0x68] sm:$0xff]  ;;  %v4566_v0 = vld [vmem:[%s8959_s10 + $0x70] sm:$0xff] }
 0xcaa   : > { %3507 = vrot.lane.b32.xlu0 %v6101_v59, %s6432_s15 }
 0xcab   : > { %5598 = vmatpush1.bf16.msra.mxu0 %v5597_v40 }
 0xce3   : > { %v3482_v19 = vpop.permute.xlu1 %3481 }
 0xce4   : > { %v3528_v1 = vmul.f32 %v3482_v19, %v8222_v15  ;;  %v3480_v30 = vpop.permute.xlu0 %3479  ;;  %v3662_v19 = vld [vmem:[#allocation7 + $0x138] sm:$0xff] }
 0xce5   : > { %v3527_v4 = vmul.f32 %v3480_v30, %v8224_v42 }
 0xce6   : > { %3561 = vrot.lane.b32.xlu1 %v3528_v1, %s6435_s26 }
 0xce7   : > { %3559 = vrot.lane.b32.xlu0 %v3527_v4, %s6435_s26 }
 0xceb   : > { %v3486_v43 = vpop.permute.xlu1 %3485 }
 0xcec   : > { %v3530_v49 = vmul.f32 %v3486_v43, %v8232_v18  ;;  %v3484_v52 = vpop.permute.xlu0 %3483 }
 0xced   : > { %v3529_v29 = vmul.f32 %v3484_v52, %v8234_v56 }
 0xcee   : > { %3565 = vrot.lane.b32.xlu1 %v3530_v49, %s6435_s26 }
 0xcef   : > { %3563 = vrot.lane.b32.xlu0 %v3529_v29, %s6435_s26 }
 0xcf3   : > { %v3490_v22 = vpop.permute.xlu1 %3489 }
 0xcf4   : > { %v3532_v15 = vmul.f32 %v3490_v22, %v8242_v37  ;;  %v3488_v13 = vpop.permute.xlu0 %3487 }
 0xcf5   : > { %v3531_v42 = vmul.f32 %v3488_v13, %v8244_v45 }
 0xcf6   : > { %3569 = vrot.lane.b32.xlu1 %v3532_v15, %s6435_s26 }
 0xcf7   : > { %3567 = vrot.lane.b32.xlu0 %v3531_v42, %s6435_s26 }
 0xcfb   : > { %v3494_v21 = vpop.permute.xlu1 %3493 }
 0xcfc   : > { %v3534_v18 = vmul.f32 %v3494_v21, %v8252_v23  ;;  %v3492_v27 = vpop.permute.xlu0 %3491 }
 0xcfd   : > { %v3533_v56 = vmul.f32 %v3492_v27, %v8254_v39 }
 0xcfe   : > { %3573 = vrot.lane.b32.xlu1 %v3534_v18, %s6435_s26 }
 0xcff   : > { %3571 = vrot.lane.b32.xlu0 %v3533_v56, %s6435_s26 }
 0xd03   : > { %v3498_v47 = vpop.permute.xlu1 %3497 }
 0xd04   : > { %v3536_v37 = vmul.f32 %v3498_v47, %v8262_v10  ;;  %v3496_v31 = vpop.permute.xlu0 %3495  ;;  %v4554_v47 = vld [vmem:[%s8959_s10 + $0x10] sm:$0xff] }
 0xd05   : > { %v3535_v45 = vmul.f32 %v3496_v31, %v8264_v11 }
 0xd06   : > { %3577 = vrot.lane.b32.xlu1 %v3536_v37, %s6435_s26  ;;  %v4555_v37 = vld [vmem:[%s8959_s10 + $0x18] sm:$0xff] }
 0xd07   : > { %3575 = vrot.lane.b32.xlu0 %v3535_v45, %s6435_s26  ;;  %v5619_v31 = vpack.c.bf16 %v4555_v37, %v4554_v47  ;;  %v4556_v45 = vld [vmem:[%s8959_s10 + $0x20] sm:$0xff] }
 0xd0b   : > { %v3502_v28 = vpop.permute.xlu1 %3501 }
 0xd0c   : > { %v3538_v23 = vmul.f32 %v3502_v28, %v8272_v9  ;;  %v3500_v59 = vpop.permute.xlu0 %3499  ;;  %v4557_v28 = vld [vmem:[%s8959_s10 + $0x28] sm:$0xff] }
 0xd0d   : > { %v3537_v39 = vmul.f32 %v3500_v59, %v8274_v26  ;;  %v4558_v59 = vld [vmem:[%s8959_s10 + $0x30] sm:$0xff] }
 0xd0e   : > { %3581 = vrot.lane.b32.xlu1 %v3538_v23, %s6435_s26  ;;  %v5623_v23 = vpack.c.bf16 %v4557_v28, %v4556_v45 }
 0xd0f   : > { %3579 = vrot.lane.b32.xlu0 %v3537_v39, %s6435_s26  ;;  %v4559_v39 = vld [vmem:[%s8959_s10 + $0x38] sm:$0xff] }
 0xd13   : > { %v3506_v36 = vpop.permute.xlu1 %3505 }
 0xd14   : > { %v3540_v10 = vmul.f32 %v3506_v36, %v8280_v35  ;;  %v3504_v25 = vpop.permute.xlu0 %3503  ;;  %v5627_v36 = vpack.c.bf16 %v4559_v39, %v4558_v59 }
 0xd15   : > { %v3539_v11 = vmul.f32 %v3504_v25, %v8282_v24  ;;  %v4561_v25 = vld [vmem:[%s8959_s10 + $0x48] sm:$0xff] }
 0xd16   : > { %3585 = vrot.lane.b32.xlu1 %v3540_v10, %s6435_s26  ;;  %v4560_v10 = vld [vmem:[%s8959_s10 + $0x40] sm:$0xff] }
 0xd17   : > { %3583 = vrot.lane.b32.xlu0 %v3539_v11, %s6435_s26  ;;  %v5631_v11 = vpack.c.bf16 %v4561_v25, %v4560_v10 }
 0xd1b   : > { %v3510_v60 = vpop.permute.xlu1 %3509 }
 0xd1c   : > { %v3542_v9 = vmul.f32 %v3510_v60, %v8288_v34  ;;  %v3508_v58 = vpop.permute.xlu0 %3507  ;;  %v3647_v34 = vld [vmem:[#allocation7 + $0xc0] sm:$0xff]  ;;  %v4562_v60 = vld [vmem:[%s8959_s10 + $0x50] sm:$0xff] }
 0xd1d   : > { %v3541_v26 = vmul.f32 %v3508_v58, %v8290_v54  ;;  %v3652_v54 = vld [vmem:[#allocation7 + $0xe8] sm:$0xff] }
 0xd1e   : > { %3589 = vrot.lane.b32.xlu1 %v3542_v9, %s6435_s26  ;;  %v4563_v9 = vld [vmem:[%s8959_s10 + $0x58] sm:$0xff] }
 0xd1f   : > { %3587 = vrot.lane.b32.xlu0 %v3541_v26, %s6435_s26  ;;  %v5635_v58 = vpack.c.bf16 %v4563_v9, %v4562_v60  ;;  %v4564_v26 = vld [vmem:[%s8959_s10 + $0x60] sm:$0xff] }
 0xd58   : > { %v3562_v40 = vpop.permute.xlu1 %3561 }
 0xd59   : > { %v3560_v35 = vpop.permute.xlu0 %3559  ;;  %v8436_v53 = vsel %vm1747_vm1, %v3562_v40, %v8300_v55  ;;  %v5611_v55 = vpack.c.bf16 %v3662_v19, %v3657_v3  ;;  %v4178_v40 = vld [vmem:[#allocation9] sm:$0xf] }
 0xd5a   : > { %v8426_v24 = vsel %vm1747_vm1, %v3560_v35, %v8302_v32  ;;  %v5607_v32 = vpack.c.bf16 %v3652_v54, %v3647_v34  ;;  %v5639_v35 = vpack.c.bf16 %v4565_v5, %v4564_v26  ;;  %v9042_v34 = vsub.s32 0, %v7048_v7 }
 0xd5b   : > { %4960 = vmatmul.mubr.msk.f32.vlgmr.msra.gmra.mrb[72].mxu1 %vm517_vm0, %v8426_v24  ;;  %4976 = vmatmul.mubr.msk.f32.vlgmr.msra.gmra.mrb[72].mxu0 %vm517_vm0, %v8426_v24  ;;  %v8631_v3 = vrot.slane %v4178_v40, %v1111_v2 }
 0xd5c   : > { %5602 = vmatpush3.bf16.msra.mxu1 %v5599_v20  ;;  %3781 = vmatprep.mubr.f32.mxu1 %v9012_v16  ;;  %v8619_v54 = vrot.slane %v4178_v40, %v9042_v34 }
 0xd5d   : > { %3942 = vmatprep.mubr.f32.mxu0 %v9012_v16  ;;  %5604 = vmatprep.subr.bf16.mxu1 %v5603_v63 }
 0xd5f   : > { %4961 = vmatmul.mubr.msk.f32.gmra.mrb[74].mxu1 %vm517_vm0, %v8436_v53  ;;  %4977 = vmatmul.mubr.msk.f32.gmra.mrb[74].mxu0 %vm517_vm0, %v8436_v53 }
 0xd60   : > { %3787 = vmatprep.mubr.f32.mxu1 %v9012_v16  ;;  %3948 = vmatprep.mubr.f32.mxu0 %v9012_v16  ;;  %v3566_v30 = vpop.permute.xlu1 %3565 }
 0xd61   : > { %v3564_v20 = vpop.permute.xlu0 %3563  ;;  %5606 = vmatpush3.bf16.msra.mxu1 %v5603_v63  ;;  %v8456_v4 = vsel %vm1747_vm1, %v3566_v30, %v8310_v14  ;;  %v4567_v63 = vld [vmem:[%s8959_s10 + $0x78] sm:$0xff] }
 0xd62   : > { %v8446_v1 = vsel %vm1747_vm1, %v3564_v20, %v8312_v44  ;;  %5608 = vmatprep.subr.bf16.mxu1 %v5607_v32 }
 0xd63   : > { %4962 = vmatmul.mubr.msk.f32.gmra.mrb[76].mxu1 %vm517_vm0, %v8446_v1  ;;  %4978 = vmatmul.mubr.msk.f32.gmra.mrb[76].mxu0 %vm517_vm0, %v8446_v1 }
 0xd64   : > { %3793 = vmatprep.mubr.f32.mxu1 %v9012_v16  ;;  %3954 = vmatprep.mubr.f32.mxu0 %v9012_v16 }
 0xd65   : > { %5610 = vmatpush3.bf16.msra.mxu1 %v5607_v32  ;;  %v8627_v32 = vrot.slane %v4178_v40, %v1103_v51 }
 0xd66   : > { %5612 = vmatprep.subr.bf16.mxu1 %v5611_v55 }
 0xd67   : > { %4963 = vmatmul.mubr.msk.f32.gmra.mrb[78].mxu1 %vm517_vm0, %v8456_v4  ;;  %4979 = vmatmul.mubr.msk.f32.gmra.mrb[78].mxu0 %vm517_vm0, %v8456_v4 }
 0xd68   : > { %3799 = vmatprep.mubr.f32.mxu1 %v9012_v16  ;;  %3960 = vmatprep.mubr.f32.mxu0 %v9012_v16  ;;  %v3570_v49 = vpop.permute.xlu1 %3569 }
 0xd69   : > { %v3568_v44 = vpop.permute.xlu0 %3567  ;;  %5614 = vmatpush3.bf16.msra.mxu1 %v5611_v55  ;;  %v8476_v14 = vsel %vm1747_vm1, %v3570_v49, %v8322_v46 }
 0xd6a   : > { %v8466_v43 = vsel %vm1747_vm1, %v3568_v44, %v8324_v33 }
 0xd6b   : > { %4964 = vmatmul.mubr.msk.f32.gmra.mrb[80].mxu1 %vm517_vm0, %v8466_v43  ;;  %4980 = vmatmul.mubr.msk.f32.gmra.mrb[80].mxu0 %vm517_vm0, %v8466_v43 }
 0xd6c   : > { %3805 = vmatprep.mubr.f32.mxu1 %v9012_v16  ;;  %3966 = vmatprep.mubr.f32.mxu0 %v9012_v16 }
 0xd6f   : > { %4965 = vmatmul.mubr.msk.f32.gmra.mrb[82].mxu1 %vm517_vm0, %v8476_v14  ;;  %4981 = vmatmul.mubr.msk.f32.gmra.mrb[82].mxu0 %vm517_vm0, %v8476_v14 }
 0xd70   : > { %3811 = vmatprep.mubr.f32.mxu1 %v9012_v16  ;;  %3972 = vmatprep.mubr.f32.mxu0 %v9012_v16  ;;  %v3574_v29 = vpop.permute.xlu1 %3573 }
 0xd71   : > { %v3572_v33 = vpop.permute.xlu0 %3571  ;;  %v3614_v46 = vsel %vm1747_vm1, %v3574_v29, %v8334_v6 }
 0xd72   : > { %v8486_v52 = vsel %vm1747_vm1, %v3572_v33, %v8336_v61 }
 0xd73   : > { %4966 = vmatmul.mubr.msk.f32.gmra.mrb[84].mxu1 %vm517_vm0, %v8486_v52  ;;  %4982 = vmatmul.mubr.msk.f32.gmra.mrb[84].mxu0 %vm517_vm0, %v8486_v52 }
 0xd74   : > { %3817 = vmatprep.mubr.f32.mxu1 %v9012_v16  ;;  %3978 = vmatprep.mubr.f32.mxu0 %v9012_v16 }
 0xd77   : > { %4967 = vmatmul.mubr.msk.f32.gmra.mrb[86].mxu1 %vm517_vm0, %v3614_v46  ;;  %4983 = vmatmul.mubr.msk.f32.gmra.mrb[86].mxu0 %vm517_vm0, %v3614_v46 }
 0xd78   : > { %3823 = vmatprep.mubr.f32.mxu1 %v9012_v16  ;;  %3984 = vmatprep.mubr.f32.mxu0 %v9012_v16  ;;  %v3578_v15 = vpop.permute.xlu1 %3577 }
 0xd79   : > { %v3576_v61 = vpop.permute.xlu0 %3575  ;;  %v3616_v6 = vsel %vm1747_vm1, %v3578_v15, %v8346_v41 }
 0xd7a   : > { %v3615_v22 = vsel %vm1747_vm1, %v3576_v61, %v8348_v62 }
 0xd7b   : > { %4968 = vmatmul.mubr.msk.f32.gmra.mrb[88].mxu1 %vm517_vm0, %v3615_v22  ;;  %4984 = vmatmul.mubr.msk.f32.gmra.mrb[88].mxu0 %vm517_vm0, %v3615_v22 }
 0xd7c   : > { %3829 = vmatprep.mubr.f32.mxu1 %v9012_v16  ;;  %3990 = vmatprep.mubr.f32.mxu0 %v9012_v16 }
 0xd7f   : > { %4969 = vmatmul.mubr.msk.f32.gmra.mrb[90].mxu1 %vm517_vm0, %v3616_v6  ;;  %4985 = vmatmul.mubr.msk.f32.gmra.mrb[90].mxu0 %vm517_vm0, %v3616_v6 }
 0xd80   : > { %3835 = vmatprep.mubr.f32.mxu1 %v9012_v16  ;;  %3996 = vmatprep.mubr.f32.mxu0 %v9012_v16  ;;  %v3582_v42 = vpop.permute.xlu1 %3581 }
 0xd81   : > { %v3580_v62 = vpop.permute.xlu0 %3579  ;;  %v3618_v41 = vsel %vm1747_vm1, %v3582_v42, %v8358_v12 }
 0xd82   : > { %v3617_v13 = vsel %vm1747_vm1, %v3580_v62, %v8360_v50 }
 0xd83   : > { %4970 = vmatmul.mubr.msk.f32.gmra.mrb[92].mxu1 %vm517_vm0, %v3617_v13  ;;  %4986 = vmatmul.mubr.msk.f32.gmra.mrb[92].mxu0 %vm517_vm0, %v3617_v13 }
 0xd84   : > { %3841 = vmatprep.mubr.f32.mxu1 %v9012_v16  ;;  %4002 = vmatprep.mubr.f32.mxu0 %v9012_v16 }
 0xd87   : > { %4971 = vmatmul.mubr.msk.f32.gmra.mrb[94].mxu1 %vm517_vm0, %v3618_v41  ;;  %4987 = vmatmul.mubr.msk.f32.gmra.mrb[94].mxu0 %vm517_vm0, %v3618_v41 }
 0xd88   : > { %3847 = vmatprep.mubr.f32.mxu1 %v9012_v16  ;;  %4008 = vmatprep.mubr.f32.mxu0 %v9012_v16  ;;  %v3586_v18 = vpop.permute.xlu1 %3585 }
 0xd89   : > { %v3584_v50 = vpop.permute.xlu0 %3583  ;;  %v3620_v12 = vsel %vm1747_vm1, %v3586_v18, %v8370_v38 }
 0xd8a   : > { %v3619_v21 = vsel %vm1747_vm1, %v3584_v50, %v8372_v8 }
 0xd8b   : > { %4972 = vmatmul.mubr.msk.f32.gmra.mrb[96].mxu1 %vm517_vm0, %v3619_v21  ;;  %4988 = vmatmul.mubr.msk.f32.gmra.mrb[96].mxu0 %vm517_vm0, %v3619_v21 }
 0xd8c   : > { %3853 = vmatprep.mubr.f32.mxu1 %v9012_v16  ;;  %4014 = vmatprep.mubr.f32.mxu0 %v9012_v16 }
 0xd8f   : > { %4973 = vmatmul.mubr.msk.f32.gmra.mrb[98].mxu1 %vm517_vm0, %v3620_v12  ;;  %4989 = vmatmul.mubr.msk.f32.gmra.mrb[98].mxu0 %vm517_vm0, %v3620_v12 }
 0xd90   : > { %3859 = vmatprep.mubr.f32.mxu1 %v9012_v16  ;;  %4020 = vmatprep.mubr.f32.mxu0 %v9012_v16  ;;  %v3590_v56 = vpop.permute.xlu1 %3589 }
 0xd91   : > { %v3588_v8 = vpop.permute.xlu0 %3587  ;;  %v3622_v38 = vsel %vm1747_vm1, %v3590_v56, %v8382_v17  ;;  %v4553_v17 = vld [vmem:[%s8959_s10 + $0x8] sm:$0xff] }
 0xd92   : > { %v3621_v27 = vsel %vm1747_vm1, %v3588_v8, %v8384_v57 }
 0xd93   : > { %4974 = vmatmul.mubr.msk.f32.gmra.mrb[100].mxu1 %vm517_vm0, %v3621_v27  ;;  %4990 = vmatmul.mubr.msk.f32.gmra.mrb[100].mxu0 %vm517_vm0, %v3621_v27 }
 0xd94   : > { %3865 = vmatprep.mubr.f32.mxu1 %v9012_v16  ;;  %4026 = vmatprep.mubr.f32.mxu0 %v9012_v16  ;;  %v4552_v16 = vld [vmem:[%s8959_s10] sm:$0xff] }
 0xd95   : > { %v5615_v57 = vpack.c.bf16 %v4553_v17, %v4552_v16 }
 0xd97   : > { %4975 = vmatmul.mubr.msk.f32.gmra.mrb[102].mxu1 %vm517_vm0, %v3622_v38  ;;  %4991 = vmatmul.mubr.msk.f32.gmra.mrb[102].mxu0 %vm517_vm0, %v3622_v38 }
 0xd98   : > { %5367 = vmatprep.mubr.msk.f32.mxu1 %vm517_vm0, %v8426_v24  ;;  %5616 = vmatprep.subr.bf16.mxu0 %v5615_v57  ;;  %v5643_v24 = vpack.c.bf16 %v4567_v63, %v4566_v0 }
 0xd99   : > { %5618 = vmatpush3.bf16.msra.mxu0 %v5615_v57 }
 0xd9a   : > { %5620 = vmatprep.subr.bf16.mxu0 %v5619_v31 }
 0xd9b   : > { %5368 = vmatmul.mubr.msk.f32.vlgmr.msra.gmra.mrb[104].mxu1 %vm517_vm0, %v8436_v53  ;;  %v8623_v53 = vrot.slane %v4178_v40, %v1107_v48 }
 0xd9c   : > { %5370 = vmatprep.mubr.msk.f32.mxu1 %vm517_vm0, %v8446_v1 }
 0xd9d   : > { %5622 = vmatpush3.bf16.msra.mxu0 %v5619_v31 }
 0xd9e   : > { %5624 = vmatprep.subr.bf16.mxu0 %v5623_v23 }
 0xd9f   : > { %5371 = vmatmul.mubr.msk.f32.gmra.mrb[106].mxu1 %vm517_vm0, %v8456_v4 }
 0xda0   : > { %5373 = vmatprep.mubr.msk.f32.mxu1 %vm517_vm0, %v8466_v43 }
 0xda1   : > { %5626 = vmatpush3.bf16.msra.mxu0 %v5623_v23 }
 0xda2   : > { %5628 = vmatprep.subr.bf16.mxu0 %v5627_v36 }
 0xda3   : > { %5374 = vmatmul.mubr.msk.f32.gmra.mrb[108].mxu1 %vm517_vm0, %v8476_v14 }
 0xda4   : > { %5376 = vmatprep.mubr.msk.f32.mxu1 %vm517_vm0, %v8486_v52 }
 0xda5   : > { %5630 = vmatpush3.bf16.msra.mxu0 %v5627_v36 }
 0xda6   : > { %5632 = vmatprep.subr.bf16.mxu0 %v5631_v11 }
 0xda7   : > { %5377 = vmatmul.mubr.msk.f32.gmra.mrb[110].mxu1 %vm517_vm0, %v3614_v46 }
 0xda8   : > { %5379 = vmatprep.mubr.msk.f32.mxu1 %vm517_vm0, %v3615_v22 }
 0xda9   : > { %5634 = vmatpush3.bf16.msra.mxu0 %v5631_v11 }
 0xdaa   : > { %5636 = vmatprep.subr.bf16.mxu0 %v5635_v58 }
 0xdab   : > { %5380 = vmatmul.mubr.msk.f32.gmra.mrb[112].mxu1 %vm517_vm0, %v3616_v6 }
 0xdac   : > { %5382 = vmatprep.mubr.msk.f32.mxu1 %vm517_vm0, %v3617_v13 }
 0xdad   : > { %5638 = vmatpush3.bf16.msra.mxu0 %v5635_v58 }
 0xdae   : > { %5640 = vmatprep.subr.bf16.mxu0 %v5639_v35 }
 0xdaf   : > { %5383 = vmatmul.mubr.msk.f32.gmra.mrb[114].mxu1 %vm517_vm0, %v3618_v41 }
 0xdb0   : > { %5385 = vmatprep.mubr.msk.f32.mxu1 %vm517_vm0, %v3619_v21 }
 0xdb1   : > { %5642 = vmatpush3.bf16.msra.mxu0 %v5639_v35 }
 0xdb2   : > { %5644 = vmatprep.subr.bf16.mxu0 %v5643_v24 }
 0xdb3   : > { %5386 = vmatmul.mubr.msk.f32.gmra.mrb[116].mxu1 %vm517_vm0, %v3620_v12 }
 0xdb4   : > { %5388 = vmatprep.mubr.msk.f32.mxu1 %vm517_vm0, %v3621_v27 }
 0xdb5   : > { %5646 = vmatpush3.bf16.msra.mxu0 %v5643_v24 }
 0xdb7   : > { %5389 = vmatmul.mubr.msk.f32.gmra.mrb[118].mxu1 %vm517_vm0, %v3622_v38 }
 0xe2e   : > { %v3777_v19 = vpop.f32.mrb[72].mxu1  ;;  %v3938_v20 = vpop.f32.mrb[72].mxu0 }
 0xe2f   : > { %v4200_v1 = vadd.f32 %v8619_v54, %v3777_v19  ;;  %v3779_v55 = vpop.f32.mrb[73].mxu1  ;;  %v3940_v30 = vpop.f32.mrb[73].mxu0  ;;  %v4202_v4 = vadd.f32 %v8623_v53, %v3938_v20 }
 0xe30   : > { %v4201_v44 = vadd.f32 %v8627_v32, %v3779_v55  ;;  %v4203_v48 = vadd.f32 %v8631_v3, %v3940_v30 }
 0xe31   : > { %v4264_v43 = vmul.f32 0.5, %v4200_v1  ;;  %6102 = vtanh.f32 %v4202_v4 }
 0xe32   : > { %v4328_v49 = vmul.f32 0.5, %v4201_v44  ;;  %v3783_v51 = vpop.f32.mrb[74].mxu1  ;;  %v3944_v14 = vpop.f32.mrb[74].mxu0  ;;  %v4408_v33 = vmul.f32 0.5, %v4203_v48 }
 0xe33   : > { %v4204_v7 = vadd.f32 %v8619_v54, %v3783_v51  ;;  %v3785_v2 = vpop.f32.mrb[75].mxu1  ;;  %v3946_v52 = vpop.f32.mrb[75].mxu0  ;;  %6104 = vtanh.f32 %v4264_v43  ;;  %v4206_v22 = vadd.f32 %v8623_v53, %v3944_v14 }
 0xe34   : > { %v4205_v29 = vadd.f32 %v8627_v32, %v3785_v2  ;;  %v4207_v46 = vadd.f32 %v8631_v3, %v3946_v52  ;;  %6106 = vtanh.f32 %v4328_v49 }
 0xe35   : > { %v4265_v61 = vmul.f32 0.5, %v4204_v7  ;;  %6108 = vtanh.f32 %v4408_v33 }
 0xe36   : > { %v4329_v15 = vmul.f32 0.5, %v4205_v29  ;;  %v3789_v6 = vpop.f32.mrb[76].mxu1  ;;  %v3950_v62 = vpop.f32.mrb[76].mxu0  ;;  %v4409_v13 = vmul.f32 0.5, %v4207_v46 }
 0xe37   : > { %v4208_v42 = vadd.f32 %v8619_v54, %v3789_v6  ;;  %v3791_v41 = vpop.f32.mrb[77].mxu1  ;;  %v3952_v50 = vpop.f32.mrb[77].mxu0  ;;  %6110 = vtanh.f32 %v4265_v61  ;;  %v4210_v21 = vadd.f32 %v8623_v53, %v3950_v62 }
 0xe38   : > { %v4209_v18 = vadd.f32 %v8627_v32, %v3791_v41  ;;  %v4211_v12 = vadd.f32 %v8631_v3, %v3952_v50  ;;  %6112 = vtanh.f32 %v4206_v22 }
 0xe39   : > { %v4266_v8 = vmul.f32 0.5, %v4208_v42  ;;  %6114 = vtanh.f32 %v4329_v15 }
 0xe3a   : > { %v4330_v27 = vmul.f32 0.5, %v4209_v18  ;;  %v3795_v56 = vpop.f32.mrb[78].mxu1  ;;  %v3956_v38 = vpop.f32.mrb[78].mxu0  ;;  %6116 = vtanh.f32 %v4409_v13  ;;  %v4410_v16 = vmul.f32 0.5, %v4211_v12 }
 0xe3b   : > { %v4212_v17 = vadd.f32 %v8619_v54, %v3795_v56  ;;  %v3797_v57 = vpop.f32.mrb[79].mxu1  ;;  %v3958_v47 = vpop.f32.mrb[79].mxu0  ;;  %6118 = vtanh.f32 %v4210_v21  ;;  %v4214_v37 = vadd.f32 %v8623_v53, %v3956_v38 }
 0xe3c   : > { %v4213_v31 = vadd.f32 %v8627_v32, %v3797_v57  ;;  %v4215_v45 = vadd.f32 %v8631_v3, %v3958_v47  ;;  %6120 = vtanh.f32 %v4266_v8  ;;  %v8649_v23 = vpop.eup %6102 }
 0xe3d   : > { %v4267_v28 = vmul.f32 0.5, %v4212_v17  ;;  %6122 = vtanh.f32 %v4330_v27  ;;  %v6105_v10 = vpop.eup %6104 }
 0xe3e   : > { %v4331_v59 = vmul.f32 0.5, %v4213_v31  ;;  %v3801_v39 = vpop.f32.mrb[80].mxu1  ;;  %v3962_v36 = vpop.f32.mrb[80].mxu0  ;;  %6124 = vtanh.f32 %v4410_v16  ;;  %v4411_v25 = vmul.f32 0.5, %v4215_v45  ;;  %v4296_v13 = vmul.f32 0.5, %v6105_v10 }
 0xe3f   : > { %v4216_v11 = vadd.f32 %v8619_v54, %v3801_v39  ;;  %v3803_v60 = vpop.f32.mrb[81].mxu1  ;;  %v3964_v9 = vpop.f32.mrb[81].mxu0  ;;  %6126 = vtanh.f32 %v4214_v37  ;;  %v4218_v26 = vadd.f32 %v8623_v53, %v3962_v36 }
 0xe40   : > { %v8652_v58 = vpop.eup %6106  ;;  %v4217_v5 = vadd.f32 %v8627_v32, %v3803_v60  ;;  %6128 = vtanh.f32 %v4267_v28  ;;  %v4219_v63 = vadd.f32 %v8631_v3, %v3964_v9  ;;  %v4312_v45 = vadd.f32 0.5, %v4296_v13 }
 0xe41   : > { %v8656_v0 = vpop.eup %6108  ;;  %v4268_v35 = vmul.f32 0.5, %v4216_v11  ;;  %6130 = vtanh.f32 %v4331_v59 }
 0xe42   : > { %v6111_v24 = vpop.eup %6110  ;;  %v4332_v40 = vmul.f32 0.5, %v4217_v5  ;;  %v3807_v34 = vpop.f32.mrb[82].mxu1  ;;  %6132 = vtanh.f32 %v4411_v25  ;;  %v4412_v1 = vmul.f32 0.5, %v4219_v63 }
 0xe43   : > { %v3968_v19 = vpop.f32.mrb[82].mxu0  ;;  %v6113_v20 = vpop.eup %6112  ;;  %v4220_v55 = vadd.f32 %v8619_v54, %v3807_v34  ;;  %6134 = vtanh.f32 %v4218_v26  ;;  %v4297_v51 = vmul.f32 0.5, %v6111_v24 }
 0xe44   : > { %v3809_v30 = vpop.f32.mrb[83].mxu1  ;;  %v3970_v4 = vpop.f32.mrb[83].mxu0  ;;  %v4222_v48 = vadd.f32 %v8623_v53, %v3968_v19  ;;  %6136 = vtanh.f32 %v4268_v35 }
 0xe45   : > { %v8660_v44 = vpop.eup %6114  ;;  %v4221_v43 = vadd.f32 %v8627_v32, %v3809_v30  ;;  %v4269_v14 = vmul.f32 0.5, %v4220_v55  ;;  %v4223_v33 = vadd.f32 %v8631_v3, %v3970_v4  ;;  %6138 = vtanh.f32 %v4332_v40 }
 0xe46   : > { %v8664_v49 = vpop.eup %6116  ;;  %v3813_v52 = vpop.f32.mrb[84].mxu1  ;;  %6140 = vtanh.f32 %v4412_v1  ;;  %v4313_v21 = vadd.f32 0.5, %v4297_v51  ;;  %v8704_v4 = vmul.f32 %v8649_v23, %v4312_v45  ;;  %v4440_v23 = vmul.f32 0.5, %v8656_v0 }
 0xe47   : > { %v8667_v7 = vpop.eup %6118  ;;  %v4333_v2 = vmul.f32 0.5, %v4221_v43  ;;  %v3974_v29 = vpop.f32.mrb[84].mxu0  ;;  %v4413_v61 = vmul.f32 0.5, %v4223_v33  ;;  %v4224_v22 = vadd.f32 %v8619_v54, %v3813_v52  ;;  %6142 = vtanh.f32 %v4222_v48 }
 0xe48   : > { %v8669_v46 = vpop.eup %6120  ;;  %v3815_v15 = vpop.f32.mrb[85].mxu1  ;;  %v4226_v42 = vadd.f32 %v8623_v53, %v3974_v29  ;;  %6144 = vtanh.f32 %v4269_v14  ;;  %v8689_v25 = vmul.f32 %v6113_v20, %v4313_v21  ;;  %v4360_v33 = vmul.f32 0.5, %v8652_v58 }
 0xe49   : > { %v3976_v6 = vpop.f32.mrb[85].mxu0  ;;  %v8672_v62 = vpop.eup %6122  ;;  %v4225_v41 = vadd.f32 %v8627_v32, %v3815_v15  ;;  %v4270_v18 = vmul.f32 0.5, %v4224_v22  ;;  %6146 = vtanh.f32 %v4333_v2 }
 0xe4a   : > { %v8676_v50 = vpop.eup %6124  ;;  %v4227_v12 = vadd.f32 %v8631_v3, %v3976_v6  ;;  %v3819_v56 = vpop.f32.mrb[86].mxu1  ;;  %6148 = vtanh.f32 %v4413_v61 }
 0xe4b   : > { %v8679_v8 = vpop.eup %6126  ;;  %v4334_v27 = vmul.f32 0.5, %v4225_v41  ;;  %v3980_v38 = vpop.f32.mrb[86].mxu0  ;;  %v4228_v57 = vadd.f32 %v8619_v54, %v3819_v56  ;;  %6150 = vtanh.f32 %v4226_v42 }
 0xe4c   : > { %v6129_v16 = vpop.eup %6128  ;;  %v4414_v17 = vmul.f32 0.5, %v4227_v12  ;;  %v3821_v47 = vpop.f32.mrb[87].mxu1  ;;  %v4230_v28 = vadd.f32 %v8623_v53, %v3980_v38  ;;  %6152 = vtanh.f32 %v4270_v18  ;;  %v4441_v12 = vmul.f32 0.5, %v8664_v49 }
 0xe4d   : > { %v3982_v37 = vpop.f32.mrb[87].mxu0  ;;  %v8682_v31 = vpop.eup %6130  ;;  %v4229_v59 = vadd.f32 %v8627_v32, %v3821_v47  ;;  %v4271_v36 = vmul.f32 0.5, %v4228_v57  ;;  %6154 = vtanh.f32 %v4334_v27  ;;  %v4299_v58 = vmul.f32 0.5, %v6129_v16 }
 0xe4e   : > { %v8686_v39 = vpop.eup %6132  ;;  %v4231_v10 = vadd.f32 %v8631_v3, %v3982_v37  ;;  %v3825_v9 = vpop.f32.mrb[88].mxu1  ;;  %6156 = vtanh.f32 %v4414_v17  ;;  %v8723_v38 = vadd.f32 0.5, %v4360_v33  ;;  %v4298_v57 = vmul.f32 0.5, %v8669_v46 }
 0xe4f   : > { %v8691_v11 = vpop.eup %6134  ;;  %v4335_v60 = vmul.f32 0.5, %v4229_v59  ;;  %v3986_v26 = vpop.f32.mrb[88].mxu0  ;;  %v4232_v63 = vadd.f32 %v8619_v54, %v3825_v9  ;;  %6158 = vtanh.f32 %v4230_v28  ;;  %v8731_v59 = vadd.f32 0.5, %v4440_v23 }
 0xe50   : > { %v8693_v5 = vpop.eup %6136  ;;  %v4415_v35 = vmul.f32 0.5, %v4231_v10  ;;  %v3827_v24 = vpop.f32.mrb[89].mxu1  ;;  %v4234_v19 = vadd.f32 %v8623_v53, %v3986_v26  ;;  %6160 = vtanh.f32 %v4271_v36 }
 0xe51   : > { %v3988_v40 = vpop.f32.mrb[89].mxu0  ;;  %v8696_v34 = vpop.eup %6138  ;;  %v4233_v20 = vadd.f32 %v8627_v32, %v3827_v24  ;;  %v4272_v55 = vmul.f32 0.5, %v4232_v63  ;;  %6162 = vtanh.f32 %v4335_v60  ;;  %v4315_v60 = vadd.f32 0.5, %v4299_v58 }
 0xe52   : > { %v8700_v1 = vpop.eup %6140  ;;  %v4235_v30 = vadd.f32 %v8631_v3, %v3988_v40  ;;  %v3831_v51 = vpop.f32.mrb[90].mxu1  ;;  %6164 = vtanh.f32 %v4415_v35  ;;  %v8740_v35 = vadd.f32 0.5, %v4441_v12  ;;  %v4443_v58 = vmul.f32 0.5, %v8686_v39 }
 0xe53   : > { %v8706_v48 = vpop.eup %6142  ;;  %v4336_v43 = vmul.f32 0.5, %v4233_v20  ;;  %v3992_v14 = vpop.f32.mrb[90].mxu0  ;;  %v4236_v29 = vadd.f32 %v8619_v54, %v3831_v51  ;;  %6166 = vtanh.f32 %v4234_v19  ;;  %v4361_v19 = vmul.f32 0.5, %v8660_v44 }
 0xe54   : > { %v8709_v2 = vpop.eup %6144  ;;  %v4416_v52 = vmul.f32 0.5, %v4235_v30  ;;  %v3833_v61 = vpop.f32.mrb[91].mxu1  ;;  %v4238_v6 = vadd.f32 %v8623_v53, %v3992_v14  ;;  %6168 = vtanh.f32 %v4272_v55  ;;  %v8745_v55 = vadd.f32 0.5, %v4298_v57 }
 0xe55   : > { %v3994_v22 = vpop.f32.mrb[91].mxu0  ;;  %v8712_v15 = vpop.eup %6146  ;;  %v4237_v13 = vadd.f32 %v8627_v32, %v3833_v61  ;;  %v4273_v41 = vmul.f32 0.5, %v4236_v29  ;;  %6170 = vtanh.f32 %v4336_v43  ;;  %v8762_v12 = vadd.f32 0.5, %v4361_v19 }
 0xe56   : > { %v8717_v42 = vpop.eup %6148  ;;  %v4239_v21 = vadd.f32 %v8631_v3, %v3994_v22  ;;  %v3837_v56 = vpop.f32.mrb[92].mxu1  ;;  %6172 = vtanh.f32 %v4416_v52  ;;  %v4442_v52 = vmul.f32 0.5, %v8676_v50 }
 0xe57   : > { %v8720_v18 = vpop.eup %6150  ;;  %v4337_v27 = vmul.f32 0.5, %v4237_v13  ;;  %v3998_v0 = vpop.f32.mrb[92].mxu0  ;;  %v4240_v47 = vadd.f32 %v8619_v54, %v3837_v56  ;;  %6174 = vtanh.f32 %v4238_v6  ;;  %v8757_v6 = vmul.f32 %v8679_v8, %v4315_v60 }
 0xe58   : > { %v8725_v17 = vpop.eup %6152  ;;  %v4417_v16 = vmul.f32 0.5, %v4239_v21  ;;  %v3839_v37 = vpop.f32.mrb[93].mxu1  ;;  %v4242_v49 = vadd.f32 %v8623_v53, %v3998_v0  ;;  %6176 = vtanh.f32 %v4273_v41  ;;  %v4300_v56 = vmul.f32 0.5, %v8693_v5 }
 0xe59   : > { %v4000_v45 = vpop.f32.mrb[93].mxu0  ;;  %v8729_v28 = vpop.eup %6154  ;;  %v4241_v36 = vadd.f32 %v8627_v32, %v3839_v37  ;;  %v4274_v46 = vmul.f32 0.5, %v4240_v47  ;;  %6178 = vtanh.f32 %v4337_v27  ;;  %v8770_v37 = vadd.f32 0.5, %v4442_v52 }
 0xe5a   : > { %v8735_v10 = vpop.eup %6156  ;;  %v4243_v9 = vadd.f32 %v8631_v3, %v4000_v45  ;;  %v3843_v24 = vpop.f32.mrb[94].mxu1  ;;  %6180 = vtanh.f32 %v4417_v16 }
 0xe5b   : > { %v8738_v26 = vpop.eup %6158  ;;  %v4338_v63 = vmul.f32 0.5, %v4241_v36  ;;  %v4004_v40 = vpop.f32.mrb[94].mxu0  ;;  %v4244_v43 = vadd.f32 %v8619_v54, %v3843_v24  ;;  %6182 = vtanh.f32 %v4242_v49  ;;  %v4444_v36 = vmul.f32 0.5, %v8700_v1 }
 0xe5c   : > { %v8743_v20 = vpop.eup %6160  ;;  %v4418_v30 = vmul.f32 0.5, %v4243_v9  ;;  %v3845_v51 = vpop.f32.mrb[95].mxu1  ;;  %v4246_v29 = vadd.f32 %v8623_v53, %v4004_v40  ;;  %6184 = vtanh.f32 %v4274_v46  ;;  %v8780_v9 = vadd.f32 0.5, %v4443_v58 }
 0xe5d   : > { %v4006_v14 = vpop.f32.mrb[95].mxu0  ;;  %v8748_v33 = vpop.eup %6162  ;;  %v4245_v61 = vadd.f32 %v8627_v32, %v3845_v51  ;;  %v4275_v22 = vmul.f32 0.5, %v4244_v43  ;;  %6186 = vtanh.f32 %v4338_v63  ;;  %v4301_v63 = vmul.f32 0.5, %v8709_v2 }
 0xe5e   : > { %v8753_v44 = vpop.eup %6164  ;;  %v4247_v23 = vadd.f32 %v8631_v3, %v4006_v14  ;;  %v3849_v41 = vpop.f32.mrb[96].mxu1  ;;  %6188 = vtanh.f32 %v4418_v30  ;;  %v8783_v43 = vadd.f32 0.5, %v4300_v56  ;;  %v8793_v58 = vadd.f32 0.5, %v4444_v36 }
 0xe5f   : > { %v8759_v13 = vpop.eup %6166  ;;  %v4339_v50 = vmul.f32 0.5, %v4245_v61  ;;  %v4010_v21 = vpop.f32.mrb[96].mxu0  ;;  %v4248_v57 = vadd.f32 %v8619_v54, %v3849_v41  ;;  %6190 = vtanh.f32 %v4246_v29  ;;  %v4302_v61 = vmul.f32 0.5, %v8725_v17 }
 0xe60   : > { %v8764_v27 = vpop.eup %6168  ;;  %v4419_v0 = vmul.f32 0.5, %v4247_v23  ;;  %v3851_v8 = vpop.f32.mrb[97].mxu1  ;;  %v4250_v39 = vadd.f32 %v8623_v53, %v4010_v21  ;;  %6192 = vtanh.f32 %v4275_v22  ;;  %v8798_v56 = vadd.f32 0.5, %v4301_v63 }
 0xe61   : > { %v4012_v16 = vpop.f32.mrb[97].mxu0  ;;  %v8768_v47 = vpop.eup %6170  ;;  %v4249_v45 = vadd.f32 %v8627_v32, %v3851_v8  ;;  %v4276_v5 = vmul.f32 0.5, %v4248_v57  ;;  %6194 = vtanh.f32 %v4339_v50  ;;  %v8807_v63 = vadd.f32 0.5, %v4302_v61 }
 0xe62   : > { %v8774_v49 = vpop.eup %6172  ;;  %v4251_v60 = vadd.f32 %v8631_v3, %v4012_v16  ;;  %v3855_v40 = vpop.f32.mrb[98].mxu1  ;;  %6196 = vtanh.f32 %v4419_v0  ;;  %v8801_v0 = vmul.f32 0.5, %v8717_v42  ;;  %v4304_v61 = vmul.f32 0.5, %v8764_v27 }
 0xe63   : > { %v8778_v46 = vpop.eup %6174  ;;  %v4340_v24 = vmul.f32 0.5, %v4249_v45  ;;  %v4016_v19 = vpop.f32.mrb[98].mxu0  ;;  %v4252_v1 = vadd.f32 %v8619_v54, %v3855_v40  ;;  %6198 = vtanh.f32 %v4250_v39  ;;  %v4362_v27 = vmul.f32 0.5, %v8672_v62 }
 0xe64   : > { %v6177_v30 = vpop.eup %6176  ;;  %v4420_v51 = vmul.f32 0.5, %v4251_v60  ;;  %v3857_v14 = vpop.f32.mrb[99].mxu1  ;;  %v4254_v2 = vadd.f32 %v8623_v53, %v4016_v19  ;;  %6200 = vtanh.f32 %v4276_v5  ;;  %v4363_v60 = vmul.f32 0.5, %v8682_v31 }
 0xe65   : > { %v4018_v52 = vpop.f32.mrb[99].mxu0  ;;  %v8786_v29 = vpop.eup %6178  ;;  %v4253_v22 = vadd.f32 %v8627_v32, %v3857_v14  ;;  %v4277_v50 = vmul.f32 0.5, %v4252_v1  ;;  %6202 = vtanh.f32 %v4340_v24  ;;  %v8816_v14 = vmul.f32 %v8667_v7, %v8745_v55 }
 0xe66   : > { %v8791_v23 = vpop.eup %6180  ;;  %v4255_v41 = vadd.f32 %v8631_v3, %v4018_v52  ;;  %v3861_v57 = vpop.f32.mrb[100].mxu1  ;;  %6204 = vtanh.f32 %v4420_v51  ;;  %v4303_v52 = vmul.f32 0.5, %v8743_v20 }
 0xe67   : > { %v8796_v21 = vpop.eup %6182  ;;  %v4341_v17 = vmul.f32 0.5, %v4253_v22  ;;  %v4022_v8 = vpop.f32.mrb[100].mxu0  ;;  %v4256_v45 = vadd.f32 %v8619_v54, %v3861_v57  ;;  %6206 = vtanh.f32 %v4254_v2 }
 0xe68   : > { %v6185_v16 = vpop.eup %6184  ;;  %v4421_v39 = vmul.f32 0.5, %v4255_v41  ;;  %v3863_v36 = vpop.f32.mrb[101].mxu1  ;;  %v4258_v42 = vadd.f32 %v8623_v53, %v4022_v8  ;;  %6208 = vtanh.f32 %v4277_v50  ;;  %v4305_v8 = vmul.f32 0.5, %v6177_v30 }
 0xe69   : > { %v4024_v5 = vpop.f32.mrb[101].mxu0  ;;  %v8805_v40 = vpop.eup %6186  ;;  %v4257_v24 = vadd.f32 %v8627_v32, %v3863_v36  ;;  %v4278_v51 = vmul.f32 0.5, %v4256_v45  ;;  %6210 = vtanh.f32 %v4341_v17 }
 0xe6a   : > { %v8811_v19 = vpop.eup %6188  ;;  %v4259_v1 = vadd.f32 %v8631_v3, %v4024_v5  ;;  %v3867_v22 = vpop.f32.mrb[102].mxu1  ;;  %6212 = vtanh.f32 %v4421_v39  ;;  %v4379_v5 = vadd.f32 0.5, %v4363_v60  ;;  %v8833_v60 = vadd.f32 0.5, %v4304_v61 }
 0xe6b   : > { %9043 = vst [vmem:[#allocation15_spill] sm:$0xff] %v8811_v19  ;;  %v8818_v31 = vpop.eup %6190  ;;  %v4342_v2 = vmul.f32 0.5, %v4257_v24  ;;  %v4028_v41 = vpop.f32.mrb[102].mxu0  ;;  %v4260_v50 = vadd.f32 %v8619_v54, %v3867_v22  ;;  %6214 = vtanh.f32 %v4258_v42  ;;  %v4319_v22 = vadd.f32 0.5, %v4303_v52 }
 0xe6c   : > { %v6193_v57 = vpop.eup %6192  ;;  %v3869_v45 = vpop.f32.mrb[103].mxu1  ;;  %v4422_v55 = vmul.f32 0.5, %v4259_v1  ;;  %6216 = vtanh.f32 %v4278_v51  ;;  %v4262_v30 = vadd.f32 %v8623_v53, %v4028_v41  ;;  %v4365_v52 = vmul.f32 0.5, %v8712_v15 }
 0xe6d   : > { %v4030_v36 = vpop.f32.mrb[103].mxu0  ;;  %v8823_v7 = vpop.eup %6194  ;;  %v4261_v20 = vadd.f32 %v8627_v32, %v3869_v45  ;;  %v4279_v24 = vmul.f32 0.5, %v4260_v50  ;;  %6218 = vtanh.f32 %v4342_v2  ;;  %v4321_v32 = vadd.f32 0.5, %v4305_v8 }
 0xe6e   : > { %v8827_v17 = vpop.eup %6196  ;;  %v4263_v39 = vadd.f32 %v8631_v3, %v4030_v36  ;;  %v5369_v1 = vpop.f32.mrb[104].mxu1  ;;  %v4306_v45 = vmul.f32 0.5, %v6185_v16  ;;  %v4378_v3 = vadd.f32 0.5, %v4362_v27  ;;  %v4493_v16 = vmul.f32 %v8706_v48, %v8798_v56 }
 0xe6f   : > { %v8831_v54 = vpop.eup %6198  ;;  %v4343_v42 = vmul.f32 0.5, %v4261_v20  ;;  %6220 = vtanh.f32 %v4279_v24  ;;  %v4473_v62 = vmul.f32 %v5369_v1, %v8762_v12  ;;  %v4099_v51 = vpop.f32.mrb[105].mxu1  ;;  %v4492_v15 = vmul.f32 %v8691_v11, %v8783_v43 }
 0xe70   : > { %v6201_v19 = vpop.eup %6200  ;;  %6222 = vtanh.f32 %v4422_v55  ;;  %v4472_v53 = vmul.f32 %v8723_v38, %v4099_v51  ;;  %v4423_v2 = vmul.f32 0.5, %v4263_v39  ;;  %v4364_v38 = vmul.f32 0.5, %v8696_v34 }
 0xe71   : > { %v8836_v50 = vpop.eup %6202  ;;  %6224 = vtanh.f32 %v4262_v30  ;;  %v4505_v41 = vadd.f32 %v8689_v25, %v4473_v62  ;;  %v8851_v20 = vadd.f32 0.5, %v4306_v45  ;;  %v4307_v27 = vmul.f32 0.5, %v6193_v57 }
 0xe72   : > { %v8840_v61 = vpop.eup %6204  ;;  %6226 = vtanh.f32 %v4343_v42  ;;  %v4504_v12 = vadd.f32 %v8704_v4, %v4472_v53  ;;  %v5372_v36 = vpop.f32.mrb[106].mxu1  ;;  %v4308_v48 = vmul.f32 0.5, %v6201_v19  ;;  %v4381_v39 = vadd.f32 0.5, %v4365_v52 }
 0xe73   : > { %v8845_v8 = vpop.eup %6206  ;;  %6228 = vtanh.f32 %v4505_v41  ;;  %v4475_v25 = vmul.f32 %v5372_v36, %v4379_v5  ;;  %v4109_v24 = vpop.f32.mrb[107].mxu1  ;;  %v4367_v11 = vmul.f32 0.5, %v8748_v33  ;;  %v4495_v43 = vmul.f32 %v8738_v26, %v4319_v22 }
 0xe74   : > { %v6209_v55 = vpop.eup %6208  ;;  %6230 = vtanh.f32 %v4504_v12  ;;  %v4474_v56 = vmul.f32 %v4378_v3, %v4109_v24  ;;  %v4380_v1 = vadd.f32 0.5, %v4364_v38  ;;  %v4366_v19 = vmul.f32 0.5, %v8729_v28 }
 0xe75   : > { %v8853_v30 = vpop.eup %6210  ;;  %6232 = vtanh.f32 %v4423_v2  ;;  %v4507_v34 = vadd.f32 %v8757_v6, %v4475_v25  ;;  %v4494_v45 = vmul.f32 %v8720_v18, %v8807_v63  ;;  %v4323_v51 = vadd.f32 0.5, %v4307_v27 }
 0xe76   : > { %v8855_v4 = vpop.eup %6212  ;;  %v4506_v57 = vadd.f32 %v8816_v14, %v4474_v56  ;;  %v5375_v5 = vpop.f32.mrb[108].mxu1  ;;  %v4309_v53 = vmul.f32 0.5, %v6209_v55  ;;  %v4324_v26 = vadd.f32 0.5, %v4308_v48  ;;  %v4369_v14 = vmul.f32 0.5, %v8786_v29 }
 0xe77   : > { %v8860_v42 = vpop.eup %6214  ;;  %6234 = vtanh.f32 %v4507_v34  ;;  %v4477_v6 = vmul.f32 %v5375_v5, %v4381_v39  ;;  %v4119_v3 = vpop.f32.mrb[109].mxu1  ;;  %v4383_v41 = vadd.f32 0.5, %v4367_v11  ;;  %v4497_v28 = vmul.f32 %v8778_v46, %v4321_v32 }
 0xe78   : > { %v6217_v62 = vpop.eup %6216  ;;  %6236 = vtanh.f32 %v4506_v57  ;;  %v4476_v22 = vmul.f32 %v4380_v1, %v4119_v3  ;;  %v4368_v18 = vmul.f32 0.5, %v8768_v47  ;;  %v4382_v55 = vadd.f32 0.5, %v4366_v19 }
 0xe79   : > { %v8866_v33 = vpop.eup %6218  ;;  %v4509_v2 = vadd.f32 %v4493_v16, %v4477_v6  ;;  %v4496_v27 = vmul.f32 %v8759_v13, %v8833_v60  ;;  %v4325_v24 = vadd.f32 0.5, %v4309_v53  ;;  %v4310_v48 = vmul.f32 0.5, %v6217_v62 }
 0xe7a   : > { %v6221_v52 = vpop.eup %6220  ;;  %v4508_v36 = vadd.f32 %v4492_v15, %v4476_v22  ;;  %v5378_v38 = vpop.f32.mrb[110].mxu1  ;;  %v4385_v32 = vadd.f32 0.5, %v4369_v14  ;;  %v4371_v47 = vmul.f32 0.5, %v8823_v7  ;;  %v4384_v15 = vadd.f32 0.5, %v4368_v18 }
 0xe7b   : > { %v8871_v63 = vpop.eup %6222  ;;  %v4311_v12 = vmul.f32 0.5, %v6221_v52  ;;  %6238 = vtanh.f32 %v4509_v2  ;;  %v4479_v29 = vmul.f32 %v5378_v38, %v4383_v41  ;;  %v4129_v16 = vpop.f32.mrb[111].mxu1  ;;  %v4499_v11 = vmul.f32 %v8818_v31, %v4323_v51 }
 0xe7c   : > { %v6225_v25 = vpop.eup %6224  ;;  %6240 = vtanh.f32 %v4508_v36  ;;  %v4478_v46 = vmul.f32 %v4382_v55, %v4129_v16  ;;  %v4370_v57 = vmul.f32 0.5, %v8805_v40  ;;  %v4498_v62 = vmul.f32 %v8796_v21, %v8851_v20 }
 0xe7d   : > { %v6227_v56 = vpop.eup %6226  ;;  %v4511_v34 = vadd.f32 %v4495_v43, %v4479_v29  ;;  %v4327_v60 = vadd.f32 0.5, %v4311_v12  ;;  %v4326_v6 = vadd.f32 0.5, %v4310_v48  ;;  %v4387_v40 = vadd.f32 0.5, %v4371_v47 }
 0xe7e   : > { %v6229_v39 = vpop.eup %6228  ;;  %v4510_v5 = vadd.f32 %v4494_v45, %v4478_v46  ;;  %v5381_v1 = vpop.f32.mrb[112].mxu1  ;;  %v4501_v51 = vmul.f32 %v8845_v8, %v4325_v24  ;;  %v4373_v14 = vmul.f32 0.5, %v8853_v30  ;;  %v4500_v21 = vmul.f32 %v8831_v54, %v4324_v26 }
 0xe7f   : > { %v6231_v13 = vpop.eup %6230  ;;  %v4537_v19 = vmul.f32 %v6229_v39, %v8740_v35  ;;  %6242 = vtanh.f32 %v4511_v34  ;;  %v4481_v7 = vmul.f32 %v5381_v1, %v4385_v32  ;;  %v4139_v43 = vpop.f32.mrb[113].mxu1  ;;  %v4386_v35 = vadd.f32 0.5, %v4370_v57 }
 0xe80   : > { %v8881_v53 = vpop.eup %6232  ;;  %v4536_v3 = vmul.f32 %v6231_v13, %v8731_v59  ;;  %6244 = vtanh.f32 %v4510_v5  ;;  %v4480_v31 = vmul.f32 %v4384_v15, %v4139_v43  ;;  %v4372_v59 = vmul.f32 0.5, %v8836_v50 }
 0xe81   : > { %v6235_v45 = vpop.eup %6234  ;;  %v4513_v22 = vadd.f32 %v4497_v28, %v4481_v7  ;;  %v4503_v18 = vmul.f32 %v6225_v25, %v4327_v60  ;;  %v4461_v12 = vadd.f32 0.5, %v8801_v0  ;;  %v4446_v30 = vmul.f32 0.5, %v8735_v10  ;;  %v9044_v7 = vld [vmem:[#allocation15_spill] sm:$0xff] }
 0xe82   : > { %5423 = vmatprep.mubr.f32.mxu0 %v4536_v3  ;;  %v6237_v20 = vpop.eup %6236  ;;  %v4512_v52 = vadd.f32 %v4496_v27, %v4480_v31  ;;  %v5384_v2 = vpop.f32.mrb[114].mxu1  ;;  %v4539_v41 = vmul.f32 %v6235_v45, %v8780_v9  ;;  %v4447_v54 = vmul.f32 0.5, %v8753_v44  ;;  %v4389_v9 = vadd.f32 0.5, %v4373_v14 }
 0xe83   : > { %5424 = vmatmul.mubr.f32.vlgmr.msra.gmra.mrb[104].mxu0 %v4537_v19  ;;  %6246 = vtanh.f32 %v4513_v22  ;;  %v4483_v8 = vmul.f32 %v5384_v2, %v4387_v40  ;;  %v4149_v28 = vpop.f32.mrb[115].mxu1  ;;  %v4538_v36 = vmul.f32 %v6237_v20, %v8770_v37  ;;  %v4375_v27 = vmul.f32 0.5, %v6227_v56 }
 0xe84   : > { %6248 = vtanh.f32 %v4512_v52  ;;  %v4482_v26 = vmul.f32 %v4386_v35, %v4149_v28  ;;  %v4502_v50 = vmul.f32 %v8860_v42, %v4326_v6  ;;  %v4388_v48 = vadd.f32 0.5, %v4372_v59 }
 0xe85   : > { %v6239_v38 = vpop.eup %6238  ;;  %v4515_v55 = vadd.f32 %v4499_v11, %v4483_v8  ;;  %5426 = vmatprep.mubr.f32.mxu0 %v4538_v36  ;;  %v4374_v37 = vmul.f32 0.5, %v8866_v33  ;;  %v4463_v46 = vadd.f32 0.5, %v4447_v54  ;;  %v4449_v32 = vmul.f32 0.5, %v8791_v23 }
 0xe86   : > { %v6241_v25 = vpop.eup %6240  ;;  %v4514_v0 = vadd.f32 %v4498_v62, %v4482_v26  ;;  %v5387_v24 = vpop.f32.mrb[116].mxu1  ;;  %v4541_v29 = vmul.f32 %v6239_v38, %v4461_v12  ;;  %v4462_v42 = vadd.f32 0.5, %v4446_v30  ;;  %v4448_v39 = vmul.f32 0.5, %v8774_v49 }
 0xe87   : > { %5427 = vmatmul.mubr.f32.gmra.mrb[106].mxu0 %v4539_v41  ;;  %6250 = vtanh.f32 %v4515_v55  ;;  %v4485_v10 = vmul.f32 %v5387_v24, %v4389_v9  ;;  %v4159_v44 = vpop.f32.mrb[117].mxu1  ;;  %v4540_v16 = vmul.f32 %v6241_v25, %v8793_v58  ;;  %v4391_v15 = vadd.f32 0.5, %v4375_v27 }
 0xe88   : > { %6252 = vtanh.f32 %v4514_v0  ;;  %v4484_v56 = vmul.f32 %v4388_v48, %v4159_v44  ;;  %v4390_v13 = vadd.f32 0.5, %v4374_v37  ;;  %v4465_v23 = vadd.f32 0.5, %v4449_v32 }
 0xe89   : > { %v6243_v47 = vpop.eup %6242  ;;  %v4517_v34 = vadd.f32 %v4501_v51, %v4485_v10  ;;  %5429 = vmatprep.mubr.f32.mxu0 %v4540_v16  ;;  %v4451_v19 = vmul.f32 0.5, %v8827_v17  ;;  %v4464_v49 = vadd.f32 0.5, %v4448_v39  ;;  %v4450_v43 = vmul.f32 0.5, %v9044_v7 }
 0xe8a   : > { %v6245_v11 = vpop.eup %6244  ;;  %v4516_v57 = vadd.f32 %v4500_v21, %v4484_v56  ;;  %v5390_v33 = vpop.f32.mrb[118].mxu1  ;;  %v4543_v60 = vmul.f32 %v6243_v47, %v4463_v46  ;;  %v4453_v35 = vmul.f32 0.5, %v8855_v4  ;;  %v4452_v21 = vmul.f32 0.5, %v8840_v61 }
 0xe8b   : > { %5430 = vmatmul.mubr.f32.gmra.mrb[108].mxu0 %v4541_v29  ;;  %6254 = vtanh.f32 %v4517_v34  ;;  %v4487_v58 = vmul.f32 %v5390_v33, %v4391_v15  ;;  %v4169_v5 = vpop.f32.mrb[119].mxu1  ;;  %v4542_v1 = vmul.f32 %v6245_v11, %v4462_v42  ;;  %v4467_v22 = vadd.f32 0.5, %v4451_v19 }
 0xe8c   : > { %6256 = vtanh.f32 %v4516_v57  ;;  %v4486_v62 = vmul.f32 %v4390_v13, %v4169_v5  ;;  %v4466_v17 = vadd.f32 0.5, %v4450_v43  ;;  %v4469_v41 = vadd.f32 0.5, %v4453_v35 }
 0xe8d   : > { %v6247_v6 = vpop.eup %6246  ;;  %v4519_v3 = vadd.f32 %v4503_v18, %v4487_v58  ;;  %5432 = vmatprep.mubr.f32.mxu0 %v4542_v1  ;;  %v4455_v59 = vmul.f32 0.5, %v8881_v53  ;;  %v4468_v12 = vadd.f32 0.5, %v4452_v21  ;;  %v4454_v8 = vmul.f32 0.5, %v8871_v63  ;;  %v5008_v63 = vld [vmem:[%s8960_s11] ss:$0 sm:$0xff] }
 0xe8e   : > { %v6249_v31 = vpop.eup %6248  ;;  %v4518_v40 = vadd.f32 %v4502_v50, %v4486_v62  ;;  %v4545_v51 = vmul.f32 %v6247_v6, %v4465_v23 }
 0xe8f   : > { %5433 = vmatmul.mubr.f32.gmra.mrb[110].mxu0 %v4543_v60  ;;  %6258 = vtanh.f32 %v4519_v3  ;;  %v4544_v45 = vmul.f32 %v6249_v31, %v4464_v49  ;;  %v4471_v30 = vadd.f32 0.5, %v4455_v59  ;;  %v4470_v54 = vadd.f32 0.5, %v4454_v8 }
 0xe90   : > { %6260 = vtanh.f32 %v4518_v40 }
 0xe91   : > { %v6251_v14 = vpop.eup %6250  ;;  %5435 = vmatprep.mubr.f32.mxu0 %v4544_v45 }
 0xe92   : > { %v6253_v20 = vpop.eup %6252  ;;  %v4547_v52 = vmul.f32 %v6251_v14, %v4467_v22 }
 0xe93   : > { %5436 = vmatmul.mubr.f32.gmra.mrb[112].mxu0 %v4545_v51  ;;  %v4546_v2 = vmul.f32 %v6253_v20, %v4466_v17 }
 0xe95   : > { %v6255_v18 = vpop.eup %6254  ;;  %5438 = vmatprep.mubr.f32.mxu0 %v4546_v2 }
 0xe96   : > { %v6257_v28 = vpop.eup %6256  ;;  %v4549_v4 = vmul.f32 %v6255_v18, %v4469_v41 }
 0xe97   : > { %5439 = vmatmul.mubr.f32.gmra.mrb[114].mxu0 %v4547_v52  ;;  %v4548_v36 = vmul.f32 %v6257_v28, %v4468_v12 }
 0xe99   : > { %v6259_v61 = vpop.eup %6258  ;;  %5441 = vmatprep.mubr.f32.mxu0 %v4548_v36 }
 0xe9a   : > { %v6261_v26 = vpop.eup %6260  ;;  %v4551_v38 = vmul.f32 %v6259_v61, %v4471_v30 }
 0xe9b   : > { %5442 = vmatmul.mubr.f32.gmra.mrb[116].mxu0 %v4549_v4  ;;  %v4550_v55 = vmul.f32 %v6261_v26, %v4470_v54 }
 0xe9d   : > { %5444 = vmatprep.mubr.f32.mxu0 %v4550_v55 }
 0xe9f   : > { %5445 = vmatmul.mubr.f32.gmra.mrb[118].mxu0 %v4551_v38 }
 0xf56   : > { %v5425_v53 = vpop.f32.mrb[104].mxu0 }
 0xf57   : > { %v4647_v9 = vadd.f32 %v5425_v53, %v5008_v63  ;;  %v4641_v27 = vpop.f32.mrb[105].mxu0 }
 0xf58   : > { %v4642_v50 = vadd.f32 %v5008_v63, %v4641_v27 }
 0xf59   : > { %v4721_v25 = vmax.f32 %v4647_v9, 0.0 }
 0xf5a   : > { %v4720_v0 = vmax.f32 %v4642_v50, 0.0  ;;  %v5428_v24 = vpop.f32.mrb[106].mxu0 }
 0xf5b   : > { %4738 = vst.msk [vmem:[%s8912_s23 + $0x8] sm:$0xff] %vm4736_vm2, %v4721_v25  ;;  %v4657_v48 = vadd.f32 %v5428_v24, %v5008_v63  ;;  %v4651_v29 = vpop.f32.mrb[107].mxu0 }
 0xf5c   : > { %4737 = vst.msk [vmem:[%s8912_s23] sm:$0xff] %vm4736_vm2, %v4720_v0  ;;  %v4652_v37 = vadd.f32 %v5008_v63, %v4651_v29 }
 0xf5d   : > { %v4723_v10 = vmax.f32 %v4657_v48, 0.0 }
 0xf5e   : > { %v4722_v44 = vmax.f32 %v4652_v37, 0.0  ;;  %v5431_v16 = vpop.f32.mrb[108].mxu0 }
 0xf5f   : > { %4740 = vst.msk [vmem:[%s8912_s23 + $0x18] sm:$0xff] %vm4736_vm2, %v4723_v10  ;;  %v4667_v46 = vadd.f32 %v5431_v16, %v5008_v63  ;;  %v4661_v32 = vpop.f32.mrb[109].mxu0 }
 0xf60   : > { %4739 = vst.msk [vmem:[%s8912_s23 + $0x10] sm:$0xff] %vm4736_vm2, %v4722_v44  ;;  %v4662_v56 = vadd.f32 %v5008_v63, %v4661_v32 }
 0xf61   : > { %v4725_v47 = vmax.f32 %v4667_v46, 0.0 }
 0xf62   : > { %v4724_v42 = vmax.f32 %v4662_v56, 0.0  ;;  %v5434_v39 = vpop.f32.mrb[110].mxu0 }
 0xf63   : > { %4742 = vst.msk [vmem:[%s8912_s23 + $0x28] sm:$0xff] %vm4736_vm2, %v4725_v47  ;;  %v4677_v34 = vadd.f32 %v5434_v39, %v5008_v63  ;;  %v4671_v15 = vpop.f32.mrb[111].mxu0 }
 0xf64   : > { %4741 = vst.msk [vmem:[%s8912_s23 + $0x20] sm:$0xff] %vm4736_vm2, %v4724_v42  ;;  %v4672_v11 = vadd.f32 %v5008_v63, %v4671_v15 }
 0xf65   : > { %v4727_v57 = vmax.f32 %v4677_v34, 0.0 }
 0xf66   : > { %v4726_v33 = vmax.f32 %v4672_v11, 0.0  ;;  %v5437_v13 = vpop.f32.mrb[112].mxu0 }
 0xf67   : > { %4744 = vst.msk [vmem:[%s8912_s23 + $0x38] sm:$0xff] %vm4736_vm2, %v4727_v57  ;;  %v4687_v60 = vadd.f32 %v5437_v13, %v5008_v63  ;;  %v4681_v58 = vpop.f32.mrb[113].mxu0 }
 0xf68   : > { %4743 = vst.msk [vmem:[%s8912_s23 + $0x30] sm:$0xff] %vm4736_vm2, %v4726_v33  ;;  %v4682_v5 = vadd.f32 %v5008_v63, %v4681_v58 }
 0xf69   : > { %v4729_v1 = vmax.f32 %v4687_v60, 0.0 }
 0xf6a   : > { %v4728_v23 = vmax.f32 %v4682_v5, 0.0  ;;  %v5440_v19 = vpop.f32.mrb[114].mxu0 }
 0xf6b   : > { %4746 = vst.msk [vmem:[%s8912_s23 + $0x48] sm:$0xff] %vm4736_vm2, %v4729_v1  ;;  %v4697_v62 = vadd.f32 %v5440_v19, %v5008_v63  ;;  %v4691_v6 = vpop.f32.mrb[115].mxu0 }
 0xf6c   : > { %4745 = vst.msk [vmem:[%s8912_s23 + $0x40] sm:$0xff] %vm4736_vm2, %v4728_v23  ;;  %v4692_v49 = vadd.f32 %v5008_v63, %v4691_v6 }
 0xf6d   : > { %v4731_v7 = vmax.f32 %v4697_v62, 0.0 }
 0xf6e   : > { %v4730_v43 = vmax.f32 %v4692_v49, 0.0  ;;  %v5443_v3 = vpop.f32.mrb[116].mxu0 }
 0xf6f   : > { %4748 = vst.msk [vmem:[%s8912_s23 + $0x58] sm:$0xff] %vm4736_vm2, %v4731_v7  ;;  %v4707_v31 = vadd.f32 %v5443_v3, %v5008_v63  ;;  %v4701_v40 = vpop.f32.mrb[117].mxu0 }
 0xf70   : > { %4747 = vst.msk [vmem:[%s8912_s23 + $0x50] sm:$0xff] %vm4736_vm2, %v4730_v43  ;;  %v4702_v51 = vadd.f32 %v5008_v63, %v4701_v40 }
 0xf71   : > { %v4733_v45 = vmax.f32 %v4707_v31, 0.0 }
 0xf72   : > { %v4732_v22 = vmax.f32 %v4702_v51, 0.0  ;;  %v5446_v35 = vpop.f32.mrb[118].mxu0 }
 0xf73   : > { %4750 = vst.msk [vmem:[%s8912_s23 + $0x68] sm:$0xff] %vm4736_vm2, %v4733_v45  ;;  %v4717_v14 = vadd.f32 %v5446_v35, %v5008_v63  ;;  %v4711_v17 = vpop.f32.mrb[119].mxu0 }
 0xf74   : > { %4749 = vst.msk [vmem:[%s8912_s23 + $0x60] sm:$0xff] %vm4736_vm2, %v4732_v22  ;;  %v4712_v21 = vadd.f32 %v5008_v63, %v4711_v17 }
 0xf75   : > { %v4735_v20 = vmax.f32 %v4717_v14, 0.0 }
 0xf76   : > { %v4734_v52 = vmax.f32 %v4712_v21, 0.0 }
 0xf77   : > { %4752 = vst.msk [vmem:[%s8912_s23 + $0x78] sm:$0xff] %vm4736_vm2, %v4735_v20 }
 0xf78   : > { %4751 = vst.msk [vmem:[%s8912_s23 + $0x70] sm:$0xff] %vm4736_vm2, %v4734_v52 }
 0xf79 PF: > { %s25_s21 = sadd.s32 1, %s6421_s21  }
 0xf7a   : > { %p22_p7 = scmp.ge.s32.totalorder %s25_s21, 4  }
 0xf7c   :  { %24 = sbr.rel (!%p22_p7) target bundleno = 6 (0x6), region = 119 }
 0xf83   :  { %4775 = vsyncpa [#allocation3], 1 }
 0xf84   :  { %4777 = vsyncpa [#allocation3 + $0x1], 1 }
 0xf85   :  { %4778 = vsyncpa [#allocation5], 1 }
 0xf86   :  { %4779 = vsyncpa [#allocation8], 1 }

</bundles_post_ra>
